<compile_context>
chip_gen: v7x
topology: tpu7x:2x2x1
jax: 0.10.0
libtpu: 0.0.40
codegen_flags: <defaults>
</compile_context>

<pallas_src>
import functools

import jax
import jax.numpy as jnp
from jax import lax
from jax.experimental import pallas as pl
from jax.experimental.pallas import tpu as pltpu


# ----------------------------------------------------------------------------
# In-kernel building block: dilated "same" conv (BN scale pre-folded), on a
# channels-major (Cin, N*HW) activation.
# ----------------------------------------------------------------------------
def _conv_apply(x2d, wflat, bias, conf, masks_ref, mask_idx, W, NHW):
    """x2d:(Cin,NHW)  wflat:(Cout,KH*KW*Cin) scale-folded  bias:(Cout,1)."""
    KH, KW, ph, pw, dh, dw = conf
    patches = []
    for kh in range(KH):
        for kw in range(KW):
            oh = kh * dh - ph                      # source-row offset of tap
            ow = kw * dw - pw                      # source-col offset of tap
            s = oh * W + ow                        # offset along flat pixels
            # Lane rotation so patch[:, n*HW + h*W + w] == x[:, ..., h+oh, w+ow].
            p = x2d if s == 0 else pltpu.roll(x2d, shift=(-s) % NHW, axis=1)
            if (oh, ow) != (0, 0):
                row = mask_idx[(oh, ow)]
                # Precomputed 0/1 f32 mask: zeros out-of-image (and cross-image
                # wrap) source pixels -> implements "same" zero padding.
                p = p * masks_ref[row:row + 1, :]
            patches.append(p)
    # im2col-style tap stack -> one fat-K MXU contraction (K = KH*KW*Cin).
    pcat = patches[0] if len(patches) == 1 else jnp.concatenate(patches, axis=0)
    y = jnp.dot(wflat, pcat, preferred_element_type=jnp.float32)
    return y + bias


def _rfb_kernel(*refs, chain_confs, mask_idx, W, cout):
    """Fused RFB_modified forward over the whole (batch-flattened) image set."""
    x_ref, masks_ref, wfused_ref = refs[0], refs[1], refs[2]
    w_refs = refs[3:13]                    # branch1[1:4], branch2[1:4],
    b_ref = refs[13]                       #   branch3[1:4], conv_cat
    o_ref = refs[14]

    x0 = x_ref[...].astype(jnp.float32)    # (Cin, N*HW)
    biases = b_ref[...]                    # (Cout, 15), canonical conv order
    NHW = x0.shape[1]

    def bias_col(j):                       # (Cout, 1) static lane slice
        return biases[:, j:j + 1]

    # --- five fused 1x1 convs on the input: one M=5*Cout matmul -------------
    # row blocks: branch0[0] | branch1[0] | branch2[0] | branch3[0] | conv_res
    y5 = jnp.dot(wfused_ref[...], x0, preferred_element_type=jnp.float32)
    b0_out = y5[0 * cout:1 * cout] + bias_col(0)
    h1 = y5[1 * cout:2 * cout] + bias_col(1)
    h2 = y5[2 * cout:3 * cout] + bias_col(5)
    h3 = y5[3 * cout:4 * cout] + bias_col(9)
    res = y5[4 * cout:5 * cout] + bias_col(14)

    def conv(h, wi, bj):
        return _conv_apply(h, w_refs[wi][...], bias_col(bj), chain_confs[wi],
                           masks_ref, mask_idx, W, NHW)

    # --- branch chains (stay VMEM/vreg resident) ----------------------------
    outs = [b0_out]
    for h, w_off, b_off in ((h1, 0, 2), (h2, 3, 6), (h3, 6, 10)):
        for k in range(3):
            h = conv(h, w_off + k, b_off + k)
        outs.append(h)

    x_cat = jnp.concatenate(outs, axis=0)          # (4*Cout, N*HW), never HBM
    y_cat = conv(x_cat, 9, 13)                     # conv_cat: 3x3, pad 1
    o_ref[...] = jnp.maximum(y_cat + res, 0.0).astype(o_ref.dtype)


# ----------------------------------------------------------------------------
# Parameter construction (deterministic, synthetic — no checkpoint load)
# ----------------------------------------------------------------------------
def make_basic_conv(key, cin, cout, kh, kw, eps=1e-5):
    kw_, kg, kb, km, kv = jax.random.split(key, 5)
    w = jax.random.normal(kw_, (kh, kw, cin, cout), jnp.float32) * 0.1
    gamma = 1.0 + 0.1 * jax.random.normal(kg, (cout,), jnp.float32)
    beta = 0.1 * jax.random.normal(kb, (cout,), jnp.float32)
    mean = 0.1 * jax.random.normal(km, (cout,), jnp.float32)
    var = 1.0 + 0.5 * jax.random.uniform(kv, (cout,), jnp.float32)
    scale = gamma / jnp.sqrt(var + eps)          # fold eval-mode BN into affine
    bias = beta - mean * scale
    return {"w": w, "scale": scale, "bias": bias}


def make_rfb_params(key, in_channel, out_channel):
    keys = iter(jax.random.split(key, 32))
    p = {}
    p["branch0"] = [make_basic_conv(next(keys), in_channel, out_channel, 1, 1)]
    p["branch1"] = [
        make_basic_conv(next(keys), in_channel, out_channel, 1, 1),
        make_basic_conv(next(keys), out_channel, out_channel, 1, 3),
        make_basic_conv(next(keys), out_channel, out_channel, 3, 1),
        make_basic_conv(next(keys), out_channel, out_channel, 3, 3),
    ]
    p["branch2"] = [
        make_basic_conv(next(keys), in_channel, out_channel, 1, 1),
        make_basic_conv(next(keys), out_channel, out_channel, 1, 5),
        make_basic_conv(next(keys), out_channel, out_channel, 5, 1),
        make_basic_conv(next(keys), out_channel, out_channel, 3, 3),
    ]
    p["branch3"] = [
        make_basic_conv(next(keys), in_channel, out_channel, 1, 1),
        make_basic_conv(next(keys), out_channel, out_channel, 1, 7),
        make_basic_conv(next(keys), out_channel, out_channel, 7, 1),
        make_basic_conv(next(keys), out_channel, out_channel, 3, 3),
    ]
    p["conv_cat"] = make_basic_conv(next(keys), 4 * out_channel, out_channel, 3, 3)
    p["conv_res"] = make_basic_conv(next(keys), in_channel, out_channel, 1, 1)
    return p


# padding / dilation schedule matching the PyTorch module
_BRANCH_CONF = {
    "branch0": [((0, 0), (1, 1))],
    "branch1": [((0, 0), (1, 1)), ((0, 1), (1, 1)), ((1, 0), (1, 1)), ((3, 3), (3, 3))],
    "branch2": [((0, 0), (1, 1)), ((0, 2), (1, 1)), ((2, 0), (1, 1)), ((5, 5), (5, 5))],
    "branch3": [((0, 0), (1, 1)), ((0, 3), (1, 1)), ((3, 0), (1, 1)), ((7, 7), (7, 7))],
}


# ----------------------------------------------------------------------------
# Pallas forward (single fused pallas_call) and pure-JAX reference
# ----------------------------------------------------------------------------
def rfb_forward_pallas(x_nchw, params):
    N, cin, H, W = x_nchw.shape
    HW = H * W
    NHW = N * HW
    cout = params["conv_res"]["w"].shape[3]

    def fold(p):
        """Tap-major (Cout, KH*KW*Cin) weight with BN scale folded in."""
        w, scale = p["w"], p["scale"]
        KH, KW, ci, co = w.shape
        wflat = jnp.transpose(w, (3, 0, 1, 2)).reshape(co, KH * KW * ci)
        return (scale.reshape(co, 1) * wflat).astype(jnp.float32)

    # Five 1x1 convs reading x, stacked into one (5*Cout, Cin) weight.
    w_fused = jnp.concatenate(
        [fold(params["branch0"][0]), fold(params["branch1"][0]),
         fold(params["branch2"][0]), fold(params["branch3"][0]),
         fold(params["conv_res"])], axis=0)

    # Ten chained convs: branch1[1:4], branch2[1:4], branch3[1:4], conv_cat.
    chain = ([(params["branch1"][k], _BRANCH_CONF["branch1"][k]) for k in (1, 2, 3)]
             + [(params["branch2"][k], _BRANCH_CONF["branch2"][k]) for k in (1, 2, 3)]
             + [(params["branch3"][k], _BRANCH_CONF["branch3"][k]) for k in (1, 2, 3)]
             + [(params["conv_cat"], ((1, 1), (1, 1)))])
    chain_ws, chain_confs = [], []
    for p, (pad, dil) in chain:
        kh, kw = p["w"].shape[:2]
        chain_ws.append(fold(p))
        chain_confs.append((kh, kw, pad[0], pad[1], dil[0], dil[1]))

    # All 15 biases packed into one lane-dense (Cout, 15) array.
    # canonical order: 0 b0[0] | 1-4 b1[0..3] | 5-8 b2[0..3] | 9-12 b3[0..3]
    #                  | 13 conv_cat | 14 conv_res
    bias_list = ([params["branch0"][0]["bias"]]
                 + [params["branch1"][k]["bias"] for k in range(4)]
                 + [params["branch2"][k]["bias"] for k in range(4)]
                 + [params["branch3"][k]["bias"] for k in range(4)]
                 + [params["conv_cat"]["bias"], params["conv_res"]["bias"]])
    bias_pack = jnp.stack(bias_list, axis=1).astype(jnp.float32)     # (cout, 15)

    # Distinct nonzero tap offsets across all multi-tap convs -> mask rows.
    offsets, seen = [], set()
    for (KH, KW, ph, pw, dh, dw) in chain_confs:
        for kh in range(KH):
            for kw in range(KW):
                oh, ow = kh * dh - ph, kw * dw - pw
                if (oh, ow) != (0, 0) and (oh, ow) not in seen:
                    seen.add((oh, ow))
                    offsets.append((oh, ow))
    max_oh = max(abs(o[0]) for o in offsets)
    max_ow = max(abs(o[1]) for o in offsets)
    # roll+mask zero padding is only valid while taps stay within one image row/col
    assert H > max_oh and W > max_ow, (H, W, max_oh, max_ow)
    mask_idx = {o: i for i, o in enumerate(offsets)}

    # Host-side boundary masks, one row per distinct offset, tiled per image.
    flat = jnp.arange(HW, dtype=jnp.int32)
    hh, ww = flat // W, flat % W
    rows = []
    for oh, ow in offsets:
        valid = jnp.ones((HW,), jnp.bool_)
        if oh:
            valid = valid & (hh + oh >= 0) & (hh + oh < H)
        if ow:
            valid = valid & (ww + ow >= 0) & (ww + ow < W)
        rows.append(valid)
    masks = jnp.tile(jnp.stack(rows).astype(jnp.float32), (1, N))   # (n_masks, N*HW)

    # Batch flattened into the lane axis: (Cin, N*H*W), lanes ordered [n][h][w].
    x2d = jnp.transpose(x_nchw, (1, 0, 2, 3)).reshape(cin, NHW).astype(jnp.float32)

    flat_args = [x2d, masks, w_fused] + chain_ws + [bias_pack]
    in_specs = [pl.BlockSpec(a.shape, lambda n: (0, 0)) for a in flat_args]

    kernel = functools.partial(_rfb_kernel, chain_confs=tuple(chain_confs),
                               mask_idx=mask_idx, W=W, cout=cout)

    out = pl.pallas_call(
        kernel,
        out_shape=jax.ShapeDtypeStruct((cout, NHW), jnp.float32),
        grid=(1,),
        in_specs=in_specs,
        out_specs=pl.BlockSpec((cout, NHW), lambda n: (0, 0)),
        compiler_params=pltpu.CompilerParams(
            dimension_semantics=("arbitrary",)),
    )(*flat_args)
    return jnp.transpose(out.reshape(cout, N, H, W), (1, 0, 2, 3))   # -> NCHW


def _conv_bn_ref(x, w, scale, bias, pad, dil):
    y = lax.conv_general_dilated(
        x, w, window_strides=(1, 1),
        padding=[(pad[0], pad[0]), (pad[1], pad[1])],
        rhs_dilation=dil,
        dimension_numbers=("NHWC", "HWIO", "NHWC"))
    return y * scale.reshape(1, 1, 1, -1) + bias.reshape(1, 1, 1, -1)


def rfb_forward_ref(x_nchw, params):
    x = jnp.transpose(x_nchw, (0, 2, 3, 1))
    branches = []
    for name in ("branch0", "branch1", "branch2", "branch3"):
        h = x
        for p, (pad, dil) in zip(params[name], _BRANCH_CONF[name]):
            h = _conv_bn_ref(h, p["w"], p["scale"], p["bias"], pad, dil)
        branches.append(h)
    x_cat = jnp.concatenate(branches, axis=-1)
    x_cat = _conv_bn_ref(x_cat, params["conv_cat"]["w"],
                         params["conv_cat"]["scale"],
                         params["conv_cat"]["bias"], (1, 1), (1, 1))
    x_res = _conv_bn_ref(x, params["conv_res"]["w"],
                         params["conv_res"]["scale"],
                         params["conv_res"]["bias"], (0, 0), (1, 1))
    out = jnp.maximum(x_cat + x_res, 0.0)
    return jnp.transpose(out, (0, 3, 1, 2))


# ----------------------------------------------------------------------------
if __name__ == "__main__":
    in_channel, out_channel = 4, 8
    N, H, W = 2, 16, 16

    key = jax.random.PRNGKey(0)
    kx, kp = jax.random.split(key)
    x = jax.random.normal(kx, (N, in_channel, H, W), jnp.float32)   # NCHW input
    params = make_rfb_params(kp, in_channel, out_channel)

    out = jax.block_until_ready(rfb_forward_pallas(x, params))
    assert out.shape == (N, out_channel, H, W), out.shape

    ref = jax.block_until_ready(rfb_forward_ref(x, params))
    err = float(jnp.max(jnp.abs(out - ref)))
    assert err < 1e-3, f"mismatch vs reference: {err}"

    print("KERNEL_OK")
</pallas_src>

<mosaic_0001>
module attributes {stable_mosaic.version = 11 : i64} {
  func.func @_rfb_kernel(%arg0: i32, %arg1: memref<4x512xf32, #tpu.memory_space<vmem>>, %arg2: memref<36x512xf32, #tpu.memory_space<vmem>>, %arg3: memref<40x4xf32, #tpu.memory_space<vmem>>, %arg4: memref<8x24xf32, #tpu.memory_space<vmem>>, %arg5: memref<8x24xf32, #tpu.memory_space<vmem>>, %arg6: memref<8x72xf32, #tpu.memory_space<vmem>>, %arg7: memref<8x40xf32, #tpu.memory_space<vmem>>, %arg8: memref<8x40xf32, #tpu.memory_space<vmem>>, %arg9: memref<8x72xf32, #tpu.memory_space<vmem>>, %arg10: memref<8x56xf32, #tpu.memory_space<vmem>>, %arg11: memref<8x56xf32, #tpu.memory_space<vmem>>, %arg12: memref<8x72xf32, #tpu.memory_space<vmem>>, %arg13: memref<8x288xf32, #tpu.memory_space<vmem>>, %arg14: memref<8x15xf32, #tpu.memory_space<vmem>>, %arg15: memref<8x512xf32, #tpu.memory_space<vmem>>) attributes {dimension_semantics = [#tpu.dimension_semantics<arbitrary>], iteration_bounds = array<i64: 1>, scalar_prefetch = 0 : i64, scratch_operands = 0 : i64, tpu.core_type = #tpu.core_type<tc>, window_params = [{pipeline_mode = #tpu.pipeline_mode<synchronous>, transform_indices = @transform_0, window_bounds = array<i64: 4, 512>}, {pipeline_mode = #tpu.pipeline_mode<synchronous>, transform_indices = @transform_1, window_bounds = array<i64: 36, 512>}, {pipeline_mode = #tpu.pipeline_mode<synchronous>, transform_indices = @transform_2, window_bounds = array<i64: 40, 4>}, {pipeline_mode = #tpu.pipeline_mode<synchronous>, transform_indices = @transform_3, window_bounds = array<i64: 8, 24>}, {pipeline_mode = #tpu.pipeline_mode<synchronous>, transform_indices = @transform_4, window_bounds = array<i64: 8, 24>}, {pipeline_mode = #tpu.pipeline_mode<synchronous>, transform_indices = @transform_5, window_bounds = array<i64: 8, 72>}, {pipeline_mode = #tpu.pipeline_mode<synchronous>, transform_indices = @transform_6, window_bounds = array<i64: 8, 40>}, {pipeline_mode = #tpu.pipeline_mode<synchronous>, transform_indices = @transform_7, window_bounds = array<i64: 8, 40>}, {pipeline_mode = #tpu.pipeline_mode<synchronous>, transform_indices = @transform_8, window_bounds = array<i64: 8, 72>}, {pipeline_mode = #tpu.pipeline_mode<synchronous>, transform_indices = @transform_9, window_bounds = array<i64: 8, 56>}, {pipeline_mode = #tpu.pipeline_mode<synchronous>, transform_indices = @transform_10, window_bounds = array<i64: 8, 56>}, {pipeline_mode = #tpu.pipeline_mode<synchronous>, transform_indices = @transform_11, window_bounds = array<i64: 8, 72>}, {pipeline_mode = #tpu.pipeline_mode<synchronous>, transform_indices = @transform_12, window_bounds = array<i64: 8, 288>}, {pipeline_mode = #tpu.pipeline_mode<synchronous>, transform_indices = @transform_13, window_bounds = array<i64: 8, 15>}, {pipeline_mode = #tpu.pipeline_mode<synchronous>, transform_indices = @transform_14, window_bounds = array<i64: 8, 512>}]} {
    %c0 = arith.constant 0 : index
    %c0_0 = arith.constant 0 : index
    %0 = vector.load %arg1[%c0, %c0_0] : memref<4x512xf32, #tpu.memory_space<vmem>>, vector<4x512xf32>
    %c0_1 = arith.constant 0 : index
    %c0_2 = arith.constant 0 : index
    %1 = vector.load %arg14[%c0_1, %c0_2] : memref<8x15xf32, #tpu.memory_space<vmem>>, vector<8x15xf32>
    %c0_3 = arith.constant 0 : index
    %c0_4 = arith.constant 0 : index
    %2 = vector.load %arg3[%c0_3, %c0_4] : memref<40x4xf32, #tpu.memory_space<vmem>>, vector<40x4xf32>
    %cst = arith.constant dense<0.000000e+00> : vector<40x512xf32>
    %3 = tpu.matmul %2, %0, %cst {dimension_numbers = #tpu.dot_dimension_numbers<[1], [0], [0], [1], [0, 0, 1, 1], [], []>} : vector<40x4xf32>, vector<4x512xf32>, vector<40x512xf32> -> vector<40x512xf32>
    %4 = vector.extract_strided_slice %3 {offsets = [0, 0], sizes = [8, 512], strides = [1, 1]} : vector<40x512xf32> to vector<8x512xf32>
    %5 = vector.extract_strided_slice %1 {offsets = [0, 0], sizes = [8, 1], strides = [1, 1]} : vector<8x15xf32> to vector<8x1xf32>
    %6 = vector.broadcast %5 : vector<8x1xf32> to vector<8x512xf32>
    %7 = arith.addf %4, %6 : vector<8x512xf32>
    %8 = vector.extract_strided_slice %3 {offsets = [8, 0], sizes = [8, 512], strides = [1, 1]} : vector<40x512xf32> to vector<8x512xf32>
    %9 = vector.extract_strided_slice %1 {offsets = [0, 1], sizes = [8, 1], strides = [1, 1]} : vector<8x15xf32> to vector<8x1xf32>
    %10 = vector.broadcast %9 : vector<8x1xf32> to vector<8x512xf32>
    %11 = arith.addf %8, %10 : vector<8x512xf32>
    %12 = vector.extract_strided_slice %3 {offsets = [16, 0], sizes = [8, 512], strides = [1, 1]} : vector<40x512xf32> to vector<8x512xf32>
    %13 = vector.extract_strided_slice %1 {offsets = [0, 5], sizes = [8, 1], strides = [1, 1]} : vector<8x15xf32> to vector<8x1xf32>
    %14 = vector.broadcast %13 : vector<8x1xf32> to vector<8x512xf32>
    %15 = arith.addf %12, %14 : vector<8x512xf32>
    %16 = vector.extract_strided_slice %3 {offsets = [24, 0], sizes = [8, 512], strides = [1, 1]} : vector<40x512xf32> to vector<8x512xf32>
    %17 = vector.extract_strided_slice %1 {offsets = [0, 9], sizes = [8, 1], strides = [1, 1]} : vector<8x15xf32> to vector<8x1xf32>
    %18 = vector.broadcast %17 : vector<8x1xf32> to vector<8x512xf32>
    %19 = arith.addf %16, %18 : vector<8x512xf32>
    %20 = vector.extract_strided_slice %3 {offsets = [32, 0], sizes = [8, 512], strides = [1, 1]} : vector<40x512xf32> to vector<8x512xf32>
    %21 = vector.extract_strided_slice %1 {offsets = [0, 14], sizes = [8, 1], strides = [1, 1]} : vector<8x15xf32> to vector<8x1xf32>
    %22 = vector.broadcast %21 : vector<8x1xf32> to vector<8x512xf32>
    %23 = arith.addf %20, %22 : vector<8x512xf32>
    %c0_5 = arith.constant 0 : index
    %c0_6 = arith.constant 0 : index
    %24 = vector.load %arg4[%c0_5, %c0_6] : memref<8x24xf32, #tpu.memory_space<vmem>>, vector<8x24xf32>
    %25 = vector.extract_strided_slice %1 {offsets = [0, 2], sizes = [8, 1], strides = [1, 1]} : vector<8x15xf32> to vector<8x1xf32>
    %c1_i32 = arith.constant 1 : i32
    %26 = tpu.dynamic_rotate %11 by %c1_i32 dim 1 : vector<8x512xf32>, i32 -> vector<8x512xf32>
    %c0_7 = arith.constant 0 : index
    %c0_8 = arith.constant 0 : index
    %27 = vector.load %arg2[%c0_7, %c0_8] : memref<36x512xf32, #tpu.memory_space<vmem>>, vector<1x512xf32>
    %28 = vector.broadcast %27 : vector<1x512xf32> to vector<8x512xf32>
    %29 = arith.mulf %26, %28 : vector<8x512xf32>
    %c511_i32 = arith.constant 511 : i32
    %30 = tpu.dynamic_rotate %11 by %c511_i32 dim 1 : vector<8x512xf32>, i32 -> vector<8x512xf32>
    %c1 = arith.constant 1 : index
    %c0_9 = arith.constant 0 : index
    %31 = vector.load %arg2[%c1, %c0_9] : memref<36x512xf32, #tpu.memory_space<vmem>>, vector<1x512xf32>
    %32 = vector.broadcast %31 : vector<1x512xf32> to vector<8x512xf32>
    %33 = arith.mulf %30, %32 : vector<8x512xf32>
    %34 = tpu.concatenate %29, %11, %33 in 0 : vector<8x512xf32>, vector<8x512xf32>, vector<8x512xf32> -> vector<24x512xf32>
    %cst_10 = arith.constant dense<0.000000e+00> : vector<8x512xf32>
    %35 = tpu.matmul %24, %34, %cst_10 {dimension_numbers = #tpu.dot_dimension_numbers<[1], [0], [0], [1], [0, 0, 1, 1], [], []>} : vector<8x24xf32>, vector<24x512xf32>, vector<8x512xf32> -> vector<8x512xf32>
    %36 = vector.broadcast %25 : vector<8x1xf32> to vector<8x512xf32>
    %37 = arith.addf %35, %36 : vector<8x512xf32>
    %c0_11 = arith.constant 0 : index
    %c0_12 = arith.constant 0 : index
    %38 = vector.load %arg5[%c0_11, %c0_12] : memref<8x24xf32, #tpu.memory_space<vmem>>, vector<8x24xf32>
    %39 = vector.extract_strided_slice %1 {offsets = [0, 3], sizes = [8, 1], strides = [1, 1]} : vector<8x15xf32> to vector<8x1xf32>
    %c16_i32 = arith.constant 16 : i32
    %40 = tpu.dynamic_rotate %37 by %c16_i32 dim 1 : vector<8x512xf32>, i32 -> vector<8x512xf32>
    %c2 = arith.constant 2 : index
    %c0_13 = arith.constant 0 : index
    %41 = vector.load %arg2[%c2, %c0_13] : memref<36x512xf32, #tpu.memory_space<vmem>>, vector<1x512xf32>
    %42 = vector.broadcast %41 : vector<1x512xf32> to vector<8x512xf32>
    %43 = arith.mulf %40, %42 : vector<8x512xf32>
    %c496_i32 = arith.constant 496 : i32
    %44 = tpu.dynamic_rotate %37 by %c496_i32 dim 1 : vector<8x512xf32>, i32 -> vector<8x512xf32>
    %c3 = arith.constant 3 : index
    %c0_14 = arith.constant 0 : index
    %45 = vector.load %arg2[%c3, %c0_14] : memref<36x512xf32, #tpu.memory_space<vmem>>, vector<1x512xf32>
    %46 = vector.broadcast %45 : vector<1x512xf32> to vector<8x512xf32>
    %47 = arith.mulf %44, %46 : vector<8x512xf32>
    %48 = tpu.concatenate %43, %37, %47 in 0 : vector<8x512xf32>, vector<8x512xf32>, vector<8x512xf32> -> vector<24x512xf32>
    %cst_15 = arith.constant dense<0.000000e+00> : vector<8x512xf32>
    %49 = tpu.matmul %38, %48, %cst_15 {dimension_numbers = #tpu.dot_dimension_numbers<[1], [0], [0], [1], [0, 0, 1, 1], [], []>} : vector<8x24xf32>, vector<24x512xf32>, vector<8x512xf32> -> vector<8x512xf32>
    %50 = vector.broadcast %39 : vector<8x1xf32> to vector<8x512xf32>
    %51 = arith.addf %49, %50 : vector<8x512xf32>
    %c0_16 = arith.constant 0 : index
    %c0_17 = arith.constant 0 : index
    %52 = vector.load %arg6[%c0_16, %c0_17] : memref<8x72xf32, #tpu.memory_space<vmem>>, vector<8x72xf32>
    %53 = vector.extract_strided_slice %1 {offsets = [0, 4], sizes = [8, 1], strides = [1, 1]} : vector<8x15xf32> to vector<8x1xf32>
    %c51_i32 = arith.constant 51 : i32
    %54 = tpu.dynamic_rotate %51 by %c51_i32 dim 1 : vector<8x512xf32>, i32 -> vector<8x512xf32>
    %c4 = arith.constant 4 : index
    %c0_18 = arith.constant 0 : index
    %55 = vector.load %arg2[%c4, %c0_18] : memref<36x512xf32, #tpu.memory_space<vmem>>, vector<1x512xf32>
    %56 = vector.broadcast %55 : vector<1x512xf32> to vector<8x512xf32>
    %57 = arith.mulf %54, %56 : vector<8x512xf32>
    %c48_i32 = arith.constant 48 : i32
    %58 = tpu.dynamic_rotate %51 by %c48_i32 dim 1 : vector<8x512xf32>, i32 -> vector<8x512xf32>
    %c5 = arith.constant 5 : index
    %c0_19 = arith.constant 0 : index
    %59 = vector.load %arg2[%c5, %c0_19] : memref<36x512xf32, #tpu.memory_space<vmem>>, vector<1x512xf32>
    %60 = vector.broadcast %59 : vector<1x512xf32> to vector<8x512xf32>
    %61 = arith.mulf %58, %60 : vector<8x512xf32>
    %c45_i32 = arith.constant 45 : i32
    %62 = tpu.dynamic_rotate %51 by %c45_i32 dim 1 : vector<8x512xf32>, i32 -> vector<8x512xf32>
    %c6 = arith.constant 6 : index
    %c0_20 = arith.constant 0 : index
    %63 = vector.load %arg2[%c6, %c0_20] : memref<36x512xf32, #tpu.memory_space<vmem>>, vector<1x512xf32>
    %64 = vector.broadcast %63 : vector<1x512xf32> to vector<8x512xf32>
    %65 = arith.mulf %62, %64 : vector<8x512xf32>
    %c3_i32 = arith.constant 3 : i32
    %66 = tpu.dynamic_rotate %51 by %c3_i32 dim 1 : vector<8x512xf32>, i32 -> vector<8x512xf32>
    %c7 = arith.constant 7 : index
    %c0_21 = arith.constant 0 : index
    %67 = vector.load %arg2[%c7, %c0_21] : memref<36x512xf32, #tpu.memory_space<vmem>>, vector<1x512xf32>
    %68 = vector.broadcast %67 : vector<1x512xf32> to vector<8x512xf32>
    %69 = arith.mulf %66, %68 : vector<8x512xf32>
    %c509_i32 = arith.constant 509 : i32
    %70 = tpu.dynamic_rotate %51 by %c509_i32 dim 1 : vector<8x512xf32>, i32 -> vector<8x512xf32>
    %c8 = arith.constant 8 : index
    %c0_22 = arith.constant 0 : index
    %71 = vector.load %arg2[%c8, %c0_22] : memref<36x512xf32, #tpu.memory_space<vmem>>, vector<1x512xf32>
    %72 = vector.broadcast %71 : vector<1x512xf32> to vector<8x512xf32>
    %73 = arith.mulf %70, %72 : vector<8x512xf32>
    %c467_i32 = arith.constant 467 : i32
    %74 = tpu.dynamic_rotate %51 by %c467_i32 dim 1 : vector<8x512xf32>, i32 -> vector<8x512xf32>
    %c9 = arith.constant 9 : index
    %c0_23 = arith.constant 0 : index
    %75 = vector.load %arg2[%c9, %c0_23] : memref<36x512xf32, #tpu.memory_space<vmem>>, vector<1x512xf32>
    %76 = vector.broadcast %75 : vector<1x512xf32> to vector<8x512xf32>
    %77 = arith.mulf %74, %76 : vector<8x512xf32>
    %c464_i32 = arith.constant 464 : i32
    %78 = tpu.dynamic_rotate %51 by %c464_i32 dim 1 : vector<8x512xf32>, i32 -> vector<8x512xf32>
    %c10 = arith.constant 10 : index
    %c0_24 = arith.constant 0 : index
    %79 = vector.load %arg2[%c10, %c0_24] : memref<36x512xf32, #tpu.memory_space<vmem>>, vector<1x512xf32>
    %80 = vector.broadcast %79 : vector<1x512xf32> to vector<8x512xf32>
    %81 = arith.mulf %78, %80 : vector<8x512xf32>
    %c461_i32 = arith.constant 461 : i32
    %82 = tpu.dynamic_rotate %51 by %c461_i32 dim 1 : vector<8x512xf32>, i32 -> vector<8x512xf32>
    %c11 = arith.constant 11 : index
    %c0_25 = arith.constant 0 : index
    %83 = vector.load %arg2[%c11, %c0_25] : memref<36x512xf32, #tpu.memory_space<vmem>>, vector<1x512xf32>
    %84 = vector.broadcast %83 : vector<1x512xf32> to vector<8x512xf32>
    %85 = arith.mulf %82, %84 : vector<8x512xf32>
    %86 = tpu.concatenate %57, %61, %65, %69, %51, %73, %77, %81, %85 in 0 : vector<8x512xf32>, vector<8x512xf32>, vector<8x512xf32>, vector<8x512xf32>, vector<8x512xf32>, vector<8x512xf32>, vector<8x512xf32>, vector<8x512xf32>, vector<8x512xf32> -> vector<72x512xf32>
    %cst_26 = arith.constant dense<0.000000e+00> : vector<8x512xf32>
    %87 = tpu.matmul %52, %86, %cst_26 {dimension_numbers = #tpu.dot_dimension_numbers<[1], [0], [0], [1], [0, 0, 1, 1], [], []>} : vector<8x72xf32>, vector<72x512xf32>, vector<8x512xf32> -> vector<8x512xf32>
    %88 = vector.broadcast %53 : vector<8x1xf32> to vector<8x512xf32>
    %89 = arith.addf %87, %88 : vector<8x512xf32>
    %c0_27 = arith.constant 0 : index
    %c0_28 = arith.constant 0 : index
    %90 = vector.load %arg7[%c0_27, %c0_28] : memref<8x40xf32, #tpu.memory_space<vmem>>, vector<8x40xf32>
    %91 = vector.extract_strided_slice %1 {offsets = [0, 6], sizes = [8, 1], strides = [1, 1]} : vector<8x15xf32> to vector<8x1xf32>
    %c2_i32 = arith.constant 2 : i32
    %92 = tpu.dynamic_rotate %15 by %c2_i32 dim 1 : vector<8x512xf32>, i32 -> vector<8x512xf32>
    %c12 = arith.constant 12 : index
    %c0_29 = arith.constant 0 : index
    %93 = vector.load %arg2[%c12, %c0_29] : memref<36x512xf32, #tpu.memory_space<vmem>>, vector<1x512xf32>
    %94 = vector.broadcast %93 : vector<1x512xf32> to vector<8x512xf32>
    %95 = arith.mulf %92, %94 : vector<8x512xf32>
    %c1_i32_30 = arith.constant 1 : i32
    %96 = tpu.dynamic_rotate %15 by %c1_i32_30 dim 1 : vector<8x512xf32>, i32 -> vector<8x512xf32>
    %c0_31 = arith.constant 0 : index
    %c0_32 = arith.constant 0 : index
    %97 = vector.load %arg2[%c0_31, %c0_32] : memref<36x512xf32, #tpu.memory_space<vmem>>, vector<1x512xf32>
    %98 = vector.broadcast %97 : vector<1x512xf32> to vector<8x512xf32>
    %99 = arith.mulf %96, %98 : vector<8x512xf32>
    %c511_i32_33 = arith.constant 511 : i32
    %100 = tpu.dynamic_rotate %15 by %c511_i32_33 dim 1 : vector<8x512xf32>, i32 -> vector<8x512xf32>
    %c1_34 = arith.constant 1 : index
    %c0_35 = arith.constant 0 : index
    %101 = vector.load %arg2[%c1_34, %c0_35] : memref<36x512xf32, #tpu.memory_space<vmem>>, vector<1x512xf32>
    %102 = vector.broadcast %101 : vector<1x512xf32> to vector<8x512xf32>
    %103 = arith.mulf %100, %102 : vector<8x512xf32>
    %c510_i32 = arith.constant 510 : i32
    %104 = tpu.dynamic_rotate %15 by %c510_i32 dim 1 : vector<8x512xf32>, i32 -> vector<8x512xf32>
    %c13 = arith.constant 13 : index
    %c0_36 = arith.constant 0 : index
    %105 = vector.load %arg2[%c13, %c0_36] : memref<36x512xf32, #tpu.memory_space<vmem>>, vector<1x512xf32>
    %106 = vector.broadcast %105 : vector<1x512xf32> to vector<8x512xf32>
    %107 = arith.mulf %104, %106 : vector<8x512xf32>
    %108 = tpu.concatenate %95, %99, %15, %103, %107 in 0 : vector<8x512xf32>, vector<8x512xf32>, vector<8x512xf32>, vector<8x512xf32>, vector<8x512xf32> -> vector<40x512xf32>
    %cst_37 = arith.constant dense<0.000000e+00> : vector<8x512xf32>
    %109 = tpu.matmul %90, %108, %cst_37 {dimension_numbers = #tpu.dot_dimension_numbers<[1], [0], [0], [1], [0, 0, 1, 1], [], []>} : vector<8x40xf32>, vector<40x512xf32>, vector<8x512xf32> -> vector<8x512xf32>
    %110 = vector.broadcast %91 : vector<8x1xf32> to vector<8x512xf32>
    %111 = arith.addf %109, %110 : vector<8x512xf32>
    %c0_38 = arith.constant 0 : index
    %c0_39 = arith.constant 0 : index
    %112 = vector.load %arg8[%c0_38, %c0_39] : memref<8x40xf32, #tpu.memory_space<vmem>>, vector<8x40xf32>
    %113 = vector.extract_strided_slice %1 {offsets = [0, 7], sizes = [8, 1], strides = [1, 1]} : vector<8x15xf32> to vector<8x1xf32>
    %c32_i32 = arith.constant 32 : i32
    %114 = tpu.dynamic_rotate %111 by %c32_i32 dim 1 : vector<8x512xf32>, i32 -> vector<8x512xf32>
    %c14 = arith.constant 14 : index
    %c0_40 = arith.constant 0 : index
    %115 = vector.load %arg2[%c14, %c0_40] : memref<36x512xf32, #tpu.memory_space<vmem>>, vector<1x512xf32>
    %116 = vector.broadcast %115 : vector<1x512xf32> to vector<8x512xf32>
    %117 = arith.mulf %114, %116 : vector<8x512xf32>
    %c16_i32_41 = arith.constant 16 : i32
    %118 = tpu.dynamic_rotate %111 by %c16_i32_41 dim 1 : vector<8x512xf32>, i32 -> vector<8x512xf32>
    %c2_42 = arith.constant 2 : index
    %c0_43 = arith.constant 0 : index
    %119 = vector.load %arg2[%c2_42, %c0_43] : memref<36x512xf32, #tpu.memory_space<vmem>>, vector<1x512xf32>
    %120 = vector.broadcast %119 : vector<1x512xf32> to vector<8x512xf32>
    %121 = arith.mulf %118, %120 : vector<8x512xf32>
    %c496_i32_44 = arith.constant 496 : i32
    %122 = tpu.dynamic_rotate %111 by %c496_i32_44 dim 1 : vector<8x512xf32>, i32 -> vector<8x512xf32>
    %c3_45 = arith.constant 3 : index
    %c0_46 = arith.constant 0 : index
    %123 = vector.load %arg2[%c3_45, %c0_46] : memref<36x512xf32, #tpu.memory_space<vmem>>, vector<1x512xf32>
    %124 = vector.broadcast %123 : vector<1x512xf32> to vector<8x512xf32>
    %125 = arith.mulf %122, %124 : vector<8x512xf32>
    %c480_i32 = arith.constant 480 : i32
    %126 = tpu.dynamic_rotate %111 by %c480_i32 dim 1 : vector<8x512xf32>, i32 -> vector<8x512xf32>
    %c15 = arith.constant 15 : index
    %c0_47 = arith.constant 0 : index
    %127 = vector.load %arg2[%c15, %c0_47] : memref<36x512xf32, #tpu.memory_space<vmem>>, vector<1x512xf32>
    %128 = vector.broadcast %127 : vector<1x512xf32> to vector<8x512xf32>
    %129 = arith.mulf %126, %128 : vector<8x512xf32>
    %130 = tpu.concatenate %117, %121, %111, %125, %129 in 0 : vector<8x512xf32>, vector<8x512xf32>, vector<8x512xf32>, vector<8x512xf32>, vector<8x512xf32> -> vector<40x512xf32>
    %cst_48 = arith.constant dense<0.000000e+00> : vector<8x512xf32>
    %131 = tpu.matmul %112, %130, %cst_48 {dimension_numbers = #tpu.dot_dimension_numbers<[1], [0], [0], [1], [0, 0, 1, 1], [], []>} : vector<8x40xf32>, vector<40x512xf32>, vector<8x512xf32> -> vector<8x512xf32>
    %132 = vector.broadcast %113 : vector<8x1xf32> to vector<8x512xf32>
    %133 = arith.addf %131, %132 : vector<8x512xf32>
    %c0_49 = arith.constant 0 : index
    %c0_50 = arith.constant 0 : index
    %134 = vector.load %arg9[%c0_49, %c0_50] : memref<8x72xf32, #tpu.memory_space<vmem>>, vector<8x72xf32>
    %135 = vector.extract_strided_slice %1 {offsets = [0, 8], sizes = [8, 1], strides = [1, 1]} : vector<8x15xf32> to vector<8x1xf32>
    %c85_i32 = arith.constant 85 : i32
    %136 = tpu.dynamic_rotate %133 by %c85_i32 dim 1 : vector<8x512xf32>, i32 -> vector<8x512xf32>
    %c16 = arith.constant 16 : index
    %c0_51 = arith.constant 0 : index
    %137 = vector.load %arg2[%c16, %c0_51] : memref<36x512xf32, #tpu.memory_space<vmem>>, vector<1x512xf32>
    %138 = vector.broadcast %137 : vector<1x512xf32> to vector<8x512xf32>
    %139 = arith.mulf %136, %138 : vector<8x512xf32>
    %c80_i32 = arith.constant 80 : i32
    %140 = tpu.dynamic_rotate %133 by %c80_i32 dim 1 : vector<8x512xf32>, i32 -> vector<8x512xf32>
    %c17 = arith.constant 17 : index
    %c0_52 = arith.constant 0 : index
    %141 = vector.load %arg2[%c17, %c0_52] : memref<36x512xf32, #tpu.memory_space<vmem>>, vector<1x512xf32>
    %142 = vector.broadcast %141 : vector<1x512xf32> to vector<8x512xf32>
    %143 = arith.mulf %140, %142 : vector<8x512xf32>
    %c75_i32 = arith.constant 75 : i32
    %144 = tpu.dynamic_rotate %133 by %c75_i32 dim 1 : vector<8x512xf32>, i32 -> vector<8x512xf32>
    %c18 = arith.constant 18 : index
    %c0_53 = arith.constant 0 : index
    %145 = vector.load %arg2[%c18, %c0_53] : memref<36x512xf32, #tpu.memory_space<vmem>>, vector<1x512xf32>
    %146 = vector.broadcast %145 : vector<1x512xf32> to vector<8x512xf32>
    %147 = arith.mulf %144, %146 : vector<8x512xf32>
    %c5_i32 = arith.constant 5 : i32
    %148 = tpu.dynamic_rotate %133 by %c5_i32 dim 1 : vector<8x512xf32>, i32 -> vector<8x512xf32>
    %c19 = arith.constant 19 : index
    %c0_54 = arith.constant 0 : index
    %149 = vector.load %arg2[%c19, %c0_54] : memref<36x512xf32, #tpu.memory_space<vmem>>, vector<1x512xf32>
    %150 = vector.broadcast %149 : vector<1x512xf32> to vector<8x512xf32>
    %151 = arith.mulf %148, %150 : vector<8x512xf32>
    %c507_i32 = arith.constant 507 : i32
    %152 = tpu.dynamic_rotate %133 by %c507_i32 dim 1 : vector<8x512xf32>, i32 -> vector<8x512xf32>
    %c20 = arith.constant 20 : index
    %c0_55 = arith.constant 0 : index
    %153 = vector.load %arg2[%c20, %c0_55] : memref<36x512xf32, #tpu.memory_space<vmem>>, vector<1x512xf32>
    %154 = vector.broadcast %153 : vector<1x512xf32> to vector<8x512xf32>
    %155 = arith.mulf %152, %154 : vector<8x512xf32>
    %c437_i32 = arith.constant 437 : i32
    %156 = tpu.dynamic_rotate %133 by %c437_i32 dim 1 : vector<8x512xf32>, i32 -> vector<8x512xf32>
    %c21 = arith.constant 21 : index
    %c0_56 = arith.constant 0 : index
    %157 = vector.load %arg2[%c21, %c0_56] : memref<36x512xf32, #tpu.memory_space<vmem>>, vector<1x512xf32>
    %158 = vector.broadcast %157 : vector<1x512xf32> to vector<8x512xf32>
    %159 = arith.mulf %156, %158 : vector<8x512xf32>
    %c432_i32 = arith.constant 432 : i32
    %160 = tpu.dynamic_rotate %133 by %c432_i32 dim 1 : vector<8x512xf32>, i32 -> vector<8x512xf32>
    %c22 = arith.constant 22 : index
    %c0_57 = arith.constant 0 : index
    %161 = vector.load %arg2[%c22, %c0_57] : memref<36x512xf32, #tpu.memory_space<vmem>>, vector<1x512xf32>
    %162 = vector.broadcast %161 : vector<1x512xf32> to vector<8x512xf32>
    %163 = arith.mulf %160, %162 : vector<8x512xf32>
    %c427_i32 = arith.constant 427 : i32
    %164 = tpu.dynamic_rotate %133 by %c427_i32 dim 1 : vector<8x512xf32>, i32 -> vector<8x512xf32>
    %c23 = arith.constant 23 : index
    %c0_58 = arith.constant 0 : index
    %165 = vector.load %arg2[%c23, %c0_58] : memref<36x512xf32, #tpu.memory_space<vmem>>, vector<1x512xf32>
    %166 = vector.broadcast %165 : vector<1x512xf32> to vector<8x512xf32>
    %167 = arith.mulf %164, %166 : vector<8x512xf32>
    %168 = tpu.concatenate %139, %143, %147, %151, %133, %155, %159, %163, %167 in 0 : vector<8x512xf32>, vector<8x512xf32>, vector<8x512xf32>, vector<8x512xf32>, vector<8x512xf32>, vector<8x512xf32>, vector<8x512xf32>, vector<8x512xf32>, vector<8x512xf32> -> vector<72x512xf32>
    %cst_59 = arith.constant dense<0.000000e+00> : vector<8x512xf32>
    %169 = tpu.matmul %134, %168, %cst_59 {dimension_numbers = #tpu.dot_dimension_numbers<[1], [0], [0], [1], [0, 0, 1, 1], [], []>} : vector<8x72xf32>, vector<72x512xf32>, vector<8x512xf32> -> vector<8x512xf32>
    %170 = vector.broadcast %135 : vector<8x1xf32> to vector<8x512xf32>
    %171 = arith.addf %169, %170 : vector<8x512xf32>
    %c0_60 = arith.constant 0 : index
    %c0_61 = arith.constant 0 : index
    %172 = vector.load %arg10[%c0_60, %c0_61] : memref<8x56xf32, #tpu.memory_space<vmem>>, vector<8x56xf32>
    %173 = vector.extract_strided_slice %1 {offsets = [0, 10], sizes = [8, 1], strides = [1, 1]} : vector<8x15xf32> to vector<8x1xf32>
    %c3_i32_62 = arith.constant 3 : i32
    %174 = tpu.dynamic_rotate %19 by %c3_i32_62 dim 1 : vector<8x512xf32>, i32 -> vector<8x512xf32>
    %c7_63 = arith.constant 7 : index
    %c0_64 = arith.constant 0 : index
    %175 = vector.load %arg2[%c7_63, %c0_64] : memref<36x512xf32, #tpu.memory_space<vmem>>, vector<1x512xf32>
    %176 = vector.broadcast %175 : vector<1x512xf32> to vector<8x512xf32>
    %177 = arith.mulf %174, %176 : vector<8x512xf32>
    %c2_i32_65 = arith.constant 2 : i32
    %178 = tpu.dynamic_rotate %19 by %c2_i32_65 dim 1 : vector<8x512xf32>, i32 -> vector<8x512xf32>
    %c12_66 = arith.constant 12 : index
    %c0_67 = arith.constant 0 : index
    %179 = vector.load %arg2[%c12_66, %c0_67] : memref<36x512xf32, #tpu.memory_space<vmem>>, vector<1x512xf32>
    %180 = vector.broadcast %179 : vector<1x512xf32> to vector<8x512xf32>
    %181 = arith.mulf %178, %180 : vector<8x512xf32>
    %c1_i32_68 = arith.constant 1 : i32
    %182 = tpu.dynamic_rotate %19 by %c1_i32_68 dim 1 : vector<8x512xf32>, i32 -> vector<8x512xf32>
    %c0_69 = arith.constant 0 : index
    %c0_70 = arith.constant 0 : index
    %183 = vector.load %arg2[%c0_69, %c0_70] : memref<36x512xf32, #tpu.memory_space<vmem>>, vector<1x512xf32>
    %184 = vector.broadcast %183 : vector<1x512xf32> to vector<8x512xf32>
    %185 = arith.mulf %182, %184 : vector<8x512xf32>
    %c511_i32_71 = arith.constant 511 : i32
    %186 = tpu.dynamic_rotate %19 by %c511_i32_71 dim 1 : vector<8x512xf32>, i32 -> vector<8x512xf32>
    %c1_72 = arith.constant 1 : index
    %c0_73 = arith.constant 0 : index
    %187 = vector.load %arg2[%c1_72, %c0_73] : memref<36x512xf32, #tpu.memory_space<vmem>>, vector<1x512xf32>
    %188 = vector.broadcast %187 : vector<1x512xf32> to vector<8x512xf32>
    %189 = arith.mulf %186, %188 : vector<8x512xf32>
    %c510_i32_74 = arith.constant 510 : i32
    %190 = tpu.dynamic_rotate %19 by %c510_i32_74 dim 1 : vector<8x512xf32>, i32 -> vector<8x512xf32>
    %c13_75 = arith.constant 13 : index
    %c0_76 = arith.constant 0 : index
    %191 = vector.load %arg2[%c13_75, %c0_76] : memref<36x512xf32, #tpu.memory_space<vmem>>, vector<1x512xf32>
    %192 = vector.broadcast %191 : vector<1x512xf32> to vector<8x512xf32>
    %193 = arith.mulf %190, %192 : vector<8x512xf32>
    %c509_i32_77 = arith.constant 509 : i32
    %194 = tpu.dynamic_rotate %19 by %c509_i32_77 dim 1 : vector<8x512xf32>, i32 -> vector<8x512xf32>
    %c8_78 = arith.constant 8 : index
    %c0_79 = arith.constant 0 : index
    %195 = vector.load %arg2[%c8_78, %c0_79] : memref<36x512xf32, #tpu.memory_space<vmem>>, vector<1x512xf32>
    %196 = vector.broadcast %195 : vector<1x512xf32> to vector<8x512xf32>
    %197 = arith.mulf %194, %196 : vector<8x512xf32>
    %198 = tpu.concatenate %177, %181, %185, %19, %189, %193, %197 in 0 : vector<8x512xf32>, vector<8x512xf32>, vector<8x512xf32>, vector<8x512xf32>, vector<8x512xf32>, vector<8x512xf32>, vector<8x512xf32> -> vector<56x512xf32>
    %cst_80 = arith.constant dense<0.000000e+00> : vector<8x512xf32>
    %199 = tpu.matmul %172, %198, %cst_80 {dimension_numbers = #tpu.dot_dimension_numbers<[1], [0], [0], [1], [0, 0, 1, 1], [], []>} : vector<8x56xf32>, vector<56x512xf32>, vector<8x512xf32> -> vector<8x512xf32>
    %200 = vector.broadcast %173 : vector<8x1xf32> to vector<8x512xf32>
    %201 = arith.addf %199, %200 : vector<8x512xf32>
    %c0_81 = arith.constant 0 : index
    %c0_82 = arith.constant 0 : index
    %202 = vector.load %arg11[%c0_81, %c0_82] : memref<8x56xf32, #tpu.memory_space<vmem>>, vector<8x56xf32>
    %203 = vector.extract_strided_slice %1 {offsets = [0, 11], sizes = [8, 1], strides = [1, 1]} : vector<8x15xf32> to vector<8x1xf32>
    %c48_i32_83 = arith.constant 48 : i32
    %204 = tpu.dynamic_rotate %201 by %c48_i32_83 dim 1 : vector<8x512xf32>, i32 -> vector<8x512xf32>
    %c5_84 = arith.constant 5 : index
    %c0_85 = arith.constant 0 : index
    %205 = vector.load %arg2[%c5_84, %c0_85] : memref<36x512xf32, #tpu.memory_space<vmem>>, vector<1x512xf32>
    %206 = vector.broadcast %205 : vector<1x512xf32> to vector<8x512xf32>
    %207 = arith.mulf %204, %206 : vector<8x512xf32>
    %c32_i32_86 = arith.constant 32 : i32
    %208 = tpu.dynamic_rotate %201 by %c32_i32_86 dim 1 : vector<8x512xf32>, i32 -> vector<8x512xf32>
    %c14_87 = arith.constant 14 : index
    %c0_88 = arith.constant 0 : index
    %209 = vector.load %arg2[%c14_87, %c0_88] : memref<36x512xf32, #tpu.memory_space<vmem>>, vector<1x512xf32>
    %210 = vector.broadcast %209 : vector<1x512xf32> to vector<8x512xf32>
    %211 = arith.mulf %208, %210 : vector<8x512xf32>
    %c16_i32_89 = arith.constant 16 : i32
    %212 = tpu.dynamic_rotate %201 by %c16_i32_89 dim 1 : vector<8x512xf32>, i32 -> vector<8x512xf32>
    %c2_90 = arith.constant 2 : index
    %c0_91 = arith.constant 0 : index
    %213 = vector.load %arg2[%c2_90, %c0_91] : memref<36x512xf32, #tpu.memory_space<vmem>>, vector<1x512xf32>
    %214 = vector.broadcast %213 : vector<1x512xf32> to vector<8x512xf32>
    %215 = arith.mulf %212, %214 : vector<8x512xf32>
    %c496_i32_92 = arith.constant 496 : i32
    %216 = tpu.dynamic_rotate %201 by %c496_i32_92 dim 1 : vector<8x512xf32>, i32 -> vector<8x512xf32>
    %c3_93 = arith.constant 3 : index
    %c0_94 = arith.constant 0 : index
    %217 = vector.load %arg2[%c3_93, %c0_94] : memref<36x512xf32, #tpu.memory_space<vmem>>, vector<1x512xf32>
    %218 = vector.broadcast %217 : vector<1x512xf32> to vector<8x512xf32>
    %219 = arith.mulf %216, %218 : vector<8x512xf32>
    %c480_i32_95 = arith.constant 480 : i32
    %220 = tpu.dynamic_rotate %201 by %c480_i32_95 dim 1 : vector<8x512xf32>, i32 -> vector<8x512xf32>
    %c15_96 = arith.constant 15 : index
    %c0_97 = arith.constant 0 : index
    %221 = vector.load %arg2[%c15_96, %c0_97] : memref<36x512xf32, #tpu.memory_space<vmem>>, vector<1x512xf32>
    %222 = vector.broadcast %221 : vector<1x512xf32> to vector<8x512xf32>
    %223 = arith.mulf %220, %222 : vector<8x512xf32>
    %c464_i32_98 = arith.constant 464 : i32
    %224 = tpu.dynamic_rotate %201 by %c464_i32_98 dim 1 : vector<8x512xf32>, i32 -> vector<8x512xf32>
    %c10_99 = arith.constant 10 : index
    %c0_100 = arith.constant 0 : index
    %225 = vector.load %arg2[%c10_99, %c0_100] : memref<36x512xf32, #tpu.memory_space<vmem>>, vector<1x512xf32>
    %226 = vector.broadcast %225 : vector<1x512xf32> to vector<8x512xf32>
    %227 = arith.mulf %224, %226 : vector<8x512xf32>
    %228 = tpu.concatenate %207, %211, %215, %201, %219, %223, %227 in 0 : vector<8x512xf32>, vector<8x512xf32>, vector<8x512xf32>, vector<8x512xf32>, vector<8x512xf32>, vector<8x512xf32>, vector<8x512xf32> -> vector<56x512xf32>
    %cst_101 = arith.constant dense<0.000000e+00> : vector<8x512xf32>
    %229 = tpu.matmul %202, %228, %cst_101 {dimension_numbers = #tpu.dot_dimension_numbers<[1], [0], [0], [1], [0, 0, 1, 1], [], []>} : vector<8x56xf32>, vector<56x512xf32>, vector<8x512xf32> -> vector<8x512xf32>
    %230 = vector.broadcast %203 : vector<8x1xf32> to vector<8x512xf32>
    %231 = arith.addf %229, %230 : vector<8x512xf32>
    %c0_102 = arith.constant 0 : index
    %c0_103 = arith.constant 0 : index
    %232 = vector.load %arg12[%c0_102, %c0_103] : memref<8x72xf32, #tpu.memory_space<vmem>>, vector<8x72xf32>
    %233 = vector.extract_strided_slice %1 {offsets = [0, 12], sizes = [8, 1], strides = [1, 1]} : vector<8x15xf32> to vector<8x1xf32>
    %c119_i32 = arith.constant 119 : i32
    %234 = tpu.dynamic_rotate %231 by %c119_i32 dim 1 : vector<8x512xf32>, i32 -> vector<8x512xf32>
    %c24 = arith.constant 24 : index
    %c0_104 = arith.constant 0 : index
    %235 = vector.load %arg2[%c24, %c0_104] : memref<36x512xf32, #tpu.memory_space<vmem>>, vector<1x512xf32>
    %236 = vector.broadcast %235 : vector<1x512xf32> to vector<8x512xf32>
    %237 = arith.mulf %234, %236 : vector<8x512xf32>
    %c112_i32 = arith.constant 112 : i32
    %238 = tpu.dynamic_rotate %231 by %c112_i32 dim 1 : vector<8x512xf32>, i32 -> vector<8x512xf32>
    %c25 = arith.constant 25 : index
    %c0_105 = arith.constant 0 : index
    %239 = vector.load %arg2[%c25, %c0_105] : memref<36x512xf32, #tpu.memory_space<vmem>>, vector<1x512xf32>
    %240 = vector.broadcast %239 : vector<1x512xf32> to vector<8x512xf32>
    %241 = arith.mulf %238, %240 : vector<8x512xf32>
    %c105_i32 = arith.constant 105 : i32
    %242 = tpu.dynamic_rotate %231 by %c105_i32 dim 1 : vector<8x512xf32>, i32 -> vector<8x512xf32>
    %c26 = arith.constant 26 : index
    %c0_106 = arith.constant 0 : index
    %243 = vector.load %arg2[%c26, %c0_106] : memref<36x512xf32, #tpu.memory_space<vmem>>, vector<1x512xf32>
    %244 = vector.broadcast %243 : vector<1x512xf32> to vector<8x512xf32>
    %245 = arith.mulf %242, %244 : vector<8x512xf32>
    %c7_i32 = arith.constant 7 : i32
    %246 = tpu.dynamic_rotate %231 by %c7_i32 dim 1 : vector<8x512xf32>, i32 -> vector<8x512xf32>
    %c27 = arith.constant 27 : index
    %c0_107 = arith.constant 0 : index
    %247 = vector.load %arg2[%c27, %c0_107] : memref<36x512xf32, #tpu.memory_space<vmem>>, vector<1x512xf32>
    %248 = vector.broadcast %247 : vector<1x512xf32> to vector<8x512xf32>
    %249 = arith.mulf %246, %248 : vector<8x512xf32>
    %c505_i32 = arith.constant 505 : i32
    %250 = tpu.dynamic_rotate %231 by %c505_i32 dim 1 : vector<8x512xf32>, i32 -> vector<8x512xf32>
    %c28 = arith.constant 28 : index
    %c0_108 = arith.constant 0 : index
    %251 = vector.load %arg2[%c28, %c0_108] : memref<36x512xf32, #tpu.memory_space<vmem>>, vector<1x512xf32>
    %252 = vector.broadcast %251 : vector<1x512xf32> to vector<8x512xf32>
    %253 = arith.mulf %250, %252 : vector<8x512xf32>
    %c407_i32 = arith.constant 407 : i32
    %254 = tpu.dynamic_rotate %231 by %c407_i32 dim 1 : vector<8x512xf32>, i32 -> vector<8x512xf32>
    %c29 = arith.constant 29 : index
    %c0_109 = arith.constant 0 : index
    %255 = vector.load %arg2[%c29, %c0_109] : memref<36x512xf32, #tpu.memory_space<vmem>>, vector<1x512xf32>
    %256 = vector.broadcast %255 : vector<1x512xf32> to vector<8x512xf32>
    %257 = arith.mulf %254, %256 : vector<8x512xf32>
    %c400_i32 = arith.constant 400 : i32
    %258 = tpu.dynamic_rotate %231 by %c400_i32 dim 1 : vector<8x512xf32>, i32 -> vector<8x512xf32>
    %c30 = arith.constant 30 : index
    %c0_110 = arith.constant 0 : index
    %259 = vector.load %arg2[%c30, %c0_110] : memref<36x512xf32, #tpu.memory_space<vmem>>, vector<1x512xf32>
    %260 = vector.broadcast %259 : vector<1x512xf32> to vector<8x512xf32>
    %261 = arith.mulf %258, %260 : vector<8x512xf32>
    %c393_i32 = arith.constant 393 : i32
    %262 = tpu.dynamic_rotate %231 by %c393_i32 dim 1 : vector<8x512xf32>, i32 -> vector<8x512xf32>
    %c31 = arith.constant 31 : index
    %c0_111 = arith.constant 0 : index
    %263 = vector.load %arg2[%c31, %c0_111] : memref<36x512xf32, #tpu.memory_space<vmem>>, vector<1x512xf32>
    %264 = vector.broadcast %263 : vector<1x512xf32> to vector<8x512xf32>
    %265 = arith.mulf %262, %264 : vector<8x512xf32>
    %266 = tpu.concatenate %237, %241, %245, %249, %231, %253, %257, %261, %265 in 0 : vector<8x512xf32>, vector<8x512xf32>, vector<8x512xf32>, vector<8x512xf32>, vector<8x512xf32>, vector<8x512xf32>, vector<8x512xf32>, vector<8x512xf32>, vector<8x512xf32> -> vector<72x512xf32>
    %cst_112 = arith.constant dense<0.000000e+00> : vector<8x512xf32>
    %267 = tpu.matmul %232, %266, %cst_112 {dimension_numbers = #tpu.dot_dimension_numbers<[1], [0], [0], [1], [0, 0, 1, 1], [], []>} : vector<8x72xf32>, vector<72x512xf32>, vector<8x512xf32> -> vector<8x512xf32>
    %268 = vector.broadcast %233 : vector<8x1xf32> to vector<8x512xf32>
    %269 = arith.addf %267, %268 : vector<8x512xf32>
    %270 = tpu.concatenate %7, %89, %171, %269 in 0 : vector<8x512xf32>, vector<8x512xf32>, vector<8x512xf32>, vector<8x512xf32> -> vector<32x512xf32>
    %c0_113 = arith.constant 0 : index
    %c0_114 = arith.constant 0 : index
    %271 = vector.load %arg13[%c0_113, %c0_114] : memref<8x288xf32, #tpu.memory_space<vmem>>, vector<8x288xf32>
    %272 = vector.extract_strided_slice %1 {offsets = [0, 13], sizes = [8, 1], strides = [1, 1]} : vector<8x15xf32> to vector<8x1xf32>
    %c17_i32 = arith.constant 17 : i32
    %273 = tpu.dynamic_rotate %270 by %c17_i32 dim 1 : vector<32x512xf32>, i32 -> vector<32x512xf32>
    %c32 = arith.constant 32 : index
    %c0_115 = arith.constant 0 : index
    %274 = vector.load %arg2[%c32, %c0_115] : memref<36x512xf32, #tpu.memory_space<vmem>>, vector<1x512xf32>
    %275 = vector.broadcast %274 : vector<1x512xf32> to vector<32x512xf32>
    %276 = arith.mulf %273, %275 : vector<32x512xf32>
    %c16_i32_116 = arith.constant 16 : i32
    %277 = tpu.dynamic_rotate %270 by %c16_i32_116 dim 1 : vector<32x512xf32>, i32 -> vector<32x512xf32>
    %c2_117 = arith.constant 2 : index
    %c0_118 = arith.constant 0 : index
    %278 = vector.load %arg2[%c2_117, %c0_118] : memref<36x512xf32, #tpu.memory_space<vmem>>, vector<1x512xf32>
    %279 = vector.broadcast %278 : vector<1x512xf32> to vector<32x512xf32>
    %280 = arith.mulf %277, %279 : vector<32x512xf32>
    %c15_i32 = arith.constant 15 : i32
    %281 = tpu.dynamic_rotate %270 by %c15_i32 dim 1 : vector<32x512xf32>, i32 -> vector<32x512xf32>
    %c33 = arith.constant 33 : index
    %c0_119 = arith.constant 0 : index
    %282 = vector.load %arg2[%c33, %c0_119] : memref<36x512xf32, #tpu.memory_space<vmem>>, vector<1x512xf32>
    %283 = vector.broadcast %282 : vector<1x512xf32> to vector<32x512xf32>
    %284 = arith.mulf %281, %283 : vector<32x512xf32>
    %c1_i32_120 = arith.constant 1 : i32
    %285 = tpu.dynamic_rotate %270 by %c1_i32_120 dim 1 : vector<32x512xf32>, i32 -> vector<32x512xf32>
    %c0_121 = arith.constant 0 : index
    %c0_122 = arith.constant 0 : index
    %286 = vector.load %arg2[%c0_121, %c0_122] : memref<36x512xf32, #tpu.memory_space<vmem>>, vector<1x512xf32>
    %287 = vector.broadcast %286 : vector<1x512xf32> to vector<32x512xf32>
    %288 = arith.mulf %285, %287 : vector<32x512xf32>
    %c511_i32_123 = arith.constant 511 : i32
    %289 = tpu.dynamic_rotate %270 by %c511_i32_123 dim 1 : vector<32x512xf32>, i32 -> vector<32x512xf32>
    %c1_124 = arith.constant 1 : index
    %c0_125 = arith.constant 0 : index
    %290 = vector.load %arg2[%c1_124, %c0_125] : memref<36x512xf32, #tpu.memory_space<vmem>>, vector<1x512xf32>
    %291 = vector.broadcast %290 : vector<1x512xf32> to vector<32x512xf32>
    %292 = arith.mulf %289, %291 : vector<32x512xf32>
    %c497_i32 = arith.constant 497 : i32
    %293 = tpu.dynamic_rotate %270 by %c497_i32 dim 1 : vector<32x512xf32>, i32 -> vector<32x512xf32>
    %c34 = arith.constant 34 : index
    %c0_126 = arith.constant 0 : index
    %294 = vector.load %arg2[%c34, %c0_126] : memref<36x512xf32, #tpu.memory_space<vmem>>, vector<1x512xf32>
    %295 = vector.broadcast %294 : vector<1x512xf32> to vector<32x512xf32>
    %296 = arith.mulf %293, %295 : vector<32x512xf32>
    %c496_i32_127 = arith.constant 496 : i32
    %297 = tpu.dynamic_rotate %270 by %c496_i32_127 dim 1 : vector<32x512xf32>, i32 -> vector<32x512xf32>
    %c3_128 = arith.constant 3 : index
    %c0_129 = arith.constant 0 : index
    %298 = vector.load %arg2[%c3_128, %c0_129] : memref<36x512xf32, #tpu.memory_space<vmem>>, vector<1x512xf32>
    %299 = vector.broadcast %298 : vector<1x512xf32> to vector<32x512xf32>
    %300 = arith.mulf %297, %299 : vector<32x512xf32>
    %c495_i32 = arith.constant 495 : i32
    %301 = tpu.dynamic_rotate %270 by %c495_i32 dim 1 : vector<32x512xf32>, i32 -> vector<32x512xf32>
    %c35 = arith.constant 35 : index
    %c0_130 = arith.constant 0 : index
    %302 = vector.load %arg2[%c35, %c0_130] : memref<36x512xf32, #tpu.memory_space<vmem>>, vector<1x512xf32>
    %303 = vector.broadcast %302 : vector<1x512xf32> to vector<32x512xf32>
    %304 = arith.mulf %301, %303 : vector<32x512xf32>
    %305 = tpu.concatenate %276, %280, %284, %288, %270, %292, %296, %300, %304 in 0 : vector<32x512xf32>, vector<32x512xf32>, vector<32x512xf32>, vector<32x512xf32>, vector<32x512xf32>, vector<32x512xf32>, vector<32x512xf32>, vector<32x512xf32>, vector<32x512xf32> -> vector<288x512xf32>
    %cst_131 = arith.constant dense<0.000000e+00> : vector<8x512xf32>
    %306 = tpu.matmul %271, %305, %cst_131 {dimension_numbers = #tpu.dot_dimension_numbers<[1], [0], [0], [1], [0, 0, 1, 1], [], []>} : vector<8x288xf32>, vector<288x512xf32>, vector<8x512xf32> -> vector<8x512xf32>
    %307 = vector.broadcast %272 : vector<8x1xf32> to vector<8x512xf32>
    %308 = arith.addf %306, %307 : vector<8x512xf32>
    %309 = arith.addf %308, %23 : vector<8x512xf32>
    %cst_132 = arith.constant 0.000000e+00 : f32
    %310 = vector.broadcast %cst_132 : f32 to vector<8x512xf32>
    %311 = arith.maximumf %309, %310 : vector<8x512xf32>
    %c0_133 = arith.constant 0 : index
    %c0_134 = arith.constant 0 : index
    %312 = vector.load %arg15[%c0_133, %c0_134] : memref<8x512xf32, #tpu.memory_space<vmem>>, vector<8x512xf32>
    tpu.vector_store %arg15[%c0_133, %c0_134], %311 {strides = array<i32>} : memref<8x512xf32, #tpu.memory_space<vmem>>, vector<8x512xf32>,
    return
  }
  func.func @transform_0(%arg0: i32) -> (i32, i32) {
    %c0_i32 = arith.constant 0 : i32
    %c0_i32_0 = arith.constant 0 : i32
    %c0_i32_1 = arith.constant 0 : i32
    return %c0_i32, %c0_i32_0 : i32, i32
  }
  func.func @transform_1(%arg0: i32) -> (i32, i32) {
    %c0_i32 = arith.constant 0 : i32
    %c0_i32_0 = arith.constant 0 : i32
    %c0_i32_1 = arith.constant 0 : i32
    return %c0_i32, %c0_i32_0 : i32, i32
  }
  func.func @transform_2(%arg0: i32) -> (i32, i32) {
    %c0_i32 = arith.constant 0 : i32
    %c0_i32_0 = arith.constant 0 : i32
    %c0_i32_1 = arith.constant 0 : i32
    return %c0_i32, %c0_i32_0 : i32, i32
  }
  func.func @transform_3(%arg0: i32) -> (i32, i32) {
    %c0_i32 = arith.constant 0 : i32
    %c0_i32_0 = arith.constant 0 : i32
    %c0_i32_1 = arith.constant 0 : i32
    return %c0_i32, %c0_i32_0 : i32, i32
  }
  func.func @transform_4(%arg0: i32) -> (i32, i32) {
    %c0_i32 = arith.constant 0 : i32
    %c0_i32_0 = arith.constant 0 : i32
    %c0_i32_1 = arith.constant 0 : i32
    return %c0_i32, %c0_i32_0 : i32, i32
  }
  func.func @transform_5(%arg0: i32) -> (i32, i32) {
    %c0_i32 = arith.constant 0 : i32
    %c0_i32_0 = arith.constant 0 : i32
    %c0_i32_1 = arith.constant 0 : i32
    return %c0_i32, %c0_i32_0 : i32, i32
  }
  func.func @transform_6(%arg0: i32) -> (i32, i32) {
    %c0_i32 = arith.constant 0 : i32
    %c0_i32_0 = arith.constant 0 : i32
    %c0_i32_1 = arith.constant 0 : i32
    return %c0_i32, %c0_i32_0 : i32, i32
  }
  func.func @transform_7(%arg0: i32) -> (i32, i32) {
    %c0_i32 = arith.constant 0 : i32
    %c0_i32_0 = arith.constant 0 : i32
    %c0_i32_1 = arith.constant 0 : i32
    return %c0_i32, %c0_i32_0 : i32, i32
  }
  func.func @transform_8(%arg0: i32) -> (i32, i32) {
    %c0_i32 = arith.constant 0 : i32
    %c0_i32_0 = arith.constant 0 : i32
    %c0_i32_1 = arith.constant 0 : i32
    return %c0_i32, %c0_i32_0 : i32, i32
  }
  func.func @transform_9(%arg0: i32) -> (i32, i32) {
    %c0_i32 = arith.constant 0 : i32
    %c0_i32_0 = arith.constant 0 : i32
    %c0_i32_1 = arith.constant 0 : i32
    return %c0_i32, %c0_i32_0 : i32, i32
  }
  func.func @transform_10(%arg0: i32) -> (i32, i32) {
    %c0_i32 = arith.constant 0 : i32
    %c0_i32_0 = arith.constant 0 : i32
    %c0_i32_1 = arith.constant 0 : i32
    return %c0_i32, %c0_i32_0 : i32, i32
  }
  func.func @transform_11(%arg0: i32) -> (i32, i32) {
    %c0_i32 = arith.constant 0 : i32
    %c0_i32_0 = arith.constant 0 : i32
    %c0_i32_1 = arith.constant 0 : i32
    return %c0_i32, %c0_i32_0 : i32, i32
  }
  func.func @transform_12(%arg0: i32) -> (i32, i32) {
    %c0_i32 = arith.constant 0 : i32
    %c0_i32_0 = arith.constant 0 : i32
    %c0_i32_1 = arith.constant 0 : i32
    return %c0_i32, %c0_i32_0 : i32, i32
  }
  func.func @transform_13(%arg0: i32) -> (i32, i32) {
    %c0_i32 = arith.constant 0 : i32
    %c0_i32_0 = arith.constant 0 : i32
    %c0_i32_1 = arith.constant 0 : i32
    return %c0_i32, %c0_i32_0 : i32, i32
  }
  func.func @transform_14(%arg0: i32) -> (i32, i32) {
    %c0_i32 = arith.constant 0 : i32
    %c0_i32_0 = arith.constant 0 : i32
    %c0_i32_1 = arith.constant 0 : i32
    return %c0_i32, %c0_i32_0 : i32, i32
  }
}

</mosaic_0001>

<bundles_post_ra>
// kernel: tpu_custom_call.1
= control target key start
LH: loop header
LB: loop body
LE: loop exit
PB: predicated region body
PF: predicated region fallthrough
CT: control target
= control target key end

     0   :  { %19 = vsyncpa [#allocation3], 0  ;;  %s7669_s0 = inlined_call_operand.vmem [shape: f32[4,512], index: 0, kind: input, shape index: {}]   ;;  %s7670_s1 = inlined_call_operand.hbm [shape: f32[36,512], index: 1, kind: input, shape index: {}]   ;;  %s7671_s2 = inlined_call_operand.vmem [shape: f32[40,4], index: 2, kind: input, shape index: {}]   ;;  %s7672_s3 = inlined_call_operand.vmem [shape: f32[8,24], index: 3, kind: input, shape index: {}]   ;;  %s7673_s4 = inlined_call_operand.vmem [shape: f32[8,24], index: 4, kind: input, shape index: {}]   ;;  %s7674_s5 = inlined_call_operand.hbm [shape: f32[8,72], index: 5, kind: input, shape index: {}]   ;;  %s7675_s6 = inlined_call_operand.vmem [shape: f32[8,40], index: 6, kind: input, shape index: {}]   ;;  %s7676_s7 = inlined_call_operand.hbm [shape: f32[8,40], index: 7, kind: input, shape index: {}]   ;;  %s7677_s8 = inlined_call_operand.vmem [shape: f32[8,72], index: 8, kind: input, shape index: {}]   ;;  %s7678_s9 = inlined_call_operand.hbm [shape: f32[8,56], index: 9, kind: input, shape index: {}]   ;;  %s7679_s10 = inlined_call_operand.vmem [shape: f32[8,56], index: 10, kind: input, shape index: {}]   ;;  %s7680_s11 = inlined_call_operand.hbm [shape: f32[8,72], index: 11, kind: input, shape index: {}]   ;;  %s7681_s12 = inlined_call_operand.vmem [shape: f32[8,288], index: 12, kind: input, shape index: {}]   ;;  %s7682_s13 = inlined_call_operand.vmem [shape: f32[8,15], index: 13, kind: input, shape index: {}]   ;;  %s7683_s14 = inlined_call_operand.hbm [shape: f32[8,512], index: 14, kind: output, shape index: {}]  }
   0x1   :  { %20 = vsyncpa [#allocation6], 0 }
   0x2   :  { %21 = vsyncpa [#allocation9], 0 }
   0x3   :  { %22 = vsyncpa [#allocation4], 0  ;;  %s4797_s29 = smov [#allocation5]   ;;  %s4798_s15 = smov [#allocation8]  }
   0x4   :  { %s49_s30 = sshll.u32 %s4797_s29, 4  ;;  %s73_s16 = sshll.u32 %s4798_s15, 4  ;;  %s50_s30 = int_to_ptr.vmem [resolvable:$true] %s49_s30  ;;  %s74_s16 = int_to_ptr.vmem [resolvable:$true] %s73_s16 }
   0x5   :  { %s4657_s19 = scalar_lea.hbm %s7674_s5, 128 }
   0x6   :  { %p4658_p0 = scmp.ne.s32.totalorder %s7674_s5, %s4657_s19  ;;  %p4661_p1 = scmp.lt.u32.totalorder %s4657_s19, %s7674_s5 }
   0x8   :  { %p4663_p2 = pnand %p4661_p1, %p4658_p0 }
   0xa   :  { %4666 = shalt.err (!%p4663_p2)
}
   0xb   :  { %s4667_s24 = scalar_lea.vmem %s50_s30, 128  ;;  %p4672_p4 = scmp.lt.s32.totalorder %s50_s30, %s50_s30 }
   0xc   :  { %p4668_p3 = scmp.ne.s32.totalorder %s50_s30, %s4667_s24  ;;  %p4673_p5 = scmp.lt.s32.totalorder %s4667_s24, %s4667_s24 }
   0xe   :  { %p4674_p6 = por %p4673_p5, %p4672_p4 }
  0x10   :  { %p4675_p7 = pnand %p4674_p6, %p4668_p3 }
  0x12   :  { %4678 = shalt.err (!%p4675_p7)
}
  0x13   :  { %52 = dma.hbm_to_vmem [thread:$0]  %s7674_s5, 128, %s50_s30, [#allocation6]  }
  0x14   :  { %s4679_s29 = scalar_lea.hbm %s7678_s9, 128 }
  0x15   :  { %p4680_p8 = scmp.ne.s32.totalorder %s7678_s9, %s4679_s29  ;;  %p4683_p9 = scmp.lt.u32.totalorder %s4679_s29, %s7678_s9 }
  0x17   :  { %p4685_p10 = pnand %p4683_p9, %p4680_p8 }
  0x19   :  { %4688 = shalt.err (!%p4685_p10)
}
  0x1a   :  { %s4689_s20 = scalar_lea.vmem %s74_s16, 128  ;;  %p4694_p12 = scmp.lt.s32.totalorder %s74_s16, %s74_s16 }
  0x1b   :  { %p4690_p11 = scmp.ne.s32.totalorder %s74_s16, %s4689_s20  ;;  %p4695_p13 = scmp.lt.s32.totalorder %s4689_s20, %s4689_s20 }
  0x1d   :  { %p4696_p0 = por %p4695_p13, %p4694_p12 }
  0x1f   :  { %p4697_p1 = pnand %p4696_p0, %p4690_p11 }
  0x21   :  { %4700 = shalt.err (!%p4697_p1)
}
  0x22   :  { %76 = dma.hbm_to_vmem [thread:$0]  %s7678_s9, 128, %s74_s16, [#allocation9]  }
  0x23   :  { %s4799_s21 = smov [#allocation2]   ;;  %s4701_s25 = scalar_lea.hbm %s7670_s1, 2560 }
  0x24   :  { %s30_s22 = sshll.u32 %s4799_s21, 4  ;;  %p4702_p2 = scmp.ne.s32.totalorder %s7670_s1, %s4701_s25  ;;  %s31_s22 = int_to_ptr.vmem [resolvable:$true] %s30_s22 }
  0x25   :  { %p4705_p3 = scmp.lt.u32.totalorder %s4701_s25, %s7670_s1 }
  0x27   :  { %p4707_p4 = pnand %p4705_p3, %p4702_p2 }
  0x29   :  { %4710 = shalt.err (!%p4707_p4)
}
  0x2a   :  { %s4711_s15 = scalar_lea.vmem %s31_s22, 2560  ;;  %p4716_p6 = scmp.lt.s32.totalorder %s31_s22, %s31_s22 }
  0x2b   :  { %p4712_p5 = scmp.ne.s32.totalorder %s31_s22, %s4711_s15  ;;  %p4717_p7 = scmp.lt.s32.totalorder %s4711_s15, %s4711_s15 }
  0x2d   :  { %p4718_p8 = por %p4717_p7, %p4716_p6 }
  0x2f   :  { %p4719_p9 = pnand %p4718_p8, %p4712_p5 }
  0x31   :  { %4722 = shalt.err (!%p4719_p9)
}
  0x32   :  { %s4800_s9 = smov 512   ;;  %s4801_s16 = smov 32  }
  0x33   :  { %36 = dma.hbm_to_vmem [thread:$0]  %s7670_s1, 2560, %s31_s22, [#allocation3], %s4800_s9, %s4800_s9, %s4801_s16  }
  0x34   :  { %s4802_s19 = smov [#allocation7]   ;;  %s4803_s5 = smov [#allocation10]  }
  0x35   :  { %s61_s20 = sshll.u32 %s4802_s19, 4  ;;  %s85_s30 = sshll.u32 %s4803_s5, 4  ;;  %s62_s20 = int_to_ptr.vmem [resolvable:$true] %s61_s20  ;;  %s86_s30 = int_to_ptr.vmem [resolvable:$true] %s85_s30 }
  0x36   :  { %s4723_s24 = scalar_lea.hbm %s7676_s7, 128 }
  0x37   :  { %p4724_p10 = scmp.ne.s32.totalorder %s7676_s7, %s4723_s24  ;;  %p4727_p11 = scmp.lt.u32.totalorder %s4723_s24, %s7676_s7 }
  0x39   :  { %p4729_p12 = pnand %p4727_p11, %p4724_p10 }
  0x3b   :  { %4732 = shalt.err (!%p4729_p12)
}
  0x3c   :  { %s4733_s1 = scalar_lea.vmem %s62_s20, 128  ;;  %p4738_p0 = scmp.lt.s32.totalorder %s62_s20, %s62_s20 }
  0x3d   :  { %p4734_p13 = scmp.ne.s32.totalorder %s62_s20, %s4733_s1  ;;  %p4739_p1 = scmp.lt.s32.totalorder %s4733_s1, %s4733_s1 }
  0x3f   :  { %p4740_p2 = por %p4739_p1, %p4738_p0 }
  0x41   :  { %p4741_p3 = pnand %p4740_p2, %p4734_p13 }
  0x43   :  { %4744 = shalt.err (!%p4741_p3)
}
  0x44   :  { %64 = dma.hbm_to_vmem [thread:$0]  %s7676_s7, 128, %s62_s20, [#allocation6]  }
  0x45   :  { %s4745_s17 = scalar_lea.hbm %s7680_s11, 128 }
  0x46   :  { %p4746_p4 = scmp.ne.s32.totalorder %s7680_s11, %s4745_s17  ;;  %p4749_p5 = scmp.lt.u32.totalorder %s4745_s17, %s7680_s11 }
  0x48   :  { %p4751_p6 = pnand %p4749_p5, %p4746_p4 }
  0x4a   :  { %4754 = shalt.err (!%p4751_p6)
}
  0x4b   :  { %s4755_s23 = scalar_lea.vmem %s86_s30, 128  ;;  %p4760_p8 = scmp.lt.s32.totalorder %s86_s30, %s86_s30 }
  0x4c   :  { %p4756_p7 = scmp.ne.s32.totalorder %s86_s30, %s4755_s23  ;;  %p4761_p9 = scmp.lt.s32.totalorder %s4755_s23, %s4755_s23 }
  0x4e   :  { %p4762_p10 = por %p4761_p9, %p4760_p8 }
  0x50   :  { %p4763_p11 = pnand %p4762_p10, %p4756_p7 }
  0x52   :  { %4766 = shalt.err (!%p4763_p11)
}
  0x53   :  { %88 = dma.hbm_to_vmem [thread:$0]  %s7680_s11, 128, %s86_s30, [#allocation9]  }
  0x54   :  { %4789 = dma.done.wait [#allocation3], 2560  }
  0x55   :  { %4790 = vsyncadd [#allocation3], 4294964736 }
  0x56   :  { %4791 = dma.done.wait [#allocation6], 256  }
  0x57   :  { %4792 = vsyncadd [#allocation6], 4294967040 }
  0x58   :  { %4793 = dma.done.wait [#allocation9], 256  }
  0x59   :  { %4794 = vsyncadd [#allocation9], 4294967040  ;;  %v7684_v0 = vmov 0.0   ;;  %v4805_v1 = vmov 1   ;;  %v108_v2 = vld [vmem:[%s7669_s0] sm:$0xff]  ;;  %vm136_vm0 = vcmask 1043456   ;;  %v385_v26 = vlaneseq }
  0x5a   :  { %209 = vmatprep.mubr.f32.mxu0 %v7684_v0  ;;  %304 = vmatprep.mubr.f32.mxu1 %v7684_v0  ;;  %v109_v3 = vld [vmem:[%s7669_s0 + $0x8] sm:$0xff]  ;;  %v118_v4 = vcombine.high %v108_v2, %v108_v2  ;;  %v4999_v6 = vld [vmem:[%s7682_s13] sm:$0xff]  ;;  %vm120_vm1 = vcmask 31744   ;;  %v113_v9 = vld [vmem:[%s7671_s2 + $0x10] sm:$0xff]  ;;  %s4806_s5 = smov 1   ;;  %v4807_v25 = vmov 2  }
  0x5b   :  { %4636 = vset.pattern.permute.xlu0 %v4805_v1  ;;  %v119_v5 = vcombine.high %v109_v3, %v109_v3  ;;  %v111_v7 = vld [vmem:[%s7671_s2] sm:$0xff]  ;;  %v112_v8 = vld [vmem:[%s7671_s2 + $0x8] sm:$0xff]  ;;  %v114_v14 = vld [vmem:[%s7671_s2 + $0x18] sm:$0xff]  ;;  %4637 = vset.pattern.permute.xlu1 %v4807_v25  ;;  %v395_v27 = vshrl.u32 %v385_v26, 7  ;;  %v5062_v28 = vand.u32 127, %v385_v26  ;;  %vm462_vm4 = vcmask 195584  }
  0x5c   :  { %345 = vperm.xlu0 %4636, %v4999_v6   ;;  %4195 = vmatprep.subr.msk.mxu0 %vm136_vm0, %v118_v4  ;;  %v115_v22 = vld [vmem:[%s7671_s2 + $0x20] sm:$0xff]  ;;  %s4808_s2 = smov 127   ;;  %s4812_s7 = smov 112  }
  0x5d   :  { %4202 = vmatprep.subr.msk.mxu1 %vm136_vm0, %v119_v5  ;;  %4196 = vmatpush1.msk.msra.mxu0 %vm136_vm0, %v108_v2  ;;  %v5064_v29 = vsub.s32 0, %v395_v27  ;;  %v5066_v30 = vsub.s32 3, %v395_v27  ;;  %v5068_v31 = vsub.s32 1, %v395_v27  ;;  %v5070_v32 = vsub.s32 2, %v395_v27  ;;  %s4814_s25 = smov 51   ;;  %s4815_s26 = smov 48  }
  0x5e   :  { %4203 = vmatpush1.msk.msra.mxu1 %vm136_vm0, %v109_v3  ;;  %4197 = vmatmul.mubr.msk.f32.vlgmr.msra.gmra.mrb[0].mxu0 %vm120_vm1, %v111_v7  ;;  %v392_v33 = vld [vmem:[#allocation2] ss:$8 sm:$0xf]  ;;  %vm387_vm2 = vcmp.lt.s32.totalorder %v5062_v28, 1  ;;  %vm426_vm3 = vcmp.lt.s32.totalorder %v5062_v28, 127  ;;  %vm617_vm5 = vcmp.lt.s32.totalorder %v5062_v28, 16 }
  0x5f   :  { %4204 = vmatmul.mubr.msk.f32.vlgmr.msra.gmra.mrb[0].mxu1 %vm120_vm1, %v111_v7  ;;  %215 = vmatprep.mubr.f32.mxu0 %v7684_v0  ;;  %7821 = vst [vmem:[#allocation20_spill] sm:$0xff] %v5066_v30  ;;  %v5074_v36 = vrot.slane %v392_v33, %v5064_v29  ;;  %v5077_v37 = vrot.slane %v392_v33, %v5066_v30  ;;  %v432_v53 = vld [vmem:[#allocation2 + $0x1] ss:$8 sm:$0xf]  ;;  %vm657_vm6 = vcmp.lt.s32.totalorder %v5062_v28, 112  ;;  %s4816_s11 = smov 45  }
  0x60   :  { %310 = vmatprep.mubr.f32.mxu1 %v7684_v0  ;;  %v5080_v38 = vrot.slane %v392_v33, %v5068_v31  ;;  %v5083_v39 = vrot.slane %v392_v33, %v5070_v32  ;;  %v5101_v57 = vrot.slane %v432_v53, %v5070_v32  ;;  %v5104_v58 = vrot.slane %v432_v53, %v5068_v31  ;;  %s4817_s30 = smov 3   ;;  %s4818_s27 = smov 125  }
  0x61   :  { %7822 = vst [vmem:[#allocation21_spill] sm:$0xff] %v5074_v36  ;;  %7823 = vst [vmem:[#allocation22_spill] sm:$0xff] %v5077_v37  ;;  %v5107_v59 = vrot.slane %v432_v53, %v5066_v30  ;;  %v5110_v60 = vrot.slane %v432_v53, %v5064_v29  ;;  %s4819_s28 = smov 83   ;;  %s4820_s1 = smov 80   ;;  %vm847_vm7 = vcmp.lt.s32.totalorder %v5062_v28, 51  ;;  %vm887_vm8 = vcmp.lt.s32.totalorder %v5062_v28, 48 }
  0x62   :  { %4198 = vmatmul.mubr.msk.f32.gmra.mrb[2].mxu0 %vm120_vm1, %v112_v8  ;;  %7824 = vst [vmem:[#allocation23_spill] sm:$0xff] %v5080_v38  ;;  %7825 = vst [vmem:[#allocation24_spill] sm:$0xff] %v5083_v39  ;;  %s4821_s0 = smov 77   ;;  %s4823_s22 = smov 126   ;;  %vm927_vm9 = vcmp.lt.s32.totalorder %v5062_v28, 45  ;;  %vm967_vm10 = vcmp.lt.s32.totalorder %v5062_v28, 3 }
  0x63   :  { %4205 = vmatmul.mubr.msk.f32.gmra.mrb[2].mxu1 %vm120_vm1, %v112_v8  ;;  %221 = vmatprep.mubr.f32.mxu0 %v7684_v0  ;;  %7826 = vst [vmem:[#allocation25_spill] sm:$0xff] %v5101_v57  ;;  %7827 = vst [vmem:[#allocation26_spill] sm:$0xff] %v5104_v58  ;;  %vm1007_vm11 = vcmp.lt.s32.totalorder %v5062_v28, 125  ;;  %vm1318_vm12 = vcmp.lt.s32.totalorder %v5062_v28, 2  ;;  %vm1047_vm13 = vcmp.lt.s32.totalorder %v5062_v28, 83  ;;  %vm1087_vm14 = vcmp.lt.s32.totalorder %v5062_v28, 80 }
  0x64   :  { %316 = vmatprep.mubr.f32.mxu1 %v7684_v0  ;;  %7828 = vst [vmem:[#allocation27_spill] sm:$0xff] %v5107_v59  ;;  %7829 = vst [vmem:[#allocation28_spill] sm:$0xff] %v5110_v60  ;;  %vm1127_vm15 = vcmp.lt.s32.totalorder %v5062_v28, 77  ;;  %vm1163_vm0 = vcmask 588800   ;;  %s4827_s18 = smov 85   ;;  %s4828_s19 = smov 75  }
  0x65   :  { %s4829_s21 = smov 5   ;;  %s4830_s23 = smov 123  }
  0x66   :  { %4199 = vmatmul.mubr.msk.f32.gmra.mrb[4].mxu0 %vm120_vm1, %v113_v9  ;;  %s4831_s20 = smov 53   ;;  %s4832_s24 = smov 43  }
  0x67   :  { %4206 = vmatmul.mubr.msk.f32.gmra.mrb[4].mxu1 %vm120_vm1, %v113_v9  ;;  %227 = vmatprep.mubr.f32.mxu0 %v7684_v0  ;;  %v376_v9 = vld [vmem:[%s7672_s3] sm:$0xff]  ;;  %s4810_s3 = smov 16   ;;  %s4846_s29 = smov 15  }
  0x68   :  { %322 = vmatprep.mubr.f32.mxu1 %v7684_v0  ;;  %s4847_s15 = smov 113  }
  0x6a   :  { %4200 = vmatmul.mubr.msk.f32.gmra.mrb[6].mxu0 %vm120_vm1, %v114_v14 }
  0x6b   :  { %4207 = vmatmul.mubr.msk.f32.gmra.mrb[6].mxu1 %vm120_vm1, %v114_v14  ;;  %233 = vmatprep.mubr.f32.mxu0 %v7684_v0 }
  0x6c   :  { %328 = vmatprep.mubr.f32.mxu1 %v7684_v0 }
  0x6e   :  { %4201 = vmatmul.mubr.msk.f32.gmra.mrb[8].mxu0 %vm120_vm1, %v115_v22 }
  0x6f   :  { %4208 = vmatmul.mubr.msk.f32.gmra.mrb[8].mxu1 %vm120_vm1, %v115_v22  ;;  %530 = vmatprep.mubr.f32.mxu0 %v7684_v0  ;;  %v4809_v22 = vmov 5   ;;  %vm1390_vm1 = vcmp.lt.s32.totalorder %v5062_v28, 126 }
  0x70   :  { %601 = vmatprep.mubr.f32.mxu1 %v7684_v0 }
  0xdb   :  { %v346_v15 = vpop.permute.xlu0 %345 }
 0x131   :  { %v5023_v10 = vpop.f32.mrb[0].mxu0 }
 0x132   :  { %7817 = vst [vmem:[#allocation16_spill] sm:$0xff] %v5023_v10  ;;  %v5025_v11 = vpop.f32.mrb[0].mxu1  ;;  %v5027_v12 = vpop.f32.mrb[1].mxu0 }
 0x133   :  { %7818 = vst [vmem:[#allocation17_spill] sm:$0xff] %v5025_v11  ;;  %7819 = vst [vmem:[#allocation18_spill] sm:$0xff] %v5027_v12  ;;  %v5029_v13 = vpop.f32.mrb[1].mxu1 }
 0x134   :  { %7820 = vst [vmem:[#allocation19_spill] sm:$0xff] %v5029_v13 }
 0x135   :  { %v217_v16 = vpop.f32.mrb[2].mxu0 }
 0x136   :  { %v312_v17 = vpop.f32.mrb[2].mxu1  ;;  %v5038_v18 = vadd.f32 %v346_v15, %v217_v16  ;;  %v219_v20 = vpop.f32.mrb[3].mxu0 }
 0x137   :  { %v5040_v19 = vadd.f32 %v346_v15, %v312_v17  ;;  %v314_v21 = vpop.f32.mrb[3].mxu1  ;;  %v349_v23 = vadd.f32 %v346_v15, %v219_v20 }
 0x138   :  { %377 = vrot.lane.b32.xlu0 %v5038_v18, %s4806_s5  ;;  %v351_v24 = vadd.f32 %v346_v15, %v314_v21 }
 0x139   :  { %381 = vrot.lane.b32.xlu1 %v5040_v19, %s4806_s5  ;;  %v5131_v14 = vpop.f32.mrb[4].mxu0 }
 0x13a   :  { %v5133_v15 = vpop.f32.mrb[4].mxu1  ;;  %v5135_v16 = vpop.f32.mrb[5].mxu0 }
 0x13c   :  { %383 = vrot.lane.b32.xlu0 %v351_v24, %s4806_s5 }
 0x13d   :  { %379 = vrot.lane.b32.xlu1 %v349_v23, %s4806_s5  ;;  %v5137_v17 = vpop.f32.mrb[6].mxu0 }
 0x13e   :  { %7830 = vst [vmem:[#allocation29_spill] sm:$0xff] %v5137_v17 }
 0x140   :  { %420 = vrot.lane.b32.xlu0 %v349_v23, %s4808_s2 }
 0x141   :  { %418 = vrot.lane.b32.xlu1 %v5038_v18, %s4808_s2 }
 0x144   :  { %424 = vrot.lane.b32.xlu0 %v351_v24, %s4808_s2 }
 0x145   :  { %422 = vrot.lane.b32.xlu1 %v5040_v19, %s4808_s2 }
 0x149   :  { %459 = vperm.xlu1 %4637, %v4999_v6  }
 0x14d   :  { %4639 = vset.pattern.permute.xlu1 %v4809_v22 }
 0x1aa   :  { %v378_v35 = vpop.permute.xlu0 %377 }
 0x1ab   :  { %v382_v34 = vpop.permute.xlu1 %381 }
 0x1ae   :  { %v384_v40 = vpop.permute.xlu0 %383 }
 0x1af   :  { %v380_v41 = vpop.permute.xlu1 %379  ;;  %v388_v42 = vsel %vm387_vm2, %v382_v34, %v384_v40  ;;  %v391_v43 = vsel %vm387_vm2, %v384_v40, %v378_v35 }
 0x1b0   :  { %v389_v44 = vsel %vm387_vm2, %v380_v41, %v382_v34  ;;  %v390_v45 = vsel %vm387_vm2, %v378_v35, %v380_v41  ;;  %v414_v46 = vmul.f32 %v5074_v36, %v391_v43  ;;  %v417_v47 = vmul.f32 %v5077_v37, %v388_v42  ;;  %v623_v42 = vld [vmem:[#allocation2 + $0x2] ss:$8 sm:$0xf] }
 0x1b1   :  { %v415_v48 = vmul.f32 %v5080_v38, %v390_v45  ;;  %v416_v49 = vmul.f32 %v5083_v39, %v389_v44  ;;  %v4811_v35 = vmov 3   ;;  %v5159_v43 = vrot.slane %v623_v42, %v5068_v31 }
 0x1b2   :  { %v4231_v50 = vpack.c.bf16 %v5038_v18, %v414_v46  ;;  %v421_v52 = vpop.permute.xlu0 %420  ;;  %v4233_v56 = vpack.c.bf16 %v351_v24, %v417_v47  ;;  %v5139_v18 = vpop.f32.mrb[7].mxu0  ;;  %4638 = vset.pattern.permute.xlu0 %v4811_v35  ;;  %v5164_v47 = vrot.slane %v623_v42, %v5070_v32 }
 0x1b3   :  { %v4235_v51 = vpack.c.bf16 %v5040_v19, %v416_v49  ;;  %v419_v54 = vpop.permute.xlu1 %418  ;;  %v4229_v55 = vpack.c.bf16 %v349_v23, %v415_v48  ;;  %7831 = vst [vmem:[#allocation30_spill] sm:$0xff] %v5139_v18  ;;  %v5141_v19 = vpop.f32.mrb[5].mxu1  ;;  %7834 = vst [vmem:[#allocation33_spill] sm:$0xff] %v5159_v43  ;;  %v5168_v49 = vrot.slane %v623_v42, %v5064_v29 }
 0x1b4   :  { %4234 = vmatprep.subr.bf16.mxu1 %v4233_v56  ;;  %v429_v61 = vsel %vm426_vm3, %v419_v54, %v421_v52  ;;  %v5143_v20 = vpop.f32.mrb[6].mxu1  ;;  %7835 = vst [vmem:[#allocation34_spill] sm:$0xff] %v5164_v47 }
 0x1b5   :  { %4230 = vmatprep.subr.bf16.mxu0 %v4229_v55  ;;  %4236 = vmatpush1.bf16.msra.mxu1 %v4235_v51  ;;  %v454_v8 = vmul.f32 %v5110_v60, %v429_v61  ;;  %7832 = vst [vmem:[#allocation31_spill] sm:$0xff] %v5143_v20  ;;  %v5145_v21 = vpop.f32.mrb[7].mxu1  ;;  %7836 = vst [vmem:[#allocation35_spill] sm:$0xff] %v5168_v49 }
 0x1b6   :  { %4232 = vmatpush1.bf16.msra.mxu0 %v4231_v50  ;;  %v425_v62 = vpop.permute.xlu0 %424  ;;  %7833 = vst [vmem:[#allocation32_spill] sm:$0xff] %v5145_v21  ;;  %v5171_v50 = vrot.slane %v623_v42, %v5066_v30 }
 0x1b7   :  { %v423_v63 = vpop.permute.xlu1 %422  ;;  %v430_v1 = vsel %vm426_vm3, %v425_v62, %v419_v54 }
 0x1b8   :  { %v427_v2 = vsel %vm426_vm3, %v423_v63, %v425_v62  ;;  %v428_v3 = vsel %vm426_vm3, %v421_v52, %v423_v63  ;;  %v457_v7 = vmul.f32 %v5107_v59, %v430_v1  ;;  %7837 = vst [vmem:[#allocation36_spill] sm:$0xff] %v5171_v50 }
 0x1b9   :  { %v456_v4 = vmul.f32 %v5101_v57, %v427_v2  ;;  %v455_v5 = vmul.f32 %v5104_v58, %v428_v3  ;;  %v663_v2 = vld [vmem:[#allocation2 + $0x3] ss:$8 sm:$0xf] }
 0x1ba   :  { %541 = vmatprep.subr.mxu1 %v457_v7  ;;  %v5190_v22 = vrot.slane %v663_v2, %v5070_v32 }
 0x1bb   :  { %470 = vmatprep.subr.mxu0 %v455_v5  ;;  %542 = vmatpush1.msra.mxu1 %v456_v4 }
 0x1bc   :  { %471 = vmatpush1.msra.mxu0 %v454_v8  ;;  %4210 = vmatmul.mubr.msk.f32.vlgmr.msra.gmra.mrb[10].mxu1 %vm462_vm4, %v376_v9  ;;  %v5184_v8 = vrot.slane %v663_v2, %v5068_v31  ;;  %7840 = vst [vmem:[#allocation39_spill] sm:$0xff] %v5190_v22 }
 0x1bd   :  { %4209 = vmatmul.mubr.msk.f32.vlgmr.msra.gmra.mrb[10].mxu0 %vm462_vm4, %v376_v9  ;;  %831 = vmatprep.mubr.f32.mxu1 %v7684_v0  ;;  %v5187_v9 = vrot.slane %v663_v2, %v5064_v29 }
 0x1be   :  { %760 = vmatprep.mubr.f32.mxu0 %v7684_v0  ;;  %7838 = vst [vmem:[#allocation37_spill] sm:$0xff] %v5184_v8 }
 0x1bf   :  { %7839 = vst [vmem:[#allocation38_spill] sm:$0xff] %v5187_v9 }
 0x1c8   :  { %v460_v23 = vpop.permute.xlu1 %459 }
 0x28f   :  { %v603_v25 = vpop.f32.mrb[10].mxu1 }
 0x290   :  { %v532_v24 = vpop.f32.mrb[10].mxu0  ;;  %v605_v33 = vpop.f32.mrb[11].mxu1  ;;  %v604_v40 = vadd.f32 %v603_v25, %v460_v23 }
 0x291   :  { %v533_v26 = vadd.f32 %v532_v24, %v460_v23  ;;  %v534_v27 = vpop.f32.mrb[11].mxu0  ;;  %v606_v41 = vadd.f32 %v605_v33, %v460_v23 }
 0x292   :  { %v535_v34 = vadd.f32 %v534_v27, %v460_v23  ;;  %v5193_v23 = vrot.slane %v663_v2, %v5066_v30 }
 0x293   :  { %609 = vrot.lane.b32.xlu0 %v533_v26, %s4810_s3 }
 0x294   :  { %611 = vrot.lane.b32.xlu1 %v535_v34, %s4810_s3  ;;  %7841 = vst [vmem:[#allocation40_spill] sm:$0xff] %v5193_v23 }
 0x297   :  { %613 = vrot.lane.b32.xlu0 %v604_v40, %s4810_s3 }
 0x298   :  { %615 = vrot.lane.b32.xlu1 %v606_v41, %s4810_s3 }
 0x29b   :  { %649 = vrot.lane.b32.xlu0 %v533_v26, %s4812_s7 }
 0x29c   :  { %651 = vrot.lane.b32.xlu1 %v535_v34, %s4812_s7 }
 0x29f   :  { %653 = vrot.lane.b32.xlu0 %v604_v40, %s4812_s7 }
 0x2a0   :  { %655 = vrot.lane.b32.xlu1 %v606_v41, %s4812_s7 }
 0x2a3   :  { %690 = vperm.xlu0 %4638, %v4999_v6  }
 0x2a4   :  { %353 = vperm.xlu1 %4639, %v4999_v6  }
 0x305   :  { %v610_v44 = vpop.permute.xlu0 %609 }
 0x306   :  { %v612_v45 = vpop.permute.xlu1 %611 }
 0x307   :  { %v620_v46 = vsel %vm617_vm5, %v610_v44, %v612_v45 }
 0x308   :  { %v646_v48 = vmul.f32 %v5159_v43, %v620_v46 }
 0x309   :  { %v614_v51 = vpop.permute.xlu0 %613 }
 0x30a   :  { %v619_v52 = vsel %vm617_vm5, %v612_v45, %v614_v51  ;;  %v616_v53 = vpop.permute.xlu1 %615  ;;  %v4237_v54 = vpack.c.bf16 %v535_v34, %v646_v48 }
 0x30b   :  { %v647_v55 = vmul.f32 %v5164_v47, %v619_v52  ;;  %v618_v56 = vsel %vm617_vm5, %v614_v51, %v616_v53  ;;  %v621_v61 = vsel %vm617_vm5, %v616_v53, %v610_v44  ;;  %v608_v44 = vld [vmem:[%s7673_s4] sm:$0xff]  ;;  %s4813_s4 = smov 2  }
 0x30c   :  { %v645_v62 = vmul.f32 %v5168_v49, %v621_v61  ;;  %v648_v63 = vmul.f32 %v5171_v50, %v618_v56  ;;  %4238 = vmatprep.subr.bf16.mxu0 %v4237_v54 }
 0x30d   :  { %v650_v1 = vpop.permute.xlu0 %649  ;;  %v4243_v7 = vpack.c.bf16 %v604_v40, %v647_v55 }
 0x30e   :  { %v4239_v3 = vpack.c.bf16 %v533_v26, %v645_v62  ;;  %v652_v4 = vpop.permute.xlu1 %651  ;;  %v4241_v5 = vpack.c.bf16 %v606_v41, %v648_v63  ;;  %v4822_v62 = vmov 6  }
 0x30f   :  { %v660_v24 = vsel %vm657_vm6, %v650_v1, %v652_v4  ;;  %4640 = vset.pattern.permute.xlu1 %v4822_v62 }
 0x310   :  { %4240 = vmatpush1.bf16.msra.mxu0 %v4239_v3  ;;  %4242 = vmatprep.subr.bf16.mxu1 %v4241_v5  ;;  %v685_v40 = vmul.f32 %v5187_v9, %v660_v24 }
 0x311   :  { %4244 = vmatpush1.bf16.msra.mxu1 %v4243_v7  ;;  %v654_v25 = vpop.permute.xlu0 %653 }
 0x312   :  { %v659_v26 = vsel %vm657_vm6, %v652_v4, %v654_v25  ;;  %v656_v27 = vpop.permute.xlu1 %655 }
 0x313   :  { %v658_v33 = vsel %vm657_vm6, %v654_v25, %v656_v27  ;;  %v661_v34 = vsel %vm657_vm6, %v656_v27, %v650_v1  ;;  %v686_v35 = vmul.f32 %v5184_v8, %v659_v26 }
 0x314   :  { %v687_v41 = vmul.f32 %v5190_v22, %v658_v33  ;;  %v688_v42 = vmul.f32 %v5193_v23, %v661_v34  ;;  %v853_v33 = vld [vmem:[#allocation2 + $0x4] ss:$8 sm:$0xf] }
 0x315   :  { %700 = vmatprep.subr.mxu0 %v686_v35  ;;  %v893_v35 = vld [vmem:[#allocation2 + $0x5] ss:$8 sm:$0xf]  ;;  %v866_v12 = vrot.slane %v853_v33, %v5070_v32 }
 0x316   :  { %701 = vmatpush1.msra.mxu0 %v685_v40  ;;  %771 = vmatprep.subr.mxu1 %v688_v42  ;;  %v5339_v42 = vrot.slane %v893_v35, %v5068_v31  ;;  %v5352_v13 = vrot.slane %v893_v35, %v5064_v29  ;;  %v5355_v11 = vrot.slane %v893_v35, %v5066_v30 }
 0x317   :  { %4211 = vmatmul.mubr.msk.f32.vlgmr.msra.gmra.mrb[12].mxu0 %vm462_vm4, %v608_v44  ;;  %772 = vmatpush1.msra.mxu1 %v687_v41  ;;  %v862_v41 = vrot.slane %v853_v33, %v5068_v31 }
 0x318   :  { %4212 = vmatmul.mubr.msk.f32.vlgmr.msra.gmra.mrb[12].mxu1 %vm462_vm4, %v608_v44  ;;  %1231 = vmatprep.mubr.f32.mxu0 %v7684_v0  ;;  %7842 = vst [vmem:[#allocation41_spill] sm:$0xff] %v5339_v42  ;;  %7844 = vst [vmem:[#allocation43_spill] sm:$0xff] %v5352_v13  ;;  %vm1426_vm4 = vcmask 326656  }
 0x319   :  { %1302 = vmatprep.mubr.f32.mxu1 %v7684_v0  ;;  %7845 = vst [vmem:[#allocation44_spill] sm:$0xff] %v5355_v11 }
 0x323   :  { %v354_v45 = vpop.permute.xlu1 %353 }
 0x324   :  { %v5215_v46 = vadd.f32 %v354_v45, %v5131_v14  ;;  %v5218_v48 = vadd.f32 %v354_v45, %v5135_v16  ;;  %v5225_v51 = vadd.f32 %v354_v45, %v5133_v15  ;;  %v5228_v52 = vadd.f32 %v354_v45, %v5141_v19  ;;  %v691_v14 = vpop.permute.xlu0 %690 }
 0x326   :  { %1310 = vrot.lane.b32.xlu1 %v5215_v46, %s4813_s4  ;;  %1312 = vrot.lane.b32.xlu0 %v5218_v48, %s4813_s4 }
 0x32a   :  { %1314 = vrot.lane.b32.xlu1 %v5225_v51, %s4813_s4  ;;  %1316 = vrot.lane.b32.xlu0 %v5228_v52, %s4813_s4 }
 0x32e   :  { %1350 = vrot.lane.b32.xlu1 %v5215_v46, %s4806_s5  ;;  %1352 = vrot.lane.b32.xlu0 %v5218_v48, %s4806_s5 }
 0x332   :  { %1354 = vrot.lane.b32.xlu1 %v5225_v51, %s4806_s5  ;;  %1356 = vrot.lane.b32.xlu0 %v5228_v52, %s4806_s5 }
 0x336   :  { %1366 = vrot.lane.b32.xlu1 %v5215_v46, %s4808_s2  ;;  %1368 = vrot.lane.b32.xlu0 %v5218_v48, %s4808_s2 }
 0x398   :  { %v5315_v63 = vpop.permute.xlu1 %1310  ;;  %v5317_v1 = vpop.permute.xlu0 %1312 }
 0x39c   :  { %v5319_v2 = vpop.permute.xlu1 %1314  ;;  %v5321_v3 = vpop.permute.xlu0 %1316 }
 0x3a0   :  { %v5323_v4 = vpop.permute.xlu1 %1350  ;;  %v5325_v5 = vpop.permute.xlu0 %1352 }
 0x3a4   :  { %v5327_v7 = vpop.permute.xlu1 %1354  ;;  %v5329_v24 = vpop.permute.xlu0 %1356 }
 0x3a8   :  { %v5331_v25 = vpop.permute.xlu1 %1366  ;;  %v5333_v26 = vpop.permute.xlu0 %1368 }
 0x3ea   :  { %v762_v15 = vpop.f32.mrb[12].mxu0 }
 0x3eb   :  { %v5246_v16 = vadd.f32 %v762_v15, %v691_v14  ;;  %v764_v19 = vpop.f32.mrb[13].mxu0  ;;  %v833_v53 = vpop.f32.mrb[12].mxu1  ;;  %v858_v15 = vrot.slane %v853_v33, %v5064_v29 }
 0x3ec   :  { %v5248_v54 = vadd.f32 %v764_v19, %v691_v14  ;;  %v835_v55 = vpop.f32.mrb[13].mxu1  ;;  %v5252_v56 = vadd.f32 %v833_v53, %v691_v14  ;;  %v870_v19 = vrot.slane %v853_v33, %v5066_v30 }
 0x3ed   :  { %839 = vrot.lane.b32.xlu1 %v5246_v16, %s4814_s25  ;;  %v5254_v61 = vadd.f32 %v835_v55, %v691_v14  ;;  %v5348_v55 = vrot.slane %v893_v35, %v5070_v32 }
 0x3ee   :  { %841 = vrot.lane.b32.xlu0 %v5248_v54, %s4814_s25 }
 0x3ef   :  { %7843 = vst [vmem:[#allocation42_spill] sm:$0xff] %v5348_v55 }
 0x3f1   :  { %843 = vrot.lane.b32.xlu1 %v5252_v56, %s4814_s25 }
 0x3f2   :  { %845 = vrot.lane.b32.xlu0 %v5254_v61, %s4814_s25 }
 0x3f5   :  { %879 = vrot.lane.b32.xlu1 %v5246_v16, %s4815_s26 }
 0x3f6   :  { %881 = vrot.lane.b32.xlu0 %v5248_v54, %s4815_s26 }
 0x3f9   :  { %883 = vrot.lane.b32.xlu1 %v5252_v56, %s4815_s26 }
 0x3fa   :  { %885 = vrot.lane.b32.xlu0 %v5254_v61, %s4815_s26 }
 0x3fd   :  { %919 = vrot.lane.b32.xlu1 %v5246_v16, %s4816_s11 }
 0x3fe   :  { %921 = vrot.lane.b32.xlu0 %v5248_v54, %s4816_s11 }
 0x401   :  { %923 = vrot.lane.b32.xlu1 %v5252_v56, %s4816_s11 }
 0x402   :  { %925 = vrot.lane.b32.xlu0 %v5254_v61, %s4816_s11  ;;  %s4839_s11 = smov 7  }
 0x405   :  { %959 = vrot.lane.b32.xlu1 %v5246_v16, %s4817_s30 }
 0x406   :  { %961 = vrot.lane.b32.xlu0 %v5248_v54, %s4817_s30 }
 0x409   :  { %963 = vrot.lane.b32.xlu1 %v5252_v56, %s4817_s30 }
 0x40a   :  { %965 = vrot.lane.b32.xlu0 %v5254_v61, %s4817_s30 }
 0x40d   :  { %999 = vrot.lane.b32.xlu1 %v5246_v16, %s4818_s27 }
 0x40e   :  { %1001 = vrot.lane.b32.xlu0 %v5248_v54, %s4818_s27 }
 0x411   :  { %1003 = vrot.lane.b32.xlu1 %v5252_v56, %s4818_s27 }
 0x412   :  { %1005 = vrot.lane.b32.xlu0 %v5254_v61, %s4818_s27 }
 0x415   :  { %1039 = vrot.lane.b32.xlu1 %v5246_v16, %s4819_s28 }
 0x416   :  { %1041 = vrot.lane.b32.xlu0 %v5248_v54, %s4819_s28 }
 0x419   :  { %1043 = vrot.lane.b32.xlu1 %v5252_v56, %s4819_s28 }
 0x41a   :  { %1045 = vrot.lane.b32.xlu0 %v5254_v61, %s4819_s28  ;;  %s4842_s28 = smov 9  }
 0x41d   :  { %1079 = vrot.lane.b32.xlu1 %v5246_v16, %s4820_s1 }
 0x41e   :  { %1081 = vrot.lane.b32.xlu0 %v5248_v54, %s4820_s1 }
 0x421   :  { %1083 = vrot.lane.b32.xlu1 %v5252_v56, %s4820_s1 }
 0x422   :  { %1085 = vrot.lane.b32.xlu0 %v5254_v61, %s4820_s1 }
 0x425   :  { %1119 = vrot.lane.b32.xlu1 %v5246_v16, %s4821_s0 }
 0x426   :  { %1121 = vrot.lane.b32.xlu0 %v5248_v54, %s4821_s0 }
 0x429   :  { %1123 = vrot.lane.b32.xlu1 %v5252_v56, %s4821_s0 }
 0x42a   :  { %1125 = vrot.lane.b32.xlu0 %v5254_v61, %s4821_s0 }
 0x42d   :  { %1370 = vrot.lane.b32.xlu1 %v5225_v51, %s4808_s2 }
 0x42e   :  { %1372 = vrot.lane.b32.xlu0 %v5228_v52, %s4808_s2 }
 0x431   :  { %1382 = vrot.lane.b32.xlu1 %v5215_v46, %s4823_s22 }
 0x432   :  { %1384 = vrot.lane.b32.xlu0 %v5218_v48, %s4823_s22 }
 0x435   :  { %1386 = vrot.lane.b32.xlu1 %v5225_v51, %s4823_s22 }
 0x436   :  { %1388 = vrot.lane.b32.xlu0 %v5228_v52, %s4823_s22 }
 0x439   :  { %1423 = vperm.xlu1 %4640, %v4999_v6  }
 0x45f   :  { %v840_v6 = vpop.permute.xlu1 %839 }
 0x460   :  { %v842_v27 = vpop.permute.xlu0 %841 }
 0x461   :  { %v850_v44 = vsel %vm847_vm7, %v840_v6, %v842_v27 }
 0x462   :  { %v876_v62 = vmul.f32 %v862_v41, %v850_v44 }
 0x463   :  { %v844_v34 = vpop.permute.xlu1 %843 }
 0x464   :  { %v846_v40 = vpop.permute.xlu0 %845  ;;  %v849_v41 = vsel %vm847_vm7, %v842_v27, %v844_v34 }
 0x465   :  { %v848_v10 = vsel %vm847_vm7, %v844_v34, %v846_v40  ;;  %v851_v21 = vsel %vm847_vm7, %v846_v40, %v840_v6  ;;  %v877_v27 = vmul.f32 %v866_v12, %v849_v41  ;;  %vm1581_vm7 = vcmp.lt.s32.totalorder %v5062_v28, 32 }
 0x466   :  { %v875_v17 = vmul.f32 %v858_v15, %v851_v21  ;;  %v878_v23 = vmul.f32 %v870_v19, %v848_v10 }
 0x467   :  { %v880_v45 = vpop.permute.xlu1 %879 }
 0x468   :  { %v882_v14 = vpop.permute.xlu0 %881 }
 0x469   :  { %v890_v53 = vsel %vm887_vm8, %v880_v45, %v882_v14 }
 0x46a   :  { %v916_v0 = vmul.f32 %v5339_v42, %v890_v53 }
 0x46b   :  { %v884_v20 = vpop.permute.xlu1 %883 }
 0x46c   :  { %v889_v44 = vsel %vm887_vm8, %v882_v14, %v884_v20  ;;  %v886_v53 = vpop.permute.xlu0 %885  ;;  %v4245_v42 = vpack.c.bf16 %v916_v0, %v876_v62 }
 0x46d   :  { %v917_v35 = vmul.f32 %v5348_v55, %v889_v44  ;;  %v888_v33 = vsel %vm887_vm8, %v884_v20, %v886_v53  ;;  %v891_v18 = vsel %vm887_vm8, %v886_v53, %v880_v45  ;;  %v933_v44 = vld [vmem:[#allocation2 + $0x6] ss:$8 sm:$0xf]  ;;  %v973_v55 = vld [vmem:[#allocation2 + $0x7] ss:$8 sm:$0xf] }
 0x46e   :  { %v915_v6 = vmul.f32 %v5352_v13, %v891_v18  ;;  %v918_v40 = vmul.f32 %v5355_v11, %v888_v33  ;;  %4246 = vmatprep.subr.bf16.mxu0 %v4245_v42  ;;  %v942_v18 = vrot.slane %v933_v44, %v5068_v31  ;;  %v5377_v12 = vrot.slane %v973_v55, %v5068_v31 }
 0x46f   :  { %v920_v34 = vpop.permute.xlu1 %919  ;;  %v4263_v62 = vpack.c.bf16 %v917_v35, %v877_v27  ;;  %v938_v42 = vrot.slane %v933_v44, %v5064_v29  ;;  %v950_v45 = vrot.slane %v933_v44, %v5066_v30  ;;  %v5386_v19 = vrot.slane %v973_v55, %v5070_v32 }
 0x470   :  { %v4247_v14 = vpack.c.bf16 %v915_v6, %v875_v17  ;;  %v922_v22 = vpop.permute.xlu0 %921  ;;  %v4261_v0 = vpack.c.bf16 %v918_v40, %v878_v23  ;;  %7846 = vst [vmem:[#allocation45_spill] sm:$0xff] %v5377_v12  ;;  %v5390_v35 = vrot.slane %v973_v55, %v5064_v29  ;;  %v5393_v33 = vrot.slane %v973_v55, %v5066_v30 }
 0x471   :  { %v930_v17 = vsel %vm927_vm9, %v920_v34, %v922_v22  ;;  %7847 = vst [vmem:[#allocation46_spill] sm:$0xff] %v5386_v19  ;;  %v946_v6 = vrot.slane %v933_v44, %v5070_v32 }
 0x472   :  { %4248 = vmatpush1.bf16.msra.mxu0 %v4247_v14  ;;  %4262 = vmatprep.subr.bf16.mxu1 %v4261_v0  ;;  %v956_v41 = vmul.f32 %v942_v18, %v930_v17  ;;  %7848 = vst [vmem:[#allocation47_spill] sm:$0xff] %v5390_v35  ;;  %7849 = vst [vmem:[#allocation48_spill] sm:$0xff] %v5393_v33 }
 0x473   :  { %v924_v20 = vpop.permute.xlu1 %923  ;;  %4264 = vmatpush1.bf16.msra.mxu1 %v4263_v62 }
 0x474   :  { %v926_v10 = vpop.permute.xlu0 %925  ;;  %v929_v0 = vsel %vm927_vm9, %v922_v22, %v924_v20 }
 0x475   :  { %v928_v40 = vsel %vm927_vm9, %v924_v20, %v926_v10  ;;  %v931_v27 = vsel %vm927_vm9, %v926_v10, %v920_v34  ;;  %v1013_v34 = vld [vmem:[#allocation2 + $0x20] ss:$8 sm:$0xf]  ;;  %vm1653_vm9 = vcmp.lt.s32.totalorder %v5062_v28, 96 }
 0x476   :  { %v955_v10 = vmul.f32 %v938_v42, %v931_v27  ;;  %v958_v11 = vmul.f32 %v950_v45, %v928_v40  ;;  %v5418_v42 = vrot.slane %v1013_v34, %v5068_v31  ;;  %v5421_v45 = vrot.slane %v1013_v34, %v5070_v32 }
 0x477   :  { %v960_v21 = vpop.permute.xlu1 %959 }
 0x478   :  { %v962_v23 = vpop.permute.xlu0 %961  ;;  %7851 = vst [vmem:[#allocation50_spill] sm:$0xff] %v5418_v42  ;;  %7852 = vst [vmem:[#allocation51_spill] sm:$0xff] %v5421_v45 }
 0x479   :  { %v970_v15 = vsel %vm967_vm10, %v960_v21, %v962_v23 }
 0x47a   :  { %v996_v53 = vmul.f32 %v5377_v12, %v970_v15 }
 0x47b   :  { %v964_v14 = vpop.permute.xlu1 %963 }
 0x47c   :  { %v969_v62 = vsel %vm967_vm10, %v962_v23, %v964_v14  ;;  %v966_v18 = vpop.permute.xlu0 %965  ;;  %v4249_v17 = vpack.c.bf16 %v996_v53, %v956_v41  ;;  %v957_v23 = vmul.f32 %v946_v6, %v929_v0  ;;  %v5424_v6 = vrot.slane %v1013_v34, %v5066_v30 }
 0x47d   :  { %v997_v55 = vmul.f32 %v5386_v19, %v969_v62  ;;  %v968_v44 = vsel %vm967_vm10, %v964_v14, %v966_v18  ;;  %v971_v15 = vsel %vm967_vm10, %v966_v18, %v960_v21  ;;  %v5413_v62 = vrot.slane %v1013_v34, %v5064_v29 }
 0x47e   :  { %v995_v22 = vmul.f32 %v5390_v35, %v971_v15  ;;  %v998_v20 = vmul.f32 %v5393_v33, %v968_v44  ;;  %4250 = vmatprep.subr.bf16.mxu0 %v4249_v17  ;;  %7853 = vst [vmem:[#allocation52_spill] sm:$0xff] %v5424_v6 }
 0x47f   :  { %v1000_v41 = vpop.permute.xlu1 %999  ;;  %7850 = vst [vmem:[#allocation49_spill] sm:$0xff] %v5413_v62  ;;  %v4267_v19 = vpack.c.bf16 %v997_v55, %v957_v23 }
 0x480   :  { %v4251_v53 = vpack.c.bf16 %v995_v22, %v955_v10  ;;  %v1002_v14 = vpop.permute.xlu0 %1001  ;;  %v4265_v13 = vpack.c.bf16 %v998_v20, %v958_v11 }
 0x481   :  { %v1010_v21 = vsel %vm1007_vm11, %v1000_v41, %v1002_v14 }
 0x482   :  { %4252 = vmatpush1.bf16.msra.mxu0 %v4251_v53  ;;  %4266 = vmatprep.subr.bf16.mxu1 %v4265_v13  ;;  %v1035_v27 = vmul.f32 %v5413_v62, %v1010_v21  ;;  %v1093_v21 = vld [vmem:[#allocation2 + $0x22] ss:$8 sm:$0xf] }
 0x483   :  { %v1004_v40 = vpop.permute.xlu1 %1003  ;;  %4268 = vmatpush1.bf16.msra.mxu1 %v4267_v19 }
 0x484   :  { %v1009_v11 = vsel %vm1007_vm11, %v1002_v14, %v1004_v40  ;;  %v1006_v0 = vpop.permute.xlu0 %1005  ;;  %v4255_v34 = vpack.c.bf16 %v1035_v27, %v5246_v16  ;;  %v1053_v14 = vld [vmem:[#allocation2 + $0x21] ss:$8 sm:$0xf] }
 0x485   :  { %v1036_v18 = vmul.f32 %v5418_v42, %v1009_v11  ;;  %v1008_v17 = vsel %vm1007_vm11, %v1004_v40, %v1006_v0  ;;  %v1011_v13 = vsel %vm1007_vm11, %v1006_v0, %v1000_v41  ;;  %v1324_v41 = vld [vmem:[#allocation2 + $0x24] ss:$8 sm:$0xf]  ;;  %v1058_v40 = vrot.slane %v1053_v14, %v5064_v29 }
 0x486   :  { %v1037_v55 = vmul.f32 %v5421_v45, %v1008_v17  ;;  %v1038_v44 = vmul.f32 %v5424_v6, %v1011_v13  ;;  %v5444_v16 = vrot.slane %v1324_v41, %v5068_v31  ;;  %v1062_v27 = vrot.slane %v1053_v14, %v5068_v31 }
 0x487   :  { %v1040_v15 = vpop.permute.xlu1 %1039  ;;  %v4253_v19 = vpack.c.bf16 %v1036_v18, %v5248_v54  ;;  %v5447_v54 = vrot.slane %v1324_v41, %v5070_v32  ;;  %v5456_v11 = vrot.slane %v1093_v21, %v5064_v29  ;;  %v1066_v17 = vrot.slane %v1053_v14, %v5070_v32 }
 0x488   :  { %v4271_v10 = vpack.c.bf16 %v1037_v55, %v5252_v56  ;;  %v1042_v22 = vpop.permute.xlu0 %1041  ;;  %v4269_v20 = vpack.c.bf16 %v1038_v44, %v5254_v61  ;;  %v1321_v61 = vsel %vm1318_vm12, %v5315_v63, %v5317_v1  ;;  %v5464_v55 = vrot.slane %v1093_v21, %v5068_v31 }
 0x489   :  { %4254 = vmatprep.subr.bf16.mxu0 %v4253_v19  ;;  %7854 = vst [vmem:[#allocation53_spill] sm:$0xff] %v5456_v11  ;;  %v1050_v18 = vsel %vm1047_vm13, %v1040_v15, %v1042_v22  ;;  %v1070_v19 = vrot.slane %v1053_v14, %v5066_v30  ;;  %v5479_v6 = vrot.slane %v1324_v41, %v5066_v30 }
 0x48a   :  { %4256 = vmatpush1.bf16.msra.mxu0 %v4255_v34  ;;  %4270 = vmatprep.subr.bf16.mxu1 %v4269_v20  ;;  %7855 = vst [vmem:[#allocation54_spill] sm:$0xff] %v5464_v55  ;;  %v5470_v34 = vrot.slane %v1093_v21, %v5070_v32  ;;  %v5476_v20 = vrot.slane %v1324_v41, %v5064_v29 }
 0x48b   :  { %v1044_v23 = vpop.permute.xlu1 %1043  ;;  %4272 = vmatpush1.bf16.msra.mxu1 %v4271_v10  ;;  %v5473_v10 = vrot.slane %v1093_v21, %v5066_v30  ;;  %v5486_v14 = vmul.f32 %v5444_v16, %v1321_v61  ;;  %v1075_v42 = vmul.f32 %v1058_v40, %v1050_v18 }
 0x48c   :  { %v1046_v53 = vpop.permute.xlu0 %1045  ;;  %v1049_v44 = vsel %vm1047_vm13, %v1042_v22, %v1044_v23  ;;  %7856 = vst [vmem:[#allocation55_spill] sm:$0xff] %v5470_v34 }
 0x48d   :  { %7857 = vst [vmem:[#allocation56_spill] sm:$0xff] %v5473_v10  ;;  %v1048_v45 = vsel %vm1047_vm13, %v1044_v23, %v1046_v53  ;;  %v1051_v22 = vsel %vm1047_vm13, %v1046_v53, %v1040_v15  ;;  %v1076_v12 = vmul.f32 %v1062_v27, %v1049_v44  ;;  %v1322_v44 = vsel %vm1318_vm12, %v5321_v3, %v5315_v63 }
 0x48e   :  { %v1077_v53 = vmul.f32 %v1066_v17, %v1048_v45  ;;  %v1078_v8 = vmul.f32 %v1070_v19, %v1051_v22  ;;  %v1133_v45 = vld [vmem:[#allocation2 + $0x23] ss:$8 sm:$0xf]  ;;  %v1359_v63 = vsel %vm387_vm2, %v5325_v5, %v5327_v7  ;;  %vm1843_vm13 = vcmp.lt.s32.totalorder %v5062_v28, 85 }
 0x48f   :  { %v1080_v56 = vpop.permute.xlu1 %1079 }
 0x490   :  { %v1082_v0 = vpop.permute.xlu0 %1081 }
 0x491   :  { %v1090_v13 = vsel %vm1087_vm14, %v1080_v56, %v1082_v0 }
 0x492   :  { %v1115_v21 = vmul.f32 %v5456_v11, %v1090_v13 }
 0x493   :  { %v1084_v62 = vpop.permute.xlu1 %1083 }
 0x494   :  { %v1089_v33 = vsel %vm1087_vm14, %v1082_v0, %v1084_v62  ;;  %v1086_v35 = vpop.permute.xlu0 %1085  ;;  %v1320_v0 = vsel %vm1318_vm12, %v5317_v1, %v5319_v2  ;;  %v4259_v27 = vpack.c.bf16 %v1115_v21, %v1075_v42  ;;  %v1319_v1 = vsel %vm1318_vm12, %v5319_v2, %v5321_v3 }
 0x495   :  { %v1116_v41 = vmul.f32 %v5464_v55, %v1089_v33  ;;  %v1088_v23 = vsel %vm1087_vm14, %v1084_v62, %v1086_v35  ;;  %v1091_v15 = vsel %vm1087_vm14, %v1086_v35, %v1080_v56  ;;  %v1360_v33 = vsel %vm387_vm2, %v5323_v4, %v5325_v5 }
 0x496   :  { %v1117_v61 = vmul.f32 %v5470_v34, %v1088_v23  ;;  %v1118_v40 = vmul.f32 %v5473_v10, %v1091_v15  ;;  %v1361_v35 = vsel %vm387_vm2, %v5329_v24, %v5323_v4  ;;  %v1358_v4 = vsel %vm387_vm2, %v5327_v7, %v5329_v24 }
 0x497   :  { %v1120_v62 = vpop.permute.xlu1 %1119  ;;  %v4257_v56 = vpack.c.bf16 %v1116_v41, %v1076_v12  ;;  %v1142_v12 = vrot.slane %v1133_v45, %v5068_v31  ;;  %v1146_v42 = vrot.slane %v1133_v45, %v5070_v32  ;;  %v1150_v2 = vrot.slane %v1133_v45, %v5066_v30 }
 0x498   :  { %v4275_v18 = vpack.c.bf16 %v1117_v61, %v1077_v53  ;;  %v1122_v17 = vpop.permute.xlu0 %1121  ;;  %v4273_v13 = vpack.c.bf16 %v1118_v40, %v1078_v8  ;;  %v1138_v8 = vrot.slane %v1133_v45, %v5064_v29  ;;  %v1363_v19 = vmul.f32 %v1360_v33, %v5080_v38 }
 0x499   :  { %4258 = vmatprep.subr.bf16.mxu0 %v4257_v56  ;;  %v1362_v3 = vmul.f32 %v1361_v35, %v5074_v36  ;;  %v1130_v24 = vsel %vm1127_vm15, %v1120_v62, %v1122_v17  ;;  %v1346_v21 = vmul.f32 %v5476_v20, %v1322_v44  ;;  %v1349_v41 = vmul.f32 %v5479_v6, %v1319_v1  ;;  %v838_v1 = vld [vmem:[#allocation5] sm:$0xff] }
 0x49a   :  { %4260 = vmatpush1.bf16.msra.mxu0 %v4259_v27  ;;  %4274 = vmatprep.subr.bf16.mxu1 %v4273_v13  ;;  %v1365_v23 = vmul.f32 %v1358_v4, %v5077_v37  ;;  %v1376_v5 = vsel %vm426_vm3, %v5331_v25, %v5333_v26  ;;  %v1364_v33 = vmul.f32 %v1359_v63, %v5083_v39  ;;  %v1396_v63 = vld [vmem:[#allocation2 + $0x25] ss:$8 sm:$0xf] }
 0x49b   :  { %v1124_v22 = vpop.permute.xlu1 %1123  ;;  %4276 = vmatpush1.bf16.msra.mxu1 %v4275_v18  ;;  %v1155_v35 = vmul.f32 %v1138_v8, %v1130_v24  ;;  %v1348_v27 = vmul.f32 %v5447_v54, %v1320_v0  ;;  %v4279_v18 = vpack.c.bf16 %v1362_v3, %v1346_v21  ;;  %v4277_v13 = vpack.c.bf16 %v1363_v19, %v5486_v14 }
 0x49c   :  { %v1129_v15 = vsel %vm1127_vm15, %v1122_v17, %v1124_v22  ;;  %v1126_v53 = vpop.permute.xlu0 %1125  ;;  %v1378_v44 = vmul.f32 %v1376_v5, %v5110_v60  ;;  %v7858_v21 = vmov 0.0  }
 0x49d   :  { %v1128_v7 = vsel %vm1127_vm15, %v1124_v22, %v1126_v53  ;;  %v1131_v61 = vsel %vm1127_vm15, %v1126_v53, %v1120_v62  ;;  %v1156_v40 = vmul.f32 %v1142_v12, %v1129_v15  ;;  %v4285_v12 = vpack.c.bf16 %v1365_v23, %v1349_v41 }
 0x49e   :  { %v1157_v45 = vmul.f32 %v1146_v42, %v1128_v7  ;;  %v1158_v56 = vmul.f32 %v1150_v2, %v1131_v61  ;;  %v4287_v42 = vpack.c.bf16 %v1364_v33, %v1348_v27  ;;  %v4283_v41 = vpack.c.bf16 %v1378_v44, %v5215_v46 }
 0x49f   :  { %v1371_v17 = vpop.permute.xlu1 %1370  ;;  %1183 = vmatprep.subr.mxu0 %v1156_v40  ;;  %v5572_v23 = vrot.slane %v1396_v63, %v5068_v31  ;;  %v5582_v15 = vrot.slane %v1396_v63, %v5066_v30  ;;  %v4824_v27 = vmov 9   ;;  %vm1922_vm15 = vcmp.lt.s32.totalorder %v5062_v28, 75 }
 0x4a0   :  { %v1375_v62 = vsel %vm426_vm3, %v5333_v26, %v1371_v17  ;;  %1184 = vmatpush1.msra.mxu0 %v1155_v35  ;;  %1254 = vmatprep.subr.mxu1 %v1158_v56  ;;  %v1373_v4 = vpop.permute.xlu0 %1372  ;;  %v1309_v56 = vld [vmem:[%s7675_s6] sm:$0xff]  ;;  %s4826_s6 = smov 96  }
 0x4a1   :  { %v1379_v8 = vmul.f32 %v1375_v62, %v5104_v58  ;;  %v1374_v0 = vsel %vm426_vm3, %v1371_v17, %v1373_v4  ;;  %v1377_v14 = vsel %vm426_vm3, %v1373_v4, %v5331_v25  ;;  %1255 = vmatpush1.msra.mxu1 %v1157_v45  ;;  %4278 = vmatprep.subr.bf16.mxu0 %v4277_v13 }
 0x4a2   :  { %v1380_v2 = vmul.f32 %v1374_v0, %v5101_v57  ;;  %v1381_v26 = vmul.f32 %v1377_v14, %v5107_v59  ;;  %4213 = vmatmul.mubr.msk.f32.vlgmr.msra.gmra.mrb[14].mxu0 %vm1163_vm0, %v838_v1  ;;  %4286 = vmatprep.subr.bf16.mxu1 %v4285_v12  ;;  %7859 = vst [vmem:[#allocation57_spill] sm:$0xff] %v5572_v23  ;;  %7862 = vst [vmem:[#allocation60_spill] sm:$0xff] %v5582_v15 }
 0x4a3   :  { %4280 = vmatpush1.bf16.msra.mxu0 %v4279_v18  ;;  %v1383_v19 = vpop.permute.xlu1 %1382  ;;  %4214 = vmatmul.mubr.msk.f32.vlgmr.msra.gmra.mrb[14].mxu1 %vm1163_vm0, %v838_v1  ;;  %v4281_v3 = vpack.c.bf16 %v1379_v8, %v5218_v48  ;;  %v5576_v48 = vrot.slane %v1396_v63, %v5064_v29 }
 0x4a4   :  { %v4291_v24 = vpack.c.bf16 %v1380_v2, %v5225_v51  ;;  %4288 = vmatpush1.bf16.msra.mxu1 %v4287_v42  ;;  %v1385_v25 = vpop.permute.xlu0 %1384  ;;  %v4289_v22 = vpack.c.bf16 %v1381_v26, %v5228_v52  ;;  %1494 = vmatprep.mubr.f32.mxu0 %v7858_v21  ;;  %v5579_v51 = vrot.slane %v1396_v63, %v5070_v32  ;;  %v4825_v26 = vmov 7  }
 0x4a5   :  { %4282 = vmatprep.subr.bf16.mxu0 %v4281_v3  ;;  %1565 = vmatprep.mubr.f32.mxu1 %v7858_v21  ;;  %7860 = vst [vmem:[#allocation58_spill] sm:$0xff] %v5576_v48  ;;  %v1393_v52 = vsel %vm1390_vm1, %v1383_v19, %v1385_v25 }
 0x4a6   :  { %4290 = vmatprep.subr.bf16.mxu1 %v4289_v22  ;;  %7861 = vst [vmem:[#allocation59_spill] sm:$0xff] %v5579_v51  ;;  %v1418_v33 = vmul.f32 %v5576_v48, %v1393_v52  ;;  %4642 = vset.pattern.permute.xlu1 %v4824_v27 }
 0x4a7   :  { %4284 = vmatpush1.bf16.msra.mxu0 %v4283_v41  ;;  %v1387_v46 = vpop.permute.xlu1 %1386  ;;  %4641 = vset.pattern.permute.xlu0 %v4825_v26 }
 0x4a8   :  { %v1392_v53 = vsel %vm1390_vm1, %v1385_v25, %v1387_v46  ;;  %4292 = vmatpush1.bf16.msra.mxu1 %v4291_v24  ;;  %v1389_v5 = vpop.permute.xlu0 %1388  ;;  %v1587_v24 = vld [vmem:[#allocation2 + $0x26] ss:$8 sm:$0xf] }
 0x4a9   :  { %v1391_v7 = vsel %vm1390_vm1, %v1387_v46, %v1389_v5  ;;  %v1394_v61 = vsel %vm1390_vm1, %v1389_v5, %v1383_v19  ;;  %v1419_v40 = vmul.f32 %v5572_v23, %v1392_v53  ;;  %v5654_v19 = vld [vmem:[%s7682_s13] sm:$0xff]  ;;  %v5660_v41 = vrot.slane %v1587_v24, %v5068_v31 }
 0x4aa   :  { %v1420_v35 = vmul.f32 %v5579_v51, %v1391_v7  ;;  %v1421_v45 = vmul.f32 %v5582_v15, %v1394_v61  ;;  %7867 = vst [vmem:[#allocation65_spill] sm:$0xff] %v5654_v19  ;;  %v5668_v61 = vrot.slane %v1587_v24, %v5064_v29 }
 0x4ab   :  { %1438 = vmatprep.subr.mxu0 %v1419_v40  ;;  %7868 = vst [vmem:[#allocation66_spill] sm:$0xff] %v5660_v41  ;;  %v5671_v40 = vrot.slane %v1587_v24, %v5066_v30 }
 0x4ac   :  { %1439 = vmatpush1.msra.mxu0 %v1418_v33  ;;  %1509 = vmatprep.subr.mxu1 %v1421_v45  ;;  %7869 = vst [vmem:[#allocation67_spill] sm:$0xff] %v5668_v61 }
 0x4ad   :  { %4215 = vmatmul.mubr.msk.f32.vlgmr.msra.gmra.mrb[16].mxu0 %vm1426_vm4, %v1309_v56  ;;  %1510 = vmatpush1.msra.mxu1 %v1420_v35  ;;  %7870 = vst [vmem:[#allocation68_spill] sm:$0xff] %v5671_v40  ;;  %v5675_v35 = vrot.slane %v1587_v24, %v5070_v32 }
 0x4ae   :  { %4216 = vmatmul.mubr.msk.f32.vlgmr.msra.gmra.mrb[16].mxu1 %vm1426_vm4, %v1309_v56  ;;  %1756 = vmatprep.mubr.f32.mxu0 %v7858_v21 }
 0x4af   :  { %1827 = vmatprep.mubr.f32.mxu1 %v7858_v21  ;;  %7871 = vst [vmem:[#allocation69_spill] sm:$0xff] %v5675_v35 }
 0x4b8   :  { %v1424_v44 = vpop.permute.xlu1 %1423 }
 0x575   :  { %v5603_v18 = vpop.f32.mrb[14].mxu0 }
 0x576   :  { %7863 = vst [vmem:[#allocation61_spill] sm:$0xff] %v5603_v18  ;;  %v5605_v17 = vpop.f32.mrb[15].mxu0  ;;  %v5607_v13 = vpop.f32.mrb[14].mxu1 }
 0x577   :  { %7864 = vst [vmem:[#allocation62_spill] sm:$0xff] %v5605_v17  ;;  %7865 = vst [vmem:[#allocation63_spill] sm:$0xff] %v5607_v13  ;;  %v5609_v1 = vpop.f32.mrb[15].mxu1 }
 0x578   :  { %7866 = vst [vmem:[#allocation64_spill] sm:$0xff] %v5609_v1 }
 0x580   :  { %v1496_v62 = vpop.f32.mrb[16].mxu0 }
 0x581   :  { %v5611_v4 = vadd.f32 %v1496_v62, %v1424_v44  ;;  %v1498_v12 = vpop.f32.mrb[17].mxu0  ;;  %v1567_v8 = vpop.f32.mrb[16].mxu1 }
 0x582   :  { %v5613_v0 = vadd.f32 %v1498_v12, %v1424_v44  ;;  %v1569_v14 = vpop.f32.mrb[17].mxu1  ;;  %v5619_v42 = vadd.f32 %v1567_v8, %v1424_v44 }
 0x583   :  { %1573 = vrot.lane.b32.xlu0 %v5611_v4, %s4801_s16  ;;  %v5621_v2 = vadd.f32 %v1569_v14, %v1424_v44 }
 0x584   :  { %1575 = vrot.lane.b32.xlu1 %v5613_v0, %s4801_s16 }
 0x587   :  { %1577 = vrot.lane.b32.xlu0 %v5619_v42, %s4801_s16 }
 0x588   :  { %1579 = vrot.lane.b32.xlu1 %v5621_v2, %s4801_s16 }
 0x58b   :  { %1613 = vrot.lane.b32.xlu0 %v5611_v4, %s4810_s3 }
 0x58c   :  { %1615 = vrot.lane.b32.xlu1 %v5613_v0, %s4810_s3 }
 0x58f   :  { %1617 = vrot.lane.b32.xlu0 %v5619_v42, %s4810_s3 }
 0x590   :  { %1619 = vrot.lane.b32.xlu1 %v5621_v2, %s4810_s3 }
 0x593   :  { %1629 = vrot.lane.b32.xlu0 %v5611_v4, %s4812_s7 }
 0x594   :  { %1631 = vrot.lane.b32.xlu1 %v5613_v0, %s4812_s7 }
 0x597   :  { %1633 = vrot.lane.b32.xlu0 %v5619_v42, %s4812_s7 }
 0x598   :  { %1635 = vrot.lane.b32.xlu1 %v5621_v2, %s4812_s7 }
 0x59b   :  { %1645 = vrot.lane.b32.xlu0 %v5611_v4, %s4826_s6 }
 0x59c   :  { %1647 = vrot.lane.b32.xlu1 %v5613_v0, %s4826_s6 }
 0x59f   :  { %1649 = vrot.lane.b32.xlu0 %v5619_v42, %s4826_s6 }
 0x5a0   :  { %1651 = vrot.lane.b32.xlu1 %v5621_v2, %s4826_s6 }
 0x5a3   :  { %1686 = vperm.xlu0 %4641, %v5654_v19  }
 0x5a4   :  { %361 = vperm.xlu1 %4642, %v5654_v19  }
 0x5f5   :  { %v1574_v63 = vpop.permute.xlu0 %1573 }
 0x5f6   :  { %v1576_v3 = vpop.permute.xlu1 %1575 }
 0x5f7   :  { %v1584_v52 = vsel %vm1581_vm7, %v1574_v63, %v1576_v3 }
 0x5f8   :  { %v1610_v7 = vmul.f32 %v5660_v41, %v1584_v52 }
 0x5f9   :  { %v1578_v25 = vpop.permute.xlu0 %1577 }
 0x5fa   :  { %v1580_v22 = vpop.permute.xlu1 %1579  ;;  %v1583_v44 = vsel %vm1581_vm7, %v1576_v3, %v1578_v25 }
 0x5fb   :  { %v1582_v45 = vsel %vm1581_vm7, %v1578_v25, %v1580_v22  ;;  %v1585_v56 = vsel %vm1581_vm7, %v1580_v22, %v1574_v63  ;;  %v1611_v25 = vmul.f32 %v5675_v35, %v1583_v44 }
 0x5fc   :  { %v1609_v52 = vmul.f32 %v5668_v61, %v1585_v56  ;;  %v1612_v63 = vmul.f32 %v5671_v40, %v1582_v45 }
 0x5fd   :  { %v1614_v46 = vpop.permute.xlu0 %1613 }
 0x5fe   :  { %v1616_v53 = vpop.permute.xlu1 %1615 }
 0x5ff   :  { %v1623_v5 = vsel %vm617_vm5, %v1614_v46, %v1616_v53 }
 0x600   :  { %v1626_v33 = vmul.f32 %v1623_v5, %v5159_v43 }
 0x601   :  { %v1618_v27 = vpop.permute.xlu0 %1617 }
 0x602   :  { %v1622_v62 = vsel %vm617_vm5, %v1616_v53, %v1618_v27  ;;  %v1620_v12 = vpop.permute.xlu1 %1619  ;;  %v4293_v8 = vpack.c.bf16 %v1626_v33, %v1610_v7 }
 0x603   :  { %v1627_v14 = vmul.f32 %v1622_v62, %v5164_v47  ;;  %v1621_v26 = vsel %vm617_vm5, %v1618_v27, %v1620_v12  ;;  %v1624_v24 = vsel %vm617_vm5, %v1620_v12, %v1614_v46 }
 0x604   :  { %v1625_v22 = vmul.f32 %v1624_v24, %v5168_v49  ;;  %v1628_v3 = vmul.f32 %v1621_v26, %v5171_v50  ;;  %4294 = vmatprep.subr.bf16.mxu0 %v4293_v8  ;;  %v7872_v8 = vld [vmem:[#allocation37_spill] sm:$0xff]  ;;  %v7873_v24 = vld [vmem:[#allocation39_spill] sm:$0xff] }
 0x605   :  { %v1630_v53 = vpop.permute.xlu0 %1629  ;;  %v4303_v62 = vpack.c.bf16 %v1627_v14, %v1611_v25  ;;  %v1659_v25 = vld [vmem:[#allocation2 + $0x27] ss:$8 sm:$0xf] }
 0x606   :  { %v4295_v5 = vpack.c.bf16 %v1625_v22, %v1609_v52  ;;  %v1632_v7 = vpop.permute.xlu1 %1631  ;;  %v4301_v33 = vpack.c.bf16 %v1628_v3, %v1612_v63  ;;  %v7874_v63 = vld [vmem:[#allocation40_spill] sm:$0xff] }
 0x607   :  { %v1639_v27 = vsel %vm657_vm6, %v1630_v53, %v1632_v7 }
 0x608   :  { %4296 = vmatpush1.bf16.msra.mxu0 %v4295_v5  ;;  %4302 = vmatprep.subr.bf16.mxu1 %v4301_v33  ;;  %v1641_v45 = vmul.f32 %v1639_v27, %v5187_v9 }
 0x609   :  { %4304 = vmatpush1.bf16.msra.mxu1 %v4303_v62  ;;  %v1634_v46 = vpop.permute.xlu0 %1633 }
 0x60a   :  { %v1638_v56 = vsel %vm657_vm6, %v1632_v7, %v1634_v46  ;;  %v1636_v12 = vpop.permute.xlu1 %1635  ;;  %v4299_v33 = vpack.c.bf16 %v1641_v45, %v5611_v4  ;;  %v5722_v4 = vrot.slane %v1659_v25, %v5066_v30 }
 0x60b   :  { %v1642_v44 = vmul.f32 %v1638_v56, %v7872_v8  ;;  %v1637_v26 = vsel %vm657_vm6, %v1634_v46, %v1636_v12  ;;  %v1640_v14 = vsel %vm657_vm6, %v1636_v12, %v1630_v53  ;;  %v5713_v53 = vrot.slane %v1659_v25, %v5068_v31 }
 0x60c   :  { %v1643_v52 = vmul.f32 %v1637_v26, %v7873_v24  ;;  %v1644_v22 = vmul.f32 %v1640_v14, %v7874_v63  ;;  %v5716_v46 = vrot.slane %v1659_v25, %v5064_v29  ;;  %7878 = vst [vmem:[#allocation73_spill] sm:$0xff] %v5722_v4  ;;  %v1888_v24 = vld [vmem:[#allocation2 + $0x41] ss:$8 sm:$0xf] }
 0x60d   :  { %v1646_v3 = vpop.permute.xlu0 %1645  ;;  %v4297_v5 = vpack.c.bf16 %v1642_v44, %v5613_v0  ;;  %7875 = vst [vmem:[#allocation70_spill] sm:$0xff] %v5713_v53  ;;  %v5719_v0 = vrot.slane %v1659_v25, %v5070_v32  ;;  %v1572_v25 = vld [vmem:[#allocation7] sm:$0xff]  ;;  %v1901_v61 = vrot.slane %v1888_v24, %v5070_v32  ;;  %v1905_v60 = vrot.slane %v1888_v24, %v5066_v30 }
 0x60e   :  { %v4307_v7 = vpack.c.bf16 %v1643_v52, %v5619_v42  ;;  %v1648_v62 = vpop.permute.xlu1 %1647  ;;  %v4305_v27 = vpack.c.bf16 %v1644_v22, %v5621_v2  ;;  %7876 = vst [vmem:[#allocation71_spill] sm:$0xff] %v5716_v46 }
 0x60f   :  { %4298 = vmatprep.subr.bf16.mxu0 %v4297_v5  ;;  %7877 = vst [vmem:[#allocation72_spill] sm:$0xff] %v5719_v0  ;;  %v1656_v42 = vsel %vm1653_vm9, %v1646_v3, %v1648_v62  ;;  %v7879_v5 = vld [vmem:[#allocation29_spill] sm:$0xff] }
 0x610   :  { %4300 = vmatpush1.bf16.msra.mxu0 %v4299_v33  ;;  %4306 = vmatprep.subr.bf16.mxu1 %v4305_v27  ;;  %v1681_v14 = vmul.f32 %v5716_v46, %v1656_v42  ;;  %v7881_v27 = vld [vmem:[#allocation31_spill] sm:$0xff]  ;;  %v1897_v46 = vrot.slane %v1888_v24, %v5068_v31 }
 0x611   :  { %4308 = vmatpush1.bf16.msra.mxu1 %v4307_v7  ;;  %v1650_v2 = vpop.permute.xlu0 %1649  ;;  %v7880_v7 = vld [vmem:[#allocation30_spill] sm:$0xff] }
 0x612   :  { %v1655_v45 = vsel %vm1653_vm9, %v1648_v62, %v1650_v2  ;;  %v1652_v56 = vpop.permute.xlu1 %1651 }
 0x613   :  { %v1654_v12 = vsel %vm1653_vm9, %v1650_v2, %v1652_v56  ;;  %v1657_v44 = vsel %vm1653_vm9, %v1652_v56, %v1646_v3  ;;  %v1682_v26 = vmul.f32 %v5713_v53, %v1655_v45  ;;  %v7882_v2 = vld [vmem:[#allocation32_spill] sm:$0xff] }
 0x614   :  { %v1683_v52 = vmul.f32 %v5719_v0, %v1654_v12  ;;  %v1684_v22 = vmul.f32 %v5722_v4, %v1657_v44  ;;  %v1849_v0 = vld [vmem:[#allocation2 + $0x40] ss:$8 sm:$0xf] }
 0x615   :  { %1700 = vmatprep.subr.mxu0 %v1682_v26  ;;  %v1858_v8 = vrot.slane %v1849_v0, %v5068_v31  ;;  %v1854_v47 = vrot.slane %v1849_v0, %v5064_v29  ;;  %v1866_v43 = vrot.slane %v1849_v0, %v5066_v30  ;;  %v1862_v15 = vrot.slane %v1849_v0, %v5070_v32 }
 0x616   :  { %1701 = vmatpush1.msra.mxu0 %v1681_v14  ;;  %1771 = vmatprep.subr.mxu1 %v1684_v22 }
 0x617   :  { %4217 = vmatmul.mubr.msk.f32.vlgmr.msra.gmra.mrb[18].mxu0 %vm1426_vm4, %v1572_v25  ;;  %1772 = vmatpush1.msra.mxu1 %v1683_v52 }
 0x618   :  { %4218 = vmatmul.mubr.msk.f32.vlgmr.msra.gmra.mrb[18].mxu1 %vm1426_vm4, %v1572_v25  ;;  %2224 = vmatprep.mubr.f32.mxu0 %v7858_v21  ;;  %vm1962_vm4 = vcmp.lt.s32.totalorder %v5062_v28, 5 }
 0x619   :  { %2295 = vmatprep.mubr.f32.mxu1 %v7858_v21 }
 0x622   :  { %v1687_v56 = vpop.permute.xlu0 %1686 }
 0x623   :  { %v362_v3 = vpop.permute.xlu1 %361 }
 0x624   :  { %v5741_v33 = vadd.f32 %v362_v3, %v7879_v5  ;;  %v5744_v62 = vadd.f32 %v362_v3, %v7880_v7  ;;  %v5751_v42 = vadd.f32 %v362_v3, %v7881_v27  ;;  %v5754_v45 = vadd.f32 %v362_v3, %v7882_v2 }
 0x625   :  { %v4833_v27 = vmov 10  }
 0x626   :  { %2303 = vrot.lane.b32.xlu1 %v5741_v33, %s4817_s30  ;;  %2305 = vrot.lane.b32.xlu0 %v5744_v62, %s4817_s30 }
 0x627   :  { %4643 = vset.pattern.permute.xlu1 %v4833_v27 }
 0x62a   :  { %2307 = vrot.lane.b32.xlu1 %v5751_v42, %s4817_s30  ;;  %2309 = vrot.lane.b32.xlu0 %v5754_v45, %s4817_s30  ;;  %s4840_s30 = smov 121  }
 0x62e   :  { %2319 = vrot.lane.b32.xlu1 %v5741_v33, %s4813_s4  ;;  %2321 = vrot.lane.b32.xlu0 %v5744_v62, %s4813_s4 }
 0x632   :  { %2323 = vrot.lane.b32.xlu1 %v5751_v42, %s4813_s4  ;;  %2325 = vrot.lane.b32.xlu0 %v5754_v45, %s4813_s4 }
 0x636   :  { %2335 = vrot.lane.b32.xlu1 %v5741_v33, %s4806_s5  ;;  %2337 = vrot.lane.b32.xlu0 %v5744_v62, %s4806_s5 }
 0x63a   :  { %2339 = vrot.lane.b32.xlu1 %v5751_v42, %s4806_s5  ;;  %2341 = vrot.lane.b32.xlu0 %v5754_v45, %s4806_s5 }
 0x63e   :  { %2351 = vrot.lane.b32.xlu1 %v5741_v33, %s4808_s2  ;;  %2353 = vrot.lane.b32.xlu0 %v5744_v62, %s4808_s2 }
 0x642   :  { %2355 = vrot.lane.b32.xlu1 %v5751_v42, %s4808_s2  ;;  %2357 = vrot.lane.b32.xlu0 %v5754_v45, %s4808_s2 }
 0x698   :  { %v5836_v5 = vpop.permute.xlu1 %2303  ;;  %v5840_v7 = vpop.permute.xlu0 %2305 }
 0x69c   :  { %v5848_v2 = vpop.permute.xlu1 %2307 }
 0x6ea   :  { %v1758_v12 = vpop.f32.mrb[18].mxu0 }
 0x6eb   :  { %v5784_v44 = vadd.f32 %v1758_v12, %v1687_v56  ;;  %v1760_v26 = vpop.f32.mrb[19].mxu0  ;;  %v1829_v14 = vpop.f32.mrb[18].mxu1 }
 0x6ec   :  { %v5786_v52 = vadd.f32 %v1760_v26, %v1687_v56  ;;  %v1831_v22 = vpop.f32.mrb[19].mxu1  ;;  %v5790_v25 = vadd.f32 %v1829_v14, %v1687_v56  ;;  %v5856_v12 = vpop.permute.xlu1 %2319 }
 0x6ed   :  { %1835 = vrot.lane.b32.xlu1 %v5784_v44, %s4827_s18  ;;  %v5792_v3 = vadd.f32 %v1831_v22, %v1687_v56  ;;  %v5850_v56 = vpop.permute.xlu0 %2309 }
 0x6ee   :  { %1837 = vrot.lane.b32.xlu0 %v5786_v52, %s4827_s18 }
 0x6f0   :  { %v5861_v14 = vpop.permute.xlu1 %2323 }
 0x6f1   :  { %1839 = vrot.lane.b32.xlu1 %v5790_v25, %s4827_s18  ;;  %v5859_v26 = vpop.permute.xlu0 %2321 }
 0x6f2   :  { %1841 = vrot.lane.b32.xlu0 %v5792_v3, %s4827_s18 }
 0x6f4   :  { %v5865_v27 = vpop.permute.xlu1 %2335 }
 0x6f5   :  { %1875 = vrot.lane.b32.xlu1 %v5784_v44, %s4820_s1  ;;  %v5863_v22 = vpop.permute.xlu0 %2325 }
 0x6f6   :  { %1877 = vrot.lane.b32.xlu0 %v5786_v52, %s4820_s1 }
 0x6f8   :  { %v5869_v13 = vpop.permute.xlu1 %2339 }
 0x6f9   :  { %1879 = vrot.lane.b32.xlu1 %v5790_v25, %s4820_s1  ;;  %v5867_v1 = vpop.permute.xlu0 %2337 }
 0x6fa   :  { %1881 = vrot.lane.b32.xlu0 %v5792_v3, %s4820_s1 }
 0x6fc   :  { %v5873_v18 = vpop.permute.xlu1 %2351 }
 0x6fd   :  { %1914 = vrot.lane.b32.xlu1 %v5784_v44, %s4828_s19  ;;  %v5871_v17 = vpop.permute.xlu0 %2341  ;;  %7883 = vst [vmem:[#allocation29_spill] sm:$0xff] %v5873_v18 }
 0x6fe   :  { %1916 = vrot.lane.b32.xlu0 %v5786_v52, %s4828_s19 }
 0x700   :  { %v5877_v34 = vpop.permute.xlu1 %2355 }
 0x701   :  { %1918 = vrot.lane.b32.xlu1 %v5790_v25, %s4828_s19  ;;  %v5875_v10 = vpop.permute.xlu0 %2353 }
 0x702   :  { %1920 = vrot.lane.b32.xlu0 %v5792_v3, %s4828_s19  ;;  %s4851_s19 = smov [#allocation11]  }
 0x705   :  { %1954 = vrot.lane.b32.xlu1 %v5784_v44, %s4829_s21  ;;  %v5879_v11 = vpop.permute.xlu0 %2357 }
 0x706   :  { %1956 = vrot.lane.b32.xlu0 %v5786_v52, %s4829_s21  ;;  %7884 = vst [vmem:[#allocation30_spill] sm:$0xff] %v5879_v11 }
 0x709   :  { %1958 = vrot.lane.b32.xlu1 %v5790_v25, %s4829_s21 }
 0x70a   :  { %1960 = vrot.lane.b32.xlu0 %v5792_v3, %s4829_s21  ;;  %s4184_s21 = sshll.u32 %s4851_s19, 4  ;;  %s4185_s21 = int_to_ptr.vmem [resolvable:$true] %s4184_s21 }
 0x70b   :  { %p4772_p13 = scmp.lt.s32.totalorder %s4185_s21, %s4185_s21 }
 0x70d   :  { %1994 = vrot.lane.b32.xlu1 %v5784_v44, %s4830_s23 }
 0x70e   :  { %1996 = vrot.lane.b32.xlu0 %v5786_v52, %s4830_s23 }
 0x711   :  { %1998 = vrot.lane.b32.xlu1 %v5790_v25, %s4830_s23 }
 0x712   :  { %2000 = vrot.lane.b32.xlu0 %v5792_v3, %s4830_s23 }
 0x715   :  { %2034 = vrot.lane.b32.xlu1 %v5784_v44, %s4831_s20 }
 0x716   :  { %2036 = vrot.lane.b32.xlu0 %v5786_v52, %s4831_s20 }
 0x719   :  { %2038 = vrot.lane.b32.xlu1 %v5790_v25, %s4831_s20 }
 0x71a   :  { %2040 = vrot.lane.b32.xlu0 %v5792_v3, %s4831_s20 }
 0x71d   :  { %2074 = vrot.lane.b32.xlu1 %v5784_v44, %s4815_s26 }
 0x71e   :  { %2076 = vrot.lane.b32.xlu0 %v5786_v52, %s4815_s26 }
 0x721   :  { %2078 = vrot.lane.b32.xlu1 %v5790_v25, %s4815_s26 }
 0x722   :  { %2080 = vrot.lane.b32.xlu0 %v5792_v3, %s4815_s26 }
 0x725   :  { %2113 = vrot.lane.b32.xlu1 %v5784_v44, %s4832_s24 }
 0x726   :  { %2115 = vrot.lane.b32.xlu0 %v5786_v52, %s4832_s24 }
 0x729   :  { %2117 = vrot.lane.b32.xlu1 %v5790_v25, %s4832_s24 }
 0x72a   :  { %2119 = vrot.lane.b32.xlu0 %v5792_v3, %s4832_s24 }
 0x72d   :  { %2367 = vrot.lane.b32.xlu1 %v5741_v33, %s4823_s22 }
 0x72e   :  { %2369 = vrot.lane.b32.xlu0 %v5744_v62, %s4823_s22 }
 0x731   :  { %2371 = vrot.lane.b32.xlu1 %v5751_v42, %s4823_s22 }
 0x732   :  { %2373 = vrot.lane.b32.xlu0 %v5754_v45, %s4823_s22  ;;  %s4845_s22 = smov 17  }
 0x735   :  { %2383 = vrot.lane.b32.xlu1 %v5741_v33, %s4818_s27 }
 0x736   :  { %2385 = vrot.lane.b32.xlu0 %v5744_v62, %s4818_s27 }
 0x739   :  { %2387 = vrot.lane.b32.xlu1 %v5751_v42, %s4818_s27 }
 0x73a   :  { %2389 = vrot.lane.b32.xlu0 %v5754_v45, %s4818_s27  ;;  %s4841_s27 = smov 23  }
 0x73d   :  { %2400 = vperm.xlu1 %4643, %v5654_v19   ;;  %v1893_v19 = vrot.slane %v1888_v24, %v5064_v29 }
 0x75f   :  { %v1836_v55 = vpop.permute.xlu1 %1835 }
 0x760   :  { %v1838_v4 = vpop.permute.xlu0 %1837 }
 0x761   :  { %v1846_v9 = vsel %vm1843_vm13, %v1836_v55, %v1838_v4 }
 0x762   :  { %v1872_v35 = vmul.f32 %v1858_v8, %v1846_v9 }
 0x763   :  { %v1840_v63 = vpop.permute.xlu1 %1839 }
 0x764   :  { %v1842_v53 = vpop.permute.xlu0 %1841  ;;  %v1845_v21 = vsel %vm1843_vm13, %v1838_v4, %v1840_v63 }
 0x765   :  { %v1844_v51 = vsel %vm1843_vm13, %v1840_v63, %v1842_v53  ;;  %v1847_v59 = vsel %vm1843_vm13, %v1842_v53, %v1836_v55  ;;  %v1873_v53 = vmul.f32 %v1862_v15, %v1845_v21  ;;  %vm2002_vm13 = vcmp.lt.s32.totalorder %v5062_v28, 123 }
 0x766   :  { %v1871_v23 = vmul.f32 %v1854_v47, %v1847_v59  ;;  %v1874_v48 = vmul.f32 %v1866_v43, %v1844_v51 }
 0x767   :  { %v1876_v50 = vpop.permute.xlu1 %1875 }
 0x768   :  { %v1878_v49 = vpop.permute.xlu0 %1877 }
 0x769   :  { %v1885_v40 = vsel %vm1087_vm14, %v1876_v50, %v1878_v49 }
 0x76a   :  { %v1911_v41 = vmul.f32 %v1897_v46, %v1885_v40 }
 0x76b   :  { %v1880_v57 = vpop.permute.xlu1 %1879 }
 0x76c   :  { %v1884_v9 = vsel %vm1087_vm14, %v1878_v49, %v1880_v57  ;;  %v1882_v40 = vpop.permute.xlu0 %1881  ;;  %v4309_v8 = vpack.c.bf16 %v1911_v41, %v1872_v35  ;;  %v1928_v41 = vld [vmem:[#allocation2 + $0x42] ss:$8 sm:$0xf] }
 0x76d   :  { %v1912_v46 = vmul.f32 %v1901_v61, %v1884_v9  ;;  %v1883_v24 = vsel %vm1087_vm14, %v1880_v57, %v1882_v40  ;;  %v1886_v0 = vsel %vm1087_vm14, %v1882_v40, %v1876_v50  ;;  %v1968_v57 = vld [vmem:[#allocation2 + $0x43] ss:$8 sm:$0xf]  ;;  %v1937_v59 = vrot.slane %v1928_v41, %v5068_v31 }
 0x76e   :  { %v1910_v58 = vmul.f32 %v1893_v19, %v1886_v0  ;;  %v1913_v55 = vmul.f32 %v1905_v60, %v1883_v24  ;;  %4310 = vmatprep.subr.bf16.mxu0 %v4309_v8  ;;  %v1977_v60 = vrot.slane %v1968_v57, %v5068_v31  ;;  %v1933_v21 = vrot.slane %v1928_v41, %v5064_v29 }
 0x76f   :  { %v1915_v11 = vpop.permute.xlu1 %1914  ;;  %v4327_v49 = vpack.c.bf16 %v1912_v46, %v1873_v53  ;;  %v1981_v51 = vrot.slane %v1968_v57, %v5070_v32  ;;  %v1973_v19 = vrot.slane %v1968_v57, %v5064_v29  ;;  %v1985_v35 = vrot.slane %v1968_v57, %v5066_v30  ;;  %v2008_v57 = vld [vmem:[#allocation2 + $0x44] ss:$8 sm:$0xf] }
 0x770   :  { %v4311_v63 = vpack.c.bf16 %v1910_v58, %v1871_v23  ;;  %v1917_v4 = vpop.permute.xlu0 %1916  ;;  %v4325_v18 = vpack.c.bf16 %v1913_v55, %v1874_v48  ;;  %v1945_v23 = vrot.slane %v1928_v41, %v5066_v30  ;;  %v1941_v9 = vrot.slane %v1928_v41, %v5070_v32 }
 0x771   :  { %v1925_v58 = vsel %vm1922_vm15, %v1915_v11, %v1917_v4 }
 0x772   :  { %4312 = vmatpush1.bf16.msra.mxu0 %v4311_v63  ;;  %4326 = vmatprep.subr.bf16.mxu1 %v4325_v18  ;;  %v1951_v15 = vmul.f32 %v1937_v59, %v1925_v58 }
 0x773   :  { %v1919_v61 = vpop.permute.xlu1 %1918  ;;  %4328 = vmatpush1.bf16.msra.mxu1 %v4327_v49 }
 0x774   :  { %v1921_v50 = vpop.permute.xlu0 %1920  ;;  %v1924_v24 = vsel %vm1922_vm15, %v1917_v4, %v1919_v61 }
 0x775   :  { %v1923_v40 = vsel %vm1922_vm15, %v1919_v61, %v1921_v50  ;;  %v1926_v8 = vsel %vm1922_vm15, %v1921_v50, %v1915_v11  ;;  %v1952_v4 = vmul.f32 %v1941_v9, %v1924_v24  ;;  %vm2042_vm15 = vcmp.lt.s32.totalorder %v5062_v28, 53 }
 0x776   :  { %v1950_v11 = vmul.f32 %v1933_v21, %v1926_v8  ;;  %v1953_v50 = vmul.f32 %v1945_v23, %v1923_v40  ;;  %v2021_v21 = vrot.slane %v2008_v57, %v5070_v32  ;;  %v2025_v23 = vrot.slane %v2008_v57, %v5066_v30 }
 0x777   :  { %v1955_v43 = vpop.permute.xlu1 %1954 }
 0x778   :  { %v1957_v47 = vpop.permute.xlu0 %1956 }
 0x779   :  { %v1965_v48 = vsel %vm1962_vm4, %v1955_v43, %v1957_v47 }
 0x77a   :  { %v1991_v18 = vmul.f32 %v1977_v60, %v1965_v48 }
 0x77b   :  { %v1959_v46 = vpop.permute.xlu1 %1958 }
 0x77c   :  { %v1964_v0 = vsel %vm1962_vm4, %v1957_v47, %v1959_v46  ;;  %v1961_v55 = vpop.permute.xlu0 %1960  ;;  %v4313_v53 = vpack.c.bf16 %v1991_v18, %v1951_v15  ;;  %v2013_v47 = vrot.slane %v2008_v57, %v5064_v29 }
 0x77d   :  { %v1992_v63 = vmul.f32 %v1981_v51, %v1964_v0  ;;  %v1963_v49 = vsel %vm1962_vm4, %v1959_v46, %v1961_v55  ;;  %v1966_v41 = vsel %vm1962_vm4, %v1961_v55, %v1955_v43  ;;  %v2017_v43 = vrot.slane %v2008_v57, %v5068_v31 }
 0x77e   :  { %v1990_v59 = vmul.f32 %v1973_v19, %v1966_v41  ;;  %v1993_v60 = vmul.f32 %v1985_v35, %v1963_v49  ;;  %4314 = vmatprep.subr.bf16.mxu0 %v4313_v53  ;;  %vm3450_vm4 = vcmp.lt.s32.totalorder %v5062_v28, 15 }
 0x77f   :  { %v1995_v61 = vpop.permute.xlu1 %1994  ;;  %v4331_v15 = vpack.c.bf16 %v1992_v63, %v1952_v4 }
 0x780   :  { %v4315_v58 = vpack.c.bf16 %v1990_v59, %v1950_v11  ;;  %v1997_v48 = vpop.permute.xlu0 %1996  ;;  %v4329_v51 = vpack.c.bf16 %v1993_v60, %v1953_v50  ;;  %v2313_v59 = vsel %vm967_vm10, %v5836_v5, %v5840_v7  ;;  %v2087_v60 = vld [vmem:[#allocation2 + $0x46] ss:$8 sm:$0xf] }
 0x781   :  { %v2005_v18 = vsel %vm2002_vm13, %v1995_v61, %v1997_v48 }
 0x782   :  { %4316 = vmatpush1.bf16.msra.mxu0 %v4315_v58  ;;  %4330 = vmatprep.subr.bf16.mxu1 %v4329_v51  ;;  %v2030_v35 = vmul.f32 %v2013_v47, %v2005_v18  ;;  %v2311_v47 = vsel %vm967_vm10, %v5848_v2, %v5850_v56  ;;  %v2329_v51 = vsel %vm1318_vm12, %v5856_v12, %v5859_v26 }
 0x783   :  { %v1999_v19 = vpop.permute.xlu1 %1998  ;;  %4332 = vmatpush1.bf16.msra.mxu1 %v4331_v15 }
 0x784   :  { %v2004_v9 = vsel %vm2002_vm13, %v1997_v48, %v1999_v19  ;;  %v2001_v40 = vpop.permute.xlu0 %2000  ;;  %v4319_v49 = vpack.c.bf16 %v2030_v35, %v5784_v44  ;;  %v2312_v44 = vsel %vm967_vm10, %v5840_v7, %v5848_v2  ;;  %v2314_v7 = vsel %vm967_vm10, %v5850_v56, %v5836_v5 }
 0x785   :  { %v2031_v8 = vmul.f32 %v2017_v43, %v2004_v9  ;;  %v2003_v46 = vsel %vm2002_vm13, %v1999_v19, %v2001_v40  ;;  %v2006_v24 = vsel %vm2002_vm13, %v2001_v40, %v1995_v61  ;;  %v7886_v61 = vld [vmem:[#allocation46_spill] sm:$0xff]  ;;  %v2092_v43 = vrot.slane %v2087_v60, %v5064_v29 }
 0x786   :  { %v2032_v0 = vmul.f32 %v2021_v21, %v2003_v46  ;;  %v2033_v55 = vmul.f32 %v2025_v23, %v2006_v24  ;;  %v5962_v58 = vmul.f32 %v2312_v44, %v7886_v61  ;;  %v2096_v56 = vrot.slane %v2087_v60, %v5068_v31  ;;  %v7888_v24 = vld [vmem:[#allocation48_spill] sm:$0xff] }
 0x787   :  { %v2035_v53 = vpop.permute.xlu1 %2034  ;;  %v4317_v63 = vpack.c.bf16 %v2031_v8, %v5786_v52  ;;  %v2100_v9 = vrot.slane %v2087_v60, %v5070_v32  ;;  %v2104_v40 = vrot.slane %v2087_v60, %v5066_v30  ;;  %v7887_v8 = vld [vmem:[#allocation47_spill] sm:$0xff]  ;;  %vm2121_vm10 = vcmp.lt.s32.totalorder %v5062_v28, 43 }
 0x788   :  { %v4335_v41 = vpack.c.bf16 %v2032_v0, %v5790_v25  ;;  %v2037_v57 = vpop.permute.xlu0 %2036  ;;  %v4333_v11 = vpack.c.bf16 %v2033_v55, %v5792_v3  ;;  %v2048_v25 = vld [vmem:[#allocation2 + $0x45] ss:$8 sm:$0xf]  ;;  %v5991_v46 = vmul.f32 %v2314_v7, %v7887_v8  ;;  %v5994_v0 = vmul.f32 %v2311_v47, %v7888_v24 }
 0x789   :  { %4318 = vmatprep.subr.bf16.mxu0 %v4317_v63  ;;  %v7885_v3 = vld [vmem:[#allocation45_spill] sm:$0xff]  ;;  %v2053_v15 = vrot.slane %v2048_v25, %v5064_v29  ;;  %v2057_v18 = vrot.slane %v2048_v25, %v5068_v31  ;;  %v2045_v2 = vsel %vm2042_vm15, %v2035_v53, %v2037_v57  ;;  %v2061_v23 = vrot.slane %v2048_v25, %v5070_v32 }
 0x78a   :  { %4320 = vmatpush1.bf16.msra.mxu0 %v4319_v49  ;;  %4334 = vmatprep.subr.bf16.mxu1 %v4333_v11  ;;  %v5959_v4 = vmul.f32 %v2313_v59, %v7885_v3  ;;  %v2065_v35 = vrot.slane %v2048_v25, %v5066_v30  ;;  %v2327_v7 = vsel %vm1318_vm12, %v5861_v14, %v5863_v22  ;;  %vm3666_vm13 = vcmp.lt.s32.totalorder %v5062_v28, 113 }
 0x78b   :  { %v2039_v50 = vpop.permute.xlu1 %2038  ;;  %4336 = vmatpush1.bf16.msra.mxu1 %v4335_v41  ;;  %v6001_v41 = vmul.f32 %v2329_v51, %v5444_v16  ;;  %v2328_v16 = vsel %vm1318_vm12, %v5859_v26, %v5861_v14  ;;  %v2330_v51 = vsel %vm1318_vm12, %v5863_v22, %v5856_v12  ;;  %v2345_v26 = vsel %vm387_vm2, %v5865_v27, %v5867_v1 }
 0x78c   :  { %v2041_v52 = vpop.permute.xlu0 %2040  ;;  %v2044_v19 = vsel %vm2042_vm15, %v2037_v57, %v2039_v50  ;;  %v2070_v57 = vmul.f32 %v2053_v15, %v2045_v2  ;;  %v2127_v15 = vld [vmem:[#allocation2 + $0x47] ss:$8 sm:$0xf]  ;;  %v2344_v14 = vsel %vm387_vm2, %v5867_v1, %v5869_v13  ;;  %v2346_v12 = vsel %vm387_vm2, %v5871_v17, %v5865_v27 }
 0x78d   :  { %v2043_v55 = vsel %vm2042_vm15, %v2039_v50, %v2041_v52  ;;  %v2046_v63 = vsel %vm2042_vm15, %v2041_v52, %v2035_v53  ;;  %v2071_v25 = vmul.f32 %v2057_v18, %v2044_v19  ;;  %v2136_v22 = vrot.slane %v2127_v15, %v5068_v31 }
 0x78e   :  { %v2072_v61 = vmul.f32 %v2061_v23, %v2043_v55  ;;  %v2073_v53 = vmul.f32 %v2065_v35, %v2046_v63  ;;  %v2144_v19 = vrot.slane %v2127_v15, %v5066_v30  ;;  %v2333_v35 = vmul.f32 %v2328_v16, %v5447_v54 }
 0x78f   :  { %v2075_v48 = vpop.permute.xlu1 %2074  ;;  %v2331_v1 = vmul.f32 %v2330_v51, %v5476_v20  ;;  %v2343_v27 = vsel %vm387_vm2, %v5869_v13, %v5871_v17  ;;  %v2334_v8 = vmul.f32 %v2327_v7, %v5479_v6  ;;  %v2348_v24 = vmul.f32 %v2345_v26, %v5080_v38  ;;  %v7890_v7 = vld [vmem:[#allocation30_spill] sm:$0xff]  ;;  %v7895_v26 = vld [vmem:[#allocation25_spill] sm:$0xff] }
 0x790   :  { %v2077_v21 = vpop.permute.xlu0 %2076  ;;  %v2349_v55 = vmul.f32 %v2344_v14, %v5083_v39  ;;  %v2347_v63 = vmul.f32 %v2346_v12, %v5074_v36  ;;  %v2359_v51 = vsel %vm426_vm3, %v5877_v34, %v7890_v7  ;;  %v7896_v12 = vld [vmem:[#allocation27_spill] sm:$0xff]  ;;  %vm2403_vm12 = vcmask 457728  }
 0x791   :  { %v2084_v5 = vsel %vm887_vm8, %v2075_v48, %v2077_v21  ;;  %v2365_v14 = vmul.f32 %v2359_v51, %v7895_v26  ;;  %vm3818_vm15 = vcmp.lt.s32.totalorder %v5062_v28, 111 }
 0x792   :  { %v2109_v11 = vmul.f32 %v2092_v43, %v2084_v5  ;;  %v2132_v5 = vrot.slane %v2127_v15, %v5064_v29 }
 0x793   :  { %v2079_v49 = vpop.permute.xlu1 %2078 }
 0x794   :  { %v2083_v59 = vsel %vm887_vm8, %v2077_v21, %v2079_v49  ;;  %v2081_v44 = vpop.permute.xlu0 %2080  ;;  %v4323_v43 = vpack.c.bf16 %v2109_v11, %v2070_v57  ;;  %v2350_v57 = vmul.f32 %v2343_v27, %v5077_v37 }
 0x795   :  { %v2110_v60 = vmul.f32 %v2096_v56, %v2083_v59  ;;  %v2082_v3 = vsel %vm887_vm8, %v2079_v49, %v2081_v44  ;;  %v2085_v50 = vsel %vm887_vm8, %v2081_v44, %v2075_v48  ;;  %v2140_v56 = vrot.slane %v2127_v15, %v5070_v32 }
 0x796   :  { %v2111_v52 = vmul.f32 %v2100_v9, %v2082_v3  ;;  %v2112_v47 = vmul.f32 %v2104_v40, %v2085_v50  ;;  %v4355_v3 = vpack.c.bf16 %v2333_v35, %v5962_v58  ;;  %v4343_v50 = vpack.c.bf16 %v2331_v1, %v5991_v46  ;;  %v7899_v1 = vld [vmem:[#allocation28_spill] sm:$0xff] }
 0x797   :  { %v2114_v48 = vpop.permute.xlu1 %2113  ;;  %v4321_v18 = vpack.c.bf16 %v2110_v60, %v2071_v25  ;;  %v4341_v25 = vpack.c.bf16 %v6001_v41, %v5959_v4  ;;  %v1834_v60 = vld [vmem:[%s7677_s8] sm:$0xff]  ;;  %v4345_v41 = vpack.c.bf16 %v5744_v62, %v2348_v24  ;;  %v4359_v58 = vpack.c.bf16 %v5751_v42, %v2349_v55  ;;  %v7891_v42 = vld [vmem:[#allocation26_spill] sm:$0xff] }
 0x798   :  { %v4339_v21 = vpack.c.bf16 %v2111_v52, %v2072_v61  ;;  %v2116_v2 = vpop.permute.xlu0 %2115  ;;  %v4337_v23 = vpack.c.bf16 %v2112_v47, %v2073_v53  ;;  %v4353_v53 = vpack.c.bf16 %v2334_v8, %v5994_v0  ;;  %v2360_v52 = vsel %vm426_vm3, %v5875_v10, %v5877_v34  ;;  %v7889_v47 = vld [vmem:[#allocation29_spill] sm:$0xff] }
 0x799   :  { %4322 = vmatprep.subr.bf16.mxu0 %v4321_v18  ;;  %v2124_v9 = vsel %vm2121_vm10, %v2114_v48, %v2116_v2  ;;  %v4347_v46 = vpack.c.bf16 %v5741_v33, %v2347_v63  ;;  %v4357_v0 = vpack.c.bf16 %v5754_v45, %v2350_v57  ;;  %v2361_v16 = vsel %vm426_vm3, %v7889_v47, %v5875_v10  ;;  %v7893_v34 = vld [vmem:[#allocation57_spill] sm:$0xff] }
 0x79a   :  { %4324 = vmatpush1.bf16.msra.mxu0 %v4323_v43  ;;  %4338 = vmatprep.subr.bf16.mxu1 %v4337_v23  ;;  %v2149_v6 = vmul.f32 %v2132_v5, %v2124_v9  ;;  %v2362_v33 = vsel %vm426_vm3, %v7890_v7, %v7889_v47  ;;  %v2364_v45 = vmul.f32 %v2360_v52, %v7891_v42  ;;  %v7894_v23 = vmov 0.0   ;;  %v7897_v5 = vld [vmem:[#allocation59_spill] sm:$0xff] }
 0x79b   :  { %v2118_v40 = vpop.permute.xlu1 %2117  ;;  %4340 = vmatpush1.bf16.msra.mxu1 %v4339_v21  ;;  %v2363_v27 = vmul.f32 %v2361_v16, %v7899_v1 }
 0x79c   :  { %v2123_v54 = vsel %vm2121_vm10, %v2116_v2, %v2118_v40  ;;  %v2120_v20 = vpop.permute.xlu0 %2119 }
 0x79d   :  { %v2122_v17 = vsel %vm2121_vm10, %v2118_v40, %v2120_v20  ;;  %v2125_v13 = vsel %vm2121_vm10, %v2120_v20, %v2114_v48  ;;  %v2150_v49 = vmul.f32 %v2136_v22, %v2123_v54  ;;  %v7892_v48 = vld [vmem:[#allocation58_spill] sm:$0xff]  ;;  %v2366_v22 = vmul.f32 %v2362_v33, %v7896_v12 }
 0x79e   :  { %v2151_v11 = vmul.f32 %v2140_v56, %v2122_v17  ;;  %v2152_v59 = vmul.f32 %v2144_v19, %v2125_v13  ;;  %v7898_v19 = vld [vmem:[#allocation60_spill] sm:$0xff] }
 0x79f   :  { %v2368_v44 = vpop.permute.xlu1 %2367  ;;  %2176 = vmatprep.subr.mxu0 %v2150_v49 }
 0x7a0   :  { %2177 = vmatpush1.msra.mxu0 %v2149_v6  ;;  %2247 = vmatprep.subr.mxu1 %v2152_v59  ;;  %v2370_v61 = vpop.permute.xlu0 %2369  ;;  %v7900_v6 = vld [vmem:[#allocation50_spill] sm:$0xff]  ;;  %v7901_v59 = vld [vmem:[#allocation49_spill] sm:$0xff] }
 0x7a1   :  { %v2377_v4 = vsel %vm1390_vm1, %v2368_v44, %v2370_v61  ;;  %2248 = vmatpush1.msra.mxu1 %v2151_v11  ;;  %4342 = vmatprep.subr.bf16.mxu0 %v4341_v25  ;;  %v7902_v25 = vld [vmem:[#allocation51_spill] sm:$0xff] }
 0x7a2   :  { %4219 = vmatmul.mubr.msk.f32.vlgmr.msra.gmra.mrb[20].mxu0 %vm1163_vm0, %v1834_v60  ;;  %4354 = vmatprep.subr.bf16.mxu1 %v4353_v53  ;;  %v2379_v15 = vmul.f32 %v2377_v4, %v7892_v48  ;;  %v7904_v48 = vld [vmem:[#allocation65_spill] sm:$0xff] }
 0x7a3   :  { %4344 = vmatpush1.bf16.msra.mxu0 %v4343_v50  ;;  %v2372_v62 = vpop.permute.xlu1 %2371  ;;  %4220 = vmatmul.mubr.msk.f32.vlgmr.msra.gmra.mrb[20].mxu1 %vm1163_vm0, %v1834_v60 }
 0x7a4   :  { %v2376_v10 = vsel %vm1390_vm1, %v2370_v61, %v2372_v62  ;;  %4346 = vmatprep.subr.bf16.mxu0 %v4345_v41  ;;  %4356 = vmatpush1.bf16.msra.mxu1 %v4355_v3  ;;  %v2374_v18 = vpop.permute.xlu0 %2373  ;;  %v4351_v54 = vpack.c.bf16 %v2379_v15, %v2363_v27  ;;  %v7903_v3 = vld [vmem:[#allocation52_spill] sm:$0xff]  ;;  %v2302_v61 = vld [vmem:[#allocation8] sm:$0xff] }
 0x7a5   :  { %v2380_v43 = vmul.f32 %v2376_v10, %v7893_v34  ;;  %4358 = vmatprep.subr.bf16.mxu1 %v4357_v0  ;;  %v2375_v21 = vsel %vm1390_vm1, %v2372_v62, %v2374_v18  ;;  %v2378_v2 = vsel %vm1390_vm1, %v2374_v18, %v2368_v44  ;;  %2471 = vmatprep.mubr.f32.mxu0 %v7894_v23  ;;  %vm2963_vm1 = vcmp.lt.s32.totalorder %v5062_v28, 121 }
 0x7a6   :  { %v2381_v56 = vmul.f32 %v2375_v21, %v7897_v5  ;;  %v2382_v35 = vmul.f32 %v2378_v2, %v7898_v19  ;;  %2542 = vmatprep.mubr.f32.mxu1 %v7894_v23 }
 0x7a7   :  { %4348 = vmatpush1.bf16.msra.mxu0 %v4347_v46  ;;  %v2384_v9 = vpop.permute.xlu1 %2383  ;;  %v4349_v40 = vpack.c.bf16 %v2380_v43, %v2364_v45  ;;  %v4834_v45 = vmov 11  }
 0x7a8   :  { %v4363_v8 = vpack.c.bf16 %v2381_v56, %v2365_v14  ;;  %4360 = vmatpush1.bf16.msra.mxu1 %v4359_v58  ;;  %v2386_v24 = vpop.permute.xlu0 %2385  ;;  %v4361_v55 = vpack.c.bf16 %v2382_v35, %v2366_v22  ;;  %4644 = vset.pattern.permute.xlu0 %v4834_v45  ;;  %v7905_v22 = vld [vmem:[#allocation41_spill] sm:$0xff]  ;;  %v7906_v56 = vld [vmem:[#allocation66_spill] sm:$0xff] }
 0x7a9   :  { %4350 = vmatprep.subr.bf16.mxu0 %v4349_v40  ;;  %v2393_v20 = vsel %vm1007_vm11, %v2384_v9, %v2386_v24 }
 0x7aa   :  { %4362 = vmatprep.subr.bf16.mxu1 %v4361_v55  ;;  %v2395_v44 = vmul.f32 %v2393_v20, %v7901_v59 }
 0x7ab   :  { %4352 = vmatpush1.bf16.msra.mxu0 %v4351_v54  ;;  %v2388_v63 = vpop.permute.xlu1 %2387  ;;  %v7907_v54 = vld [vmem:[#allocation69_spill] sm:$0xff] }
 0x7ac   :  { %v2392_v17 = vsel %vm1007_vm11, %v2386_v24, %v2388_v63  ;;  %4364 = vmatpush1.bf16.msra.mxu1 %v4363_v8  ;;  %v2390_v13 = vpop.permute.xlu0 %2389 }
 0x7ad   :  { %v2391_v49 = vsel %vm1007_vm11, %v2388_v63, %v2390_v13  ;;  %v2394_v57 = vsel %vm1007_vm11, %v2390_v13, %v2384_v9  ;;  %v2396_v11 = vmul.f32 %v2392_v17, %v7900_v6  ;;  %v7908_v13 = vld [vmem:[#allocation43_spill] sm:$0xff]  ;;  %vm2883_vm11 = vcmp.lt.s32.totalorder %v5062_v28, 105 }
 0x7ae   :  { %v2397_v60 = vmul.f32 %v2391_v49, %v7902_v25  ;;  %v2398_v50 = vmul.f32 %v2394_v57, %v7903_v3  ;;  %v7909_v57 = vld [vmem:[#allocation44_spill] sm:$0xff] }
 0x7af   :  { %2419 = vmatprep.subr.mxu0 %v2396_v11  ;;  %v7910_v11 = vld [vmem:[#allocation67_spill] sm:$0xff] }
 0x7b0   :  { %2420 = vmatpush1.msra.mxu0 %v2395_v44  ;;  %2490 = vmatprep.subr.mxu1 %v2398_v50  ;;  %v7911_v44 = vld [vmem:[#allocation68_spill] sm:$0xff] }
 0x7b1   :  { %4221 = vmatmul.mubr.msk.f32.vlgmr.msra.gmra.mrb[22].mxu0 %vm2403_vm12, %v2302_v61  ;;  %2491 = vmatpush1.msra.mxu1 %v2397_v60  ;;  %v7912_v60 = vld [vmem:[#allocation42_spill] sm:$0xff] }
 0x7b2   :  { %4222 = vmatmul.mubr.msk.f32.vlgmr.msra.gmra.mrb[22].mxu1 %vm2403_vm12, %v2302_v61  ;;  %2717 = vmatprep.mubr.f32.mxu0 %v7894_v23 }
 0x7b3   :  { %2788 = vmatprep.mubr.f32.mxu1 %v7894_v23 }
 0x7bc   :  { %v2401_v58 = vpop.permute.xlu1 %2400 }
 0x875   :  { %v6121_v53 = vpop.f32.mrb[20].mxu0 }
 0x876   :  { %v6123_v52 = vpop.f32.mrb[21].mxu0  ;;  %v6125_v4 = vpop.f32.mrb[20].mxu1 }
 0x877   :  { %v6127_v41 = vpop.f32.mrb[21].mxu1 }
 0x884   :  { %v2473_v46 = vpop.f32.mrb[22].mxu0 }
 0x885   :  { %v6129_v0 = vadd.f32 %v2473_v46, %v2401_v58  ;;  %v2475_v47 = vpop.f32.mrb[23].mxu0  ;;  %v2544_v16 = vpop.f32.mrb[22].mxu1 }
 0x886   :  { %v6131_v7 = vadd.f32 %v2475_v47, %v2401_v58  ;;  %v2546_v51 = vpop.f32.mrb[23].mxu1  ;;  %v6137_v33 = vadd.f32 %v2544_v16, %v2401_v58 }
 0x887   :  { %2550 = vrot.lane.b32.xlu0 %v6129_v0, %s4815_s26  ;;  %v6139_v62 = vadd.f32 %v2546_v51, %v2401_v58  ;;  %v7913_v51 = vld [vmem:[#allocation33_spill] sm:$0xff] }
 0x888   :  { %2552 = vrot.lane.b32.xlu1 %v6131_v7, %s4815_s26 }
 0x88b   :  { %2554 = vrot.lane.b32.xlu0 %v6137_v33, %s4815_s26 }
 0x88c   :  { %2556 = vrot.lane.b32.xlu1 %v6139_v62, %s4815_s26  ;;  %s4838_s26 = smov 105  }
 0x88f   :  { %2566 = vrot.lane.b32.xlu0 %v6129_v0, %s4801_s16 }
 0x890   :  { %2568 = vrot.lane.b32.xlu1 %v6131_v7, %s4801_s16 }
 0x893   :  { %2570 = vrot.lane.b32.xlu0 %v6137_v33, %s4801_s16 }
 0x894   :  { %2572 = vrot.lane.b32.xlu1 %v6139_v62, %s4801_s16 }
 0x897   :  { %2582 = vrot.lane.b32.xlu0 %v6129_v0, %s4810_s3 }
 0x898   :  { %2584 = vrot.lane.b32.xlu1 %v6131_v7, %s4810_s3 }
 0x89b   :  { %2586 = vrot.lane.b32.xlu0 %v6137_v33, %s4810_s3 }
 0x89c   :  { %2588 = vrot.lane.b32.xlu1 %v6139_v62, %s4810_s3 }
 0x89f   :  { %2598 = vrot.lane.b32.xlu0 %v6129_v0, %s4812_s7 }
 0x8a0   :  { %2600 = vrot.lane.b32.xlu1 %v6131_v7, %s4812_s7 }
 0x8a3   :  { %2602 = vrot.lane.b32.xlu0 %v6137_v33, %s4812_s7 }
 0x8a4   :  { %2604 = vrot.lane.b32.xlu1 %v6139_v62, %s4812_s7 }
 0x8a7   :  { %2614 = vrot.lane.b32.xlu0 %v6129_v0, %s4826_s6 }
 0x8a8   :  { %2616 = vrot.lane.b32.xlu1 %v6131_v7, %s4826_s6 }
 0x8ab   :  { %2618 = vrot.lane.b32.xlu0 %v6137_v33, %s4826_s6 }
 0x8ac   :  { %2620 = vrot.lane.b32.xlu1 %v6139_v62, %s4826_s6  ;;  %s4848_s6 = smov 111  }
 0x8af   :  { %2630 = vrot.lane.b32.xlu0 %v6129_v0, %s4820_s1 }
 0x8b0   :  { %2632 = vrot.lane.b32.xlu1 %v6131_v7, %s4820_s1 }
 0x8b3   :  { %2634 = vrot.lane.b32.xlu0 %v6137_v33, %s4820_s1 }
 0x8b4   :  { %2636 = vrot.lane.b32.xlu1 %v6139_v62, %s4820_s1 }
 0x8b7   :  { %2647 = vperm.xlu0 %4644, %v7904_v48  }
 0x8f9   :  { %v2551_v15 = vpop.permute.xlu0 %2550 }
 0x8fa   :  { %v2553_v10 = vpop.permute.xlu1 %2552 }
 0x8fb   :  { %v2560_v43 = vsel %vm887_vm8, %v2551_v15, %v2553_v10 }
 0x8fc   :  { %v2563_v5 = vmul.f32 %v2560_v43, %v7905_v22 }
 0x8fd   :  { %v2555_v18 = vpop.permute.xlu0 %2554 }
 0x8fe   :  { %v2557_v34 = vpop.permute.xlu1 %2556  ;;  %v2559_v40 = vsel %vm887_vm8, %v2553_v10, %v2555_v18 }
 0x8ff   :  { %v2558_v35 = vsel %vm887_vm8, %v2555_v18, %v2557_v34  ;;  %v2561_v27 = vsel %vm887_vm8, %v2557_v34, %v2551_v15  ;;  %v2564_v3 = vmul.f32 %v2559_v40, %v7912_v60  ;;  %v7914_v34 = vld [vmem:[#allocation34_spill] sm:$0xff]  ;;  %vm2804_vm8 = vcmp.lt.s32.totalorder %v5062_v28, 119 }
 0x900   :  { %v2562_v49 = vmul.f32 %v2561_v27, %v7908_v13  ;;  %v2565_v6 = vmul.f32 %v2558_v35, %v7909_v57 }
 0x901   :  { %v2567_v21 = vpop.permute.xlu0 %2566 }
 0x902   :  { %v2569_v2 = vpop.permute.xlu1 %2568 }
 0x903   :  { %v2576_v14 = vsel %vm1581_vm7, %v2567_v21, %v2569_v2 }
 0x904   :  { %v2579_v19 = vmul.f32 %v2576_v14, %v7906_v56  ;;  %v7915_v14 = vld [vmem:[#allocation35_spill] sm:$0xff] }
 0x905   :  { %v2571_v9 = vpop.permute.xlu0 %2570 }
 0x906   :  { %v2575_v8 = vsel %vm1581_vm7, %v2569_v2, %v2571_v9  ;;  %v2573_v24 = vpop.permute.xlu1 %2572  ;;  %v4365_v55 = vpack.c.bf16 %v2579_v19, %v2563_v5  ;;  %v7916_v5 = vld [vmem:[#allocation36_spill] sm:$0xff] }
 0x907   :  { %v2580_v20 = vmul.f32 %v2575_v8, %v7907_v54  ;;  %v2574_v63 = vsel %vm1581_vm7, %v2571_v9, %v2573_v24  ;;  %v2577_v17 = vsel %vm1581_vm7, %v2573_v24, %v2567_v21  ;;  %vm3003_vm7 = vcmp.lt.s32.totalorder %v5062_v28, 23 }
 0x908   :  { %v2578_v59 = vmul.f32 %v2577_v17, %v7910_v11  ;;  %v2581_v25 = vmul.f32 %v2574_v63, %v7911_v44  ;;  %4366 = vmatprep.subr.bf16.mxu0 %v4365_v55  ;;  %v7917_v17 = vld [vmem:[#allocation38_spill] sm:$0xff] }
 0x909   :  { %v2583_v50 = vpop.permute.xlu0 %2582  ;;  %v4379_v47 = vpack.c.bf16 %v2580_v20, %v2564_v3 }
 0x90a   :  { %v4367_v61 = vpack.c.bf16 %v2578_v59, %v2562_v49  ;;  %v2585_v58 = vpop.permute.xlu1 %2584  ;;  %v4377_v46 = vpack.c.bf16 %v2581_v25, %v2565_v6  ;;  %v7918_v49 = vld [vmem:[#allocation71_spill] sm:$0xff]  ;;  %v7919_v59 = vld [vmem:[#allocation37_spill] sm:$0xff]  ;;  %v7920_v25 = vld [vmem:[#allocation70_spill] sm:$0xff] }
 0x90b   :  { %v2592_v16 = vsel %vm617_vm5, %v2583_v50, %v2585_v58 }
 0x90c   :  { %v2595_v45 = vmul.f32 %v2592_v16, %v7913_v51  ;;  %4368 = vmatpush1.bf16.msra.mxu0 %v4367_v61  ;;  %4378 = vmatprep.subr.bf16.mxu1 %v4377_v46  ;;  %v7921_v61 = vld [vmem:[#allocation39_spill] sm:$0xff]  ;;  %v7922_v46 = vld [vmem:[#allocation40_spill] sm:$0xff] }
 0x90d   :  { %4380 = vmatpush1.bf16.msra.mxu1 %v4379_v47  ;;  %v2587_v48 = vpop.permute.xlu0 %2586  ;;  %v7923_v16 = vld [vmem:[#allocation72_spill] sm:$0xff] }
 0x90e   :  { %v2591_v15 = vsel %vm617_vm5, %v2585_v58, %v2587_v48  ;;  %v2589_v10 = vpop.permute.xlu1 %2588  ;;  %v4369_v18 = vpack.c.bf16 %v6131_v7, %v2595_v45 }
 0x90f   :  { %v2596_v43 = vmul.f32 %v2591_v15, %v7914_v34  ;;  %v2590_v21 = vsel %vm617_vm5, %v2587_v48, %v2589_v10  ;;  %v2593_v2 = vsel %vm617_vm5, %v2589_v10, %v2583_v50  ;;  %v7924_v48 = vld [vmem:[#allocation73_spill] sm:$0xff] }
 0x910   :  { %v2594_v22 = vmul.f32 %v2593_v2, %v7915_v14  ;;  %v2597_v56 = vmul.f32 %v2590_v21, %v7916_v5  ;;  %4370 = vmatprep.subr.bf16.mxu0 %v4369_v18 }
 0x911   :  { %v2599_v19 = vpop.permute.xlu0 %2598  ;;  %v4383_v7 = vpack.c.bf16 %v6137_v33, %v2596_v43 }
 0x912   :  { %v4371_v35 = vpack.c.bf16 %v6129_v0, %v2594_v22  ;;  %v2601_v27 = vpop.permute.xlu1 %2600  ;;  %v4381_v9 = vpack.c.bf16 %v6139_v62, %v2597_v56 }
 0x913   :  { %v2608_v54 = vsel %vm657_vm6, %v2599_v19, %v2601_v27 }
 0x914   :  { %4372 = vmatpush1.bf16.msra.mxu0 %v4371_v35  ;;  %4382 = vmatprep.subr.bf16.mxu1 %v4381_v9  ;;  %v2610_v13 = vmul.f32 %v2608_v54, %v7917_v17  ;;  %v7927_v54 = vld [vmem:[#allocation55_spill] sm:$0xff] }
 0x915   :  { %4384 = vmatpush1.bf16.msra.mxu1 %v4383_v7  ;;  %v2603_v40 = vpop.permute.xlu0 %2602 }
 0x916   :  { %v2605_v8 = vpop.permute.xlu1 %2604  ;;  %v2607_v0 = vsel %vm657_vm6, %v2601_v27, %v2603_v40 }
 0x917   :  { %v2606_v62 = vsel %vm657_vm6, %v2603_v40, %v2605_v8  ;;  %v2609_v33 = vsel %vm657_vm6, %v2605_v8, %v2599_v19  ;;  %v2611_v44 = vmul.f32 %v2607_v0, %v7919_v59  ;;  %v7925_v40 = vld [vmem:[#allocation54_spill] sm:$0xff]  ;;  %v7928_v0 = vld [vmem:[#allocation56_spill] sm:$0xff] }
 0x918   :  { %v2612_v58 = vmul.f32 %v2606_v62, %v7921_v61  ;;  %v2613_v47 = vmul.f32 %v2609_v33, %v7922_v46  ;;  %v2549_v33 = vld [vmem:[%s7679_s10] sm:$0xff]  ;;  %s4837_s10 = smov 119  }
 0x919   :  { %v2615_v24 = vpop.permute.xlu0 %2614 }
 0x91a   :  { %v2617_v55 = vpop.permute.xlu1 %2616 }
 0x91b   :  { %v2624_v20 = vsel %vm1653_vm9, %v2615_v24, %v2617_v55 }
 0x91c   :  { %v2626_v57 = vmul.f32 %v2624_v20, %v7918_v49 }
 0x91d   :  { %v2619_v63 = vpop.permute.xlu0 %2618 }
 0x91e   :  { %v2623_v6 = vsel %vm1653_vm9, %v2617_v55, %v2619_v63  ;;  %v2621_v11 = vpop.permute.xlu1 %2620  ;;  %v4375_v43 = vpack.c.bf16 %v2626_v57, %v2610_v13  ;;  %v4836_v13 = vmov 4  }
 0x91f   :  { %v2627_v60 = vmul.f32 %v2623_v6, %v7920_v25  ;;  %v2622_v3 = vsel %vm1653_vm9, %v2619_v63, %v2621_v11  ;;  %v2625_v50 = vsel %vm1653_vm9, %v2621_v11, %v2615_v24  ;;  %v7926_v24 = vld [vmem:[#allocation53_spill] sm:$0xff]  ;;  %v4835_v63 = vmov 0   ;;  %4646 = vset.pattern.permute.xlu1 %v4836_v13 }
 0x920   :  { %v2628_v45 = vmul.f32 %v2622_v3, %v7923_v16  ;;  %v2629_v15 = vmul.f32 %v2625_v50, %v7924_v48  ;;  %4645 = vset.pattern.permute.xlu0 %v4835_v63  ;;  %v4844_v16 = vmov 8   ;;  %vm3082_vm9 = vcmp.lt.s32.totalorder %v5062_v28, 9 }
 0x921   :  { %v2631_v10 = vpop.permute.xlu0 %2630  ;;  %v4373_v18 = vpack.c.bf16 %v2627_v60, %v2611_v44 }
 0x922   :  { %v4387_v21 = vpack.c.bf16 %v2628_v45, %v2612_v58  ;;  %v2633_v2 = vpop.permute.xlu1 %2632  ;;  %v4385_v22 = vpack.c.bf16 %v2629_v15, %v2613_v47  ;;  %v4655_v58 = vld [vmem:[%s7682_s13] sm:$0xff]  ;;  %v4843_v47 = vmov 12  }
 0x923   :  { %4374 = vmatprep.subr.bf16.mxu0 %v4373_v18  ;;  %v2640_v56 = vsel %vm1087_vm14, %v2631_v10, %v2633_v2  ;;  %v2810_v18 = vld [vmem:[#allocation2 + $0x60] ss:$8 sm:$0xf] }
 0x924   :  { %4376 = vmatpush1.bf16.msra.mxu0 %v4375_v43  ;;  %4386 = vmatprep.subr.bf16.mxu1 %v4385_v22  ;;  %v2642_v55 = vmul.f32 %v2640_v56, %v7926_v24  ;;  %v2849_v43 = vld [vmem:[#allocation2 + $0x61] ss:$8 sm:$0xf]  ;;  %v2819_v22 = vrot.slane %v2810_v18, %v5068_v31 }
 0x925   :  { %4388 = vmatpush1.bf16.msra.mxu1 %v4387_v21  ;;  %v2635_v19 = vpop.permute.xlu0 %2634  ;;  %v2858_v56 = vrot.slane %v2849_v43, %v5068_v31  ;;  %v2854_v24 = vrot.slane %v2849_v43, %v5064_v29 }
 0x926   :  { %v2639_v35 = vsel %vm1087_vm14, %v2633_v2, %v2635_v19  ;;  %v2637_v27 = vpop.permute.xlu1 %2636 }
 0x927   :  { %v2638_v9 = vsel %vm1087_vm14, %v2635_v19, %v2637_v27  ;;  %v2641_v7 = vsel %vm1087_vm14, %v2637_v27, %v2631_v10  ;;  %v2643_v8 = vmul.f32 %v2639_v35, %v7925_v40  ;;  %v2815_v35 = vrot.slane %v2810_v18, %v5064_v29 }
 0x928   :  { %v2644_v20 = vmul.f32 %v2638_v9, %v7927_v54  ;;  %v2645_v62 = vmul.f32 %v2641_v7, %v7928_v0  ;;  %v2827_v9 = vrot.slane %v2810_v18, %v5066_v30  ;;  %v2862_v7 = vrot.slane %v2849_v43, %v5070_v32 }
 0x929   :  { %2665 = vmatprep.subr.mxu0 %v2643_v8  ;;  %v2866_v0 = vrot.slane %v2849_v43, %v5066_v30  ;;  %vm2923_vm14 = vcmp.lt.s32.totalorder %v5062_v28, 7 }
 0x92a   :  { %2666 = vmatpush1.msra.mxu0 %v2642_v55  ;;  %2736 = vmatprep.subr.mxu1 %v2645_v62  ;;  %v2823_v62 = vrot.slane %v2810_v18, %v5070_v32 }
 0x92b   :  { %4223 = vmatmul.mubr.msk.f32.vlgmr.msra.gmra.mrb[24].mxu0 %vm2403_vm12, %v2549_v33  ;;  %2737 = vmatpush1.msra.mxu1 %v2644_v20 }
 0x92c   :  { %4224 = vmatmul.mubr.msk.f32.vlgmr.msra.gmra.mrb[24].mxu1 %vm2403_vm12, %v2549_v33  ;;  %3185 = vmatprep.mubr.f32.mxu0 %v7894_v23 }
 0x92d   :  { %3256 = vmatprep.mubr.f32.mxu1 %v7894_v23 }
 0x936   :  { %v2648_v49 = vpop.permute.xlu0 %2647 }
 0x9fe   :  { %v2719_v57 = vpop.f32.mrb[24].mxu0 }
 0x9ff   :  { %v6269_v6 = vadd.f32 %v2719_v57, %v2648_v49  ;;  %v2790_v11 = vpop.f32.mrb[24].mxu1  ;;  %v2721_v44 = vpop.f32.mrb[25].mxu0 }
 0xa00   :  { %v6271_v25 = vadd.f32 %v2790_v11, %v2648_v49  ;;  %v2792_v60 = vpop.f32.mrb[25].mxu1  ;;  %v6275_v3 = vadd.f32 %v2721_v44, %v2648_v49 }
 0xa01   :  { %2796 = vrot.lane.b32.xlu1 %v6269_v6, %s4837_s10  ;;  %v6280_v50 = vadd.f32 %v2792_v60, %v2648_v49 }
 0xa02   :  { %2800 = vrot.lane.b32.xlu0 %v6271_v25, %s4837_s10 }
 0xa05   :  { %2798 = vrot.lane.b32.xlu1 %v6275_v3, %s4837_s10 }
 0xa06   :  { %2836 = vrot.lane.b32.xlu0 %v6269_v6, %s4812_s7 }
 0xa09   :  { %2802 = vrot.lane.b32.xlu1 %v6280_v50, %s4837_s10 }
 0xa0a   :  { %2840 = vrot.lane.b32.xlu0 %v6271_v25, %s4812_s7 }
 0xa0d   :  { %2838 = vrot.lane.b32.xlu1 %v6275_v3, %s4812_s7 }
 0xa0e   :  { %2875 = vrot.lane.b32.xlu0 %v6269_v6, %s4838_s26 }
 0xa11   :  { %2842 = vrot.lane.b32.xlu1 %v6280_v50, %s4812_s7 }
 0xa12   :  { %2879 = vrot.lane.b32.xlu0 %v6271_v25, %s4838_s26 }
 0xa15   :  { %2877 = vrot.lane.b32.xlu1 %v6275_v3, %s4838_s26 }
 0xa16   :  { %2915 = vrot.lane.b32.xlu0 %v6269_v6, %s4839_s11 }
 0xa19   :  { %2881 = vrot.lane.b32.xlu1 %v6280_v50, %s4838_s26 }
 0xa1a   :  { %2919 = vrot.lane.b32.xlu0 %v6271_v25, %s4839_s11 }
 0xa1d   :  { %2917 = vrot.lane.b32.xlu1 %v6275_v3, %s4839_s11 }
 0xa1e   :  { %2955 = vrot.lane.b32.xlu0 %v6269_v6, %s4840_s30 }
 0xa21   :  { %2921 = vrot.lane.b32.xlu1 %v6280_v50, %s4839_s11 }
 0xa22   :  { %2959 = vrot.lane.b32.xlu0 %v6271_v25, %s4840_s30 }
 0xa25   :  { %2957 = vrot.lane.b32.xlu1 %v6275_v3, %s4840_s30 }
 0xa26   :  { %2995 = vrot.lane.b32.xlu0 %v6269_v6, %s4841_s27 }
 0xa29   :  { %2961 = vrot.lane.b32.xlu1 %v6280_v50, %s4840_s30 }
 0xa2a   :  { %2999 = vrot.lane.b32.xlu0 %v6271_v25, %s4841_s27 }
 0xa2d   :  { %2997 = vrot.lane.b32.xlu1 %v6275_v3, %s4841_s27 }
 0xa2e   :  { %3035 = vrot.lane.b32.xlu0 %v6269_v6, %s4810_s3 }
 0xa31   :  { %3001 = vrot.lane.b32.xlu1 %v6280_v50, %s4841_s27 }
 0xa32   :  { %3039 = vrot.lane.b32.xlu0 %v6271_v25, %s4810_s3 }
 0xa35   :  { %3037 = vrot.lane.b32.xlu1 %v6275_v3, %s4810_s3 }
 0xa36   :  { %3074 = vrot.lane.b32.xlu0 %v6269_v6, %s4842_s28 }
 0xa39   :  { %3041 = vrot.lane.b32.xlu1 %v6280_v50, %s4810_s3 }
 0xa3a   :  { %3078 = vrot.lane.b32.xlu0 %v6271_v25, %s4842_s28 }
 0xa3d   :  { %3076 = vrot.lane.b32.xlu1 %v6275_v3, %s4842_s28 }
 0xa3e   :  { %337 = vperm.xlu0 %4645, %v4655_v58  }
 0xa41   :  { %3080 = vrot.lane.b32.xlu1 %v6280_v50, %s4842_s28 }
 0xa42   :  { %4648 = vset.pattern.permute.xlu0 %v4843_v47 }
 0xa43   :  { %3115 = vperm.xlu0 %4648, %v4655_v58  }
 0xa45   :  { %1160 = vperm.xlu1 %4646, %v4655_v58  }
 0xa49   :  { %4647 = vset.pattern.permute.xlu1 %v4844_v16 }
 0xa4a   :  { %2154 = vperm.xlu1 %4647, %v4655_v58  }
 0xa73   :  { %v2797_v45 = vpop.permute.xlu1 %2796 }
 0xa74   :  { %v2801_v48 = vpop.permute.xlu0 %2800 }
 0xa77   :  { %v2799_v15 = vpop.permute.xlu1 %2798 }
 0xa78   :  { %v2837_v10 = vpop.permute.xlu0 %2836  ;;  %v2807_v19 = vsel %vm2804_vm8, %v2797_v45, %v2799_v15  ;;  %v2806_v13 = vsel %vm2804_vm8, %v2799_v15, %v2801_v48 }
 0xa79   :  { %v2833_v55 = vmul.f32 %v2819_v22, %v2807_v19  ;;  %v2834_v22 = vmul.f32 %v2823_v62, %v2806_v13  ;;  %v2889_v19 = vld [vmem:[#allocation2 + $0x62] ss:$8 sm:$0xf] }
 0xa7b   :  { %v2803_v21 = vpop.permute.xlu1 %2802 }
 0xa7c   :  { %v2841_v2 = vpop.permute.xlu0 %2840  ;;  %v2805_v33 = vsel %vm2804_vm8, %v2801_v48, %v2803_v21  ;;  %v2808_v63 = vsel %vm2804_vm8, %v2803_v21, %v2797_v45 }
 0xa7d   :  { %v2832_v47 = vmul.f32 %v2815_v35, %v2808_v63  ;;  %v2835_v16 = vmul.f32 %v2827_v9, %v2805_v33  ;;  %v2898_v35 = vrot.slane %v2889_v19, %v5068_v31  ;;  %v2969_v33 = vld [vmem:[#allocation2 + $0x64] ss:$8 sm:$0xf] }
 0xa7f   :  { %v2839_v27 = vpop.permute.xlu1 %2838 }
 0xa80   :  { %v2846_v40 = vsel %vm657_vm6, %v2837_v10, %v2839_v27  ;;  %v2876_v8 = vpop.permute.xlu0 %2875  ;;  %v2845_v54 = vsel %vm657_vm6, %v2839_v27, %v2841_v2 }
 0xa81   :  { %v2872_v20 = vmul.f32 %v2858_v56, %v2846_v40  ;;  %v2873_v11 = vmul.f32 %v2862_v7, %v2845_v54  ;;  %v2894_v40 = vrot.slane %v2889_v19, %v5064_v29 }
 0xa83   :  { %v2843_v49 = vpop.permute.xlu1 %2842  ;;  %v4389_v57 = vpack.c.bf16 %v2872_v20, %v2833_v55  ;;  %v4407_v48 = vpack.c.bf16 %v2873_v11, %v2834_v22  ;;  %v2906_v55 = vrot.slane %v2889_v19, %v5066_v30  ;;  %v2902_v11 = vrot.slane %v2889_v19, %v5070_v32 }
 0xa84   :  { %v2844_v44 = vsel %vm657_vm6, %v2841_v2, %v2843_v49  ;;  %v2847_v60 = vsel %vm657_vm6, %v2843_v49, %v2837_v10  ;;  %v2880_v58 = vpop.permute.xlu0 %2879  ;;  %v2929_v2 = vld [vmem:[#allocation2 + $0x63] ss:$8 sm:$0xf]  ;;  %v2978_v19 = vrot.slane %v2969_v33, %v5068_v31 }
 0xa85   :  { %v2871_v18 = vmul.f32 %v2854_v24, %v2847_v60  ;;  %v2874_v43 = vmul.f32 %v2866_v0, %v2844_v44  ;;  %4390 = vmatprep.subr.bf16.mxu0 %v4389_v57  ;;  %v2938_v9 = vrot.slane %v2929_v2, %v5068_v31  ;;  %v2942_v54 = vrot.slane %v2929_v2, %v5070_v32 }
 0xa86   :  { %v2934_v62 = vrot.slane %v2929_v2, %v5064_v29  ;;  %v2946_v57 = vrot.slane %v2929_v2, %v5066_v30 }
 0xa87   :  { %v4391_v45 = vpack.c.bf16 %v2871_v18, %v2832_v47  ;;  %v2878_v21 = vpop.permute.xlu1 %2877  ;;  %v4405_v56 = vpack.c.bf16 %v2874_v43, %v2835_v16  ;;  %v2974_v43 = vrot.slane %v2969_v33, %v5064_v29 }
 0xa88   :  { %v2916_v15 = vpop.permute.xlu0 %2915  ;;  %v2886_v7 = vsel %vm2883_vm11, %v2876_v8, %v2878_v21  ;;  %v2885_v47 = vsel %vm2883_vm11, %v2878_v21, %v2880_v58 }
 0xa89   :  { %4392 = vmatpush1.bf16.msra.mxu0 %v4391_v45  ;;  %4406 = vmatprep.subr.bf16.mxu1 %v4405_v56  ;;  %v2912_v63 = vmul.f32 %v2898_v35, %v2886_v7  ;;  %v2913_v21 = vmul.f32 %v2902_v11, %v2885_v47 }
 0xa8a   :  { %4408 = vmatpush1.bf16.msra.mxu1 %v4407_v48 }
 0xa8b   :  { %v2882_v10 = vpop.permute.xlu1 %2881 }
 0xa8c   :  { %v2920_v27 = vpop.permute.xlu0 %2919  ;;  %v2884_v44 = vsel %vm2883_vm11, %v2880_v58, %v2882_v10  ;;  %v2887_v60 = vsel %vm2883_vm11, %v2882_v10, %v2876_v8 }
 0xa8d   :  { %v2911_v8 = vmul.f32 %v2894_v40, %v2887_v60  ;;  %v2914_v2 = vmul.f32 %v2906_v55, %v2884_v44  ;;  %v2986_v55 = vrot.slane %v2969_v33, %v5066_v30 }
 0xa8f   :  { %v2918_v24 = vpop.permute.xlu1 %2917 }
 0xa90   :  { %v2926_v20 = vsel %vm2923_vm14, %v2916_v15, %v2918_v24  ;;  %v2956_v0 = vpop.permute.xlu0 %2955  ;;  %v2925_v13 = vsel %vm2923_vm14, %v2918_v24, %v2920_v27 }
 0xa91   :  { %v2952_v49 = vmul.f32 %v2938_v9, %v2926_v20  ;;  %v2953_v22 = vmul.f32 %v2942_v54, %v2925_v13  ;;  %v2982_v20 = vrot.slane %v2969_v33, %v5070_v32 }
 0xa93   :  { %v2922_v16 = vpop.permute.xlu1 %2921  ;;  %v4393_v18 = vpack.c.bf16 %v2952_v49, %v2912_v63  ;;  %v4411_v24 = vpack.c.bf16 %v2953_v22, %v2913_v21 }
 0xa94   :  { %v2924_v45 = vsel %vm2923_vm14, %v2920_v27, %v2922_v16  ;;  %v2927_v56 = vsel %vm2923_vm14, %v2922_v16, %v2916_v15  ;;  %v2960_v48 = vpop.permute.xlu0 %2959 }
 0xa95   :  { %v2951_v10 = vmul.f32 %v2934_v62, %v2927_v56  ;;  %v2954_v58 = vmul.f32 %v2946_v57, %v2924_v45  ;;  %4394 = vmatprep.subr.bf16.mxu0 %v4393_v18 }
 0xa97   :  { %v4395_v35 = vpack.c.bf16 %v2951_v10, %v2911_v8  ;;  %v2958_v9 = vpop.permute.xlu1 %2957  ;;  %v4409_v7 = vpack.c.bf16 %v2954_v58, %v2914_v2 }
 0xa98   :  { %v2965_v54 = vsel %vm2963_vm1, %v2958_v9, %v2960_v48  ;;  %v2966_v27 = vsel %vm2963_vm1, %v2956_v0, %v2958_v9  ;;  %v2996_v15 = vpop.permute.xlu0 %2995 }
 0xa99   :  { %v2991_v63 = vmul.f32 %v2974_v43, %v2966_v27  ;;  %v2992_v40 = vmul.f32 %v2978_v19, %v2965_v54  ;;  %4396 = vmatpush1.bf16.msra.mxu0 %v4395_v35  ;;  %4410 = vmatprep.subr.bf16.mxu1 %v4409_v7  ;;  %v3009_v43 = vld [vmem:[#allocation2 + $0x65] ss:$8 sm:$0xf] }
 0xa9a   :  { %4412 = vmatpush1.bf16.msra.mxu1 %v4411_v24  ;;  %v3018_v56 = vrot.slane %v3009_v43, %v5068_v31  ;;  %v3022_v8 = vrot.slane %v3009_v43, %v5070_v32  ;;  %v3026_v2 = vrot.slane %v3009_v43, %v5066_v30 }
 0xa9b   :  { %v4399_v62 = vpack.c.bf16 %v2991_v63, %v6269_v6  ;;  %v2962_v13 = vpop.permute.xlu1 %2961  ;;  %v4397_v49 = vpack.c.bf16 %v2992_v40, %v6275_v3  ;;  %v3048_v3 = vld [vmem:[#allocation2 + $0x66] ss:$8 sm:$0xf]  ;;  %v3088_v63 = vld [vmem:[#allocation2 + $0x67] ss:$8 sm:$0xf] }
 0xa9c   :  { %v2964_v57 = vsel %vm2963_vm1, %v2960_v48, %v2962_v13  ;;  %v2967_v11 = vsel %vm2963_vm1, %v2962_v13, %v2956_v0  ;;  %v3000_v44 = vpop.permute.xlu0 %2999  ;;  %v3014_v0 = vrot.slane %v3009_v43, %v5064_v29  ;;  %v3053_v48 = vrot.slane %v3048_v3, %v5064_v29 }
 0xa9d   :  { %v2993_v60 = vmul.f32 %v2982_v20, %v2964_v57  ;;  %v2994_v47 = vmul.f32 %v2986_v55, %v2967_v11  ;;  %4398 = vmatprep.subr.bf16.mxu0 %v4397_v49  ;;  %v3061_v35 = vrot.slane %v3048_v3, %v5070_v32  ;;  %v3065_v9 = vrot.slane %v3048_v3, %v5066_v30 }
 0xa9e   :  { %4400 = vmatpush1.bf16.msra.mxu0 %v4399_v62 }
 0xa9f   :  { %v4415_v16 = vpack.c.bf16 %v2993_v60, %v6271_v25  ;;  %v2998_v33 = vpop.permute.xlu1 %2997  ;;  %v4413_v18 = vpack.c.bf16 %v2994_v47, %v6280_v50  ;;  %v3057_v25 = vrot.slane %v3048_v3, %v5068_v31  ;;  %v3093_v60 = vrot.slane %v3088_v63, %v5064_v29 }
 0xaa0   :  { %v3036_v6 = vpop.permute.xlu0 %3035  ;;  %v3005_v50 = vsel %vm3003_vm7, %v2998_v33, %v3000_v44  ;;  %v3006_v19 = vsel %vm3003_vm7, %v2996_v15, %v2998_v33  ;;  %v3097_v47 = vrot.slane %v3088_v63, %v5068_v31 }
 0xaa1   :  { %4414 = vmatprep.subr.bf16.mxu1 %v4413_v18  ;;  %v3031_v7 = vmul.f32 %v3014_v0, %v3006_v19  ;;  %v3032_v24 = vmul.f32 %v3018_v56, %v3005_v50  ;;  %v2795_v50 = vld [vmem:[#allocation10] sm:$0xff] }
 0xaa2   :  { %4416 = vmatpush1.bf16.msra.mxu1 %v4415_v16 }
 0xaa3   :  { %v3002_v22 = vpop.permute.xlu1 %3001 }
 0xaa4   :  { %v3040_v45 = vpop.permute.xlu0 %3039  ;;  %v3004_v40 = vsel %vm3003_vm7, %v3000_v44, %v3002_v22  ;;  %v3007_v55 = vsel %vm3003_vm7, %v3002_v22, %v2996_v15 }
 0xaa5   :  { %v3033_v16 = vmul.f32 %v3022_v8, %v3004_v40  ;;  %v3034_v44 = vmul.f32 %v3026_v2, %v3007_v55  ;;  %v7937_v55 = vld [vmem:[#allocation19_spill] sm:$0xff] }
 0xaa7   :  { %v3038_v10 = vpop.permute.xlu1 %3037 }
 0xaa8   :  { %v3044_v58 = vsel %vm617_vm5, %v3038_v10, %v3040_v45  ;;  %v3045_v21 = vsel %vm617_vm5, %v3036_v6, %v3038_v10  ;;  %v3075_v20 = vpop.permute.xlu0 %3074 }
 0xaa9   :  { %v3070_v54 = vmul.f32 %v3053_v48, %v3045_v21  ;;  %v3071_v27 = vmul.f32 %v3057_v25, %v3044_v58  ;;  %v3101_v48 = vrot.slane %v3088_v63, %v5070_v32  ;;  %v3105_v25 = vrot.slane %v3088_v63, %v5066_v30  ;;  %v7935_v63 = vld [vmem:[#allocation61_spill] sm:$0xff] }
 0xaab   :  { %v4403_v62 = vpack.c.bf16 %v3070_v54, %v3031_v7  ;;  %v3042_v13 = vpop.permute.xlu1 %3041  ;;  %v4401_v49 = vpack.c.bf16 %v3071_v27, %v3032_v24  ;;  %v7931_v7 = vld [vmem:[#allocation18_spill] sm:$0xff]  ;;  %v7933_v54 = vld [vmem:[#allocation17_spill] sm:$0xff] }
 0xaac   :  { %v3043_v57 = vsel %vm617_vm5, %v3040_v45, %v3042_v13  ;;  %v3046_v11 = vsel %vm617_vm5, %v3042_v13, %v3036_v6  ;;  %v3079_v43 = vpop.permute.xlu0 %3078  ;;  %v7938_v13 = vld [vmem:[#allocation62_spill] sm:$0xff] }
 0xaad   :  { %v3072_v33 = vmul.f32 %v3061_v35, %v3043_v57  ;;  %v3073_v18 = vmul.f32 %v3065_v9, %v3046_v11  ;;  %4402 = vmatprep.subr.bf16.mxu0 %v4401_v49  ;;  %v7929_v35 = vld [vmem:[#allocation16_spill] sm:$0xff] }
 0xaae   :  { %4404 = vmatpush1.bf16.msra.mxu0 %v4403_v62 }
 0xaaf   :  { %v4419_v15 = vpack.c.bf16 %v3072_v33, %v3033_v16  ;;  %v3077_v3 = vpop.permute.xlu1 %3076  ;;  %v4417_v22 = vpack.c.bf16 %v3073_v18, %v3034_v44 }
 0xab0   :  { %v3084_v45 = vsel %vm3082_vm9, %v3077_v3, %v3079_v43  ;;  %v3085_v6 = vsel %vm3082_vm9, %v3075_v20, %v3077_v3 }
 0xab1   :  { %v3110_v0 = vmul.f32 %v3093_v60, %v3085_v6  ;;  %4418 = vmatprep.subr.bf16.mxu1 %v4417_v22  ;;  %v3111_v56 = vmul.f32 %v3097_v47, %v3084_v45  ;;  %v7941_v60 = vld [vmem:[#allocation63_spill] sm:$0xff] }
 0xab2   :  { %4420 = vmatpush1.bf16.msra.mxu1 %v4419_v15 }
 0xab3   :  { %3137 = vmatprep.subr.mxu0 %v3111_v56  ;;  %v3081_v19 = vpop.permute.xlu1 %3080 }
 0xab4   :  { %v3083_v8 = vsel %vm3082_vm9, %v3079_v43, %v3081_v19  ;;  %v3086_v2 = vsel %vm3082_vm9, %v3081_v19, %v3075_v20  ;;  %3138 = vmatpush1.msra.mxu0 %v3110_v0  ;;  %v3316_v43 = vld [vmem:[#allocation2 + $0x80] ss:$8 sm:$0xf] }
 0xab5   :  { %v3112_v10 = vmul.f32 %v3101_v48, %v3083_v8  ;;  %4225 = vmatmul.mubr.msk.f32.vlgmr.msra.gmra.mrb[26].mxu0 %vm1163_vm0, %v2795_v50  ;;  %v3113_v58 = vmul.f32 %v3105_v25, %v3086_v2  ;;  %v6590_v45 = vrot.slane %v3316_v43, %v5068_v31 }
 0xab7   :  { %3208 = vmatprep.subr.mxu1 %v3113_v58  ;;  %v6614_v58 = vrot.slane %v3316_v43, %v5066_v30 }
 0xab8   :  { %3209 = vmatpush1.msra.mxu1 %v3112_v10  ;;  %v6611_v10 = vrot.slane %v3316_v43, %v5064_v29 }
 0xab9   :  { %4226 = vmatmul.mubr.msk.f32.vlgmr.msra.gmra.mrb[26].mxu1 %vm1163_vm0, %v2795_v50  ;;  %vm3298_vm0 = vcmp.lt.s32.totalorder %v5062_v28, 17  ;;  %v3265_v28 = vld [vmem:[%s7681_s12 + $0x10] sm:$0xff] }
 0xabd   :  { %v338_v21 = vpop.permute.xlu0 %337 }
 0xabe   :  { %v6429_v9 = vadd.f32 %v338_v21, %v7929_v35  ;;  %v6432_v24 = vadd.f32 %v338_v21, %v7931_v7  ;;  %v6439_v27 = vadd.f32 %v338_v21, %v7933_v54  ;;  %v6447_v62 = vadd.f32 %v338_v21, %v7937_v55 }
 0xabf   :  { %v6621_v35 = vrot.slane %v3316_v43, %v5070_v32 }
 0xac0   :  { %7930 = vst [vmem:[#allocation31_spill] sm:$0xff] %v6429_v9  ;;  %7932 = vst [vmem:[#allocation32_spill] sm:$0xff] %v6432_v24  ;;  %3274 = vrot.lane.b32.xlu0 %v6432_v24, %s4845_s22  ;;  %3266 = vrot.lane.b32.xlu1 %v6429_v9, %s4845_s22 }
 0xac1   :  { %7934 = vst [vmem:[#allocation45_spill] sm:$0xff] %v6439_v27 }
 0xac4   :  { %3282 = vrot.lane.b32.xlu0 %v6439_v27, %s4845_s22  ;;  %v1161_v20 = vpop.permute.xlu1 %1160 }
 0xac5   :  { %v6444_v40 = vadd.f32 %v7935_v63, %v1161_v20  ;;  %v6454_v49 = vadd.f32 %v7938_v13, %v1161_v20  ;;  %v6464_v47 = vadd.f32 %v7941_v60, %v1161_v20 }
 0xac7   :  { %7936 = vst [vmem:[#allocation46_spill] sm:$0xff] %v6444_v40  ;;  %3268 = vrot.lane.b32.xlu1 %v6444_v40, %s4845_s22  ;;  %7939 = vst [vmem:[#allocation47_spill] sm:$0xff] %v6454_v49 }
 0xac8   :  { %3290 = vrot.lane.b32.xlu0 %v6447_v62, %s4845_s22  ;;  %7942 = vst [vmem:[#allocation29_spill] sm:$0xff] %v6464_v47 }
 0xac9   :  { %v2155_v57 = vpop.permute.xlu1 %2154 }
 0xaca   :  { %v6457_v11 = vadd.f32 %v6121_v53, %v2155_v57  ;;  %v6467_v16 = vadd.f32 %v6123_v52, %v2155_v57  ;;  %v7943_v53 = vld [vmem:[#allocation64_spill] sm:$0xff]  ;;  %v6477_v33 = vadd.f32 %v6125_v4, %v2155_v57  ;;  %v6484_v52 = vadd.f32 %v6127_v41, %v2155_v57  ;;  %v6574_v4 = vpop.permute.xlu0 %3115 }
 0xacb   :  { %3276 = vrot.lane.b32.xlu1 %v6454_v49, %s4845_s22  ;;  %v6474_v44 = vadd.f32 %v7943_v53, %v1161_v20 }
 0xacc   :  { %7940 = vst [vmem:[#allocation48_spill] sm:$0xff] %v6457_v11  ;;  %3270 = vrot.lane.b32.xlu0 %v6457_v11, %s4845_s22  ;;  %7945 = vst [vmem:[#allocation58_spill] sm:$0xff] %v6477_v33 }
 0xacd   :  { %7944 = vst [vmem:[#allocation30_spill] sm:$0xff] %v6474_v44 }
 0xacf   :  { %3284 = vrot.lane.b32.xlu1 %v6464_v47, %s4845_s22 }
 0xad0   :  { %3278 = vrot.lane.b32.xlu0 %v6467_v16, %s4845_s22 }
 0xad3   :  { %3292 = vrot.lane.b32.xlu1 %v6474_v44, %s4845_s22 }
 0xad4   :  { %3286 = vrot.lane.b32.xlu0 %v6477_v33, %s4845_s22 }
 0xad7   :  { %3356 = vrot.lane.b32.xlu1 %v6444_v40, %s4810_s3 }
 0xad8   :  { %3294 = vrot.lane.b32.xlu0 %v6484_v52, %s4845_s22 }
 0xadb   :  { %3364 = vrot.lane.b32.xlu1 %v6454_v49, %s4810_s3 }
 0xadc   :  { %3354 = vrot.lane.b32.xlu0 %v6429_v9, %s4810_s3 }
 0xadf   :  { %3372 = vrot.lane.b32.xlu1 %v6464_v47, %s4810_s3 }
 0xae0   :  { %3362 = vrot.lane.b32.xlu0 %v6432_v24, %s4810_s3 }
 0xae3   :  { %3380 = vrot.lane.b32.xlu1 %v6474_v44, %s4810_s3 }
 0xae4   :  { %3370 = vrot.lane.b32.xlu0 %v6439_v27, %s4810_s3 }
 0xae7   :  { %3420 = vrot.lane.b32.xlu1 %v6444_v40, %s4846_s29 }
 0xae8   :  { %3378 = vrot.lane.b32.xlu0 %v6447_v62, %s4810_s3 }
 0xaeb   :  { %3428 = vrot.lane.b32.xlu1 %v6454_v49, %s4846_s29 }
 0xaec   :  { %3358 = vrot.lane.b32.xlu0 %v6457_v11, %s4810_s3 }
 0xaef   :  { %3436 = vrot.lane.b32.xlu1 %v6464_v47, %s4846_s29 }
 0xaf0   :  { %3366 = vrot.lane.b32.xlu0 %v6467_v16, %s4810_s3 }
 0xaf3   :  { %3444 = vrot.lane.b32.xlu1 %v6474_v44, %s4846_s29 }
 0xaf4   :  { %3374 = vrot.lane.b32.xlu0 %v6477_v33, %s4810_s3 }
 0xaf7   :  { %3508 = vrot.lane.b32.xlu1 %v6444_v40, %s4806_s5 }
 0xaf8   :  { %3382 = vrot.lane.b32.xlu0 %v6484_v52, %s4810_s3 }
 0xafb   :  { %3516 = vrot.lane.b32.xlu1 %v6454_v49, %s4806_s5 }
 0xafc   :  { %3418 = vrot.lane.b32.xlu0 %v6429_v9, %s4846_s29 }
 0xaff   :  { %3524 = vrot.lane.b32.xlu1 %v6464_v47, %s4806_s5 }
 0xb00   :  { %3426 = vrot.lane.b32.xlu0 %v6432_v24, %s4846_s29 }
 0xb03   :  { %3532 = vrot.lane.b32.xlu1 %v6474_v44, %s4806_s5 }
 0xb04   :  { %3434 = vrot.lane.b32.xlu0 %v6439_v27, %s4846_s29 }
 0xb07   :  { %3572 = vrot.lane.b32.xlu1 %v6444_v40, %s4808_s2 }
 0xb08   :  { %3442 = vrot.lane.b32.xlu0 %v6447_v62, %s4846_s29 }
 0xb0b   :  { %3580 = vrot.lane.b32.xlu1 %v6454_v49, %s4808_s2 }
 0xb0c   :  { %3422 = vrot.lane.b32.xlu0 %v6457_v11, %s4846_s29 }
 0xb0f   :  { %3588 = vrot.lane.b32.xlu1 %v6464_v47, %s4808_s2 }
 0xb10   :  { %3430 = vrot.lane.b32.xlu0 %v6467_v16, %s4846_s29 }
 0xb13   :  { %3596 = vrot.lane.b32.xlu1 %v6474_v44, %s4808_s2 }
 0xb14   :  { %3438 = vrot.lane.b32.xlu0 %v6477_v33, %s4846_s29 }
 0xb17   :  { %3636 = vrot.lane.b32.xlu1 %v6444_v40, %s4847_s15 }
 0xb18   :  { %3446 = vrot.lane.b32.xlu0 %v6484_v52, %s4846_s29 }
 0xb1b   :  { %3644 = vrot.lane.b32.xlu1 %v6454_v49, %s4847_s15 }
 0xb1c   :  { %3506 = vrot.lane.b32.xlu0 %v6429_v9, %s4806_s5 }
 0xb1f   :  { %3652 = vrot.lane.b32.xlu1 %v6464_v47, %s4847_s15 }
 0xb20   :  { %3514 = vrot.lane.b32.xlu0 %v6432_v24, %s4806_s5 }
 0xb23   :  { %3660 = vrot.lane.b32.xlu1 %v6474_v44, %s4847_s15 }
 0xb24   :  { %3522 = vrot.lane.b32.xlu0 %v6439_v27, %s4806_s5 }
 0xb27   :  { %3724 = vrot.lane.b32.xlu1 %v6444_v40, %s4812_s7 }
 0xb28   :  { %3530 = vrot.lane.b32.xlu0 %v6447_v62, %s4806_s5 }
 0xb2b   :  { %3732 = vrot.lane.b32.xlu1 %v6454_v49, %s4812_s7 }
 0xb2c   :  { %3510 = vrot.lane.b32.xlu0 %v6457_v11, %s4806_s5 }
 0xb2f   :  { %3740 = vrot.lane.b32.xlu1 %v6464_v47, %s4812_s7 }
 0xb30   :  { %3518 = vrot.lane.b32.xlu0 %v6467_v16, %s4806_s5 }
 0xb32   :  { %v3275_v41 = vpop.permute.xlu0 %3274  ;;  %v3267_v18 = vpop.permute.xlu1 %3266 }
 0xb33   :  { %3748 = vrot.lane.b32.xlu1 %v6474_v44, %s4812_s7  ;;  %v3307_v6 = vsel %vm3298_vm0, %v3267_v18, %v3275_v41 }
 0xb34   :  { %3526 = vrot.lane.b32.xlu0 %v6477_v33, %s4806_s5  ;;  %v3339_v25 = vmul.f32 %v6590_v45, %v3307_v6 }
 0xb36   :  { %v3283_v15 = vpop.permute.xlu0 %3282 }
 0xb37   :  { %3788 = vrot.lane.b32.xlu1 %v6444_v40, %s4848_s6  ;;  %v3303_v20 = vsel %vm3298_vm0, %v3275_v41, %v3283_v15 }
 0xb38   :  { %3534 = vrot.lane.b32.xlu0 %v6484_v52, %s4806_s5  ;;  %v3340_v41 = vmul.f32 %v6621_v35, %v3303_v20 }
 0xb39   :  { %v3269_v3 = vpop.permute.xlu1 %3268 }
 0xb3a   :  { %v3291_v22 = vpop.permute.xlu0 %3290 }
 0xb3b   :  { %3796 = vrot.lane.b32.xlu1 %v6454_v49, %s4848_s6  ;;  %v3299_v7 = vsel %vm3298_vm0, %v3283_v15, %v3291_v22  ;;  %v3311_v54 = vsel %vm3298_vm0, %v3291_v22, %v3267_v18 }
 0xb3c   :  { %3570 = vrot.lane.b32.xlu0 %v6429_v9, %s4808_s2  ;;  %v3338_v53 = vmul.f32 %v6611_v10, %v3311_v54  ;;  %v3341_v18 = vmul.f32 %v6614_v58, %v3299_v7 }
 0xb3d   :  { %v3277_v0 = vpop.permute.xlu1 %3276 }
 0xb3e   :  { %v3308_v56 = vsel %vm3298_vm0, %v3269_v3, %v3277_v0  ;;  %v6600_v48 = vpop.permute.xlu0 %3270 }
 0xb3f   :  { %v3343_v50 = vmul.f32 %v6590_v45, %v3308_v56  ;;  %3804 = vrot.lane.b32.xlu1 %v6464_v47, %s4848_s6 }
 0xb40   :  { %3578 = vrot.lane.b32.xlu0 %v6432_v24, %s4808_s2 }
 0xb41   :  { %v3285_v19 = vpop.permute.xlu1 %3284  ;;  %v4421_v8 = vpack.c.bf16 %v3343_v50, %v3339_v25 }
 0xb42   :  { %v6608_v2 = vpop.permute.xlu0 %3278  ;;  %v3304_v21 = vsel %vm3298_vm0, %v3277_v0, %v3285_v19 }
 0xb43   :  { %3812 = vrot.lane.b32.xlu1 %v6474_v44, %s4848_s6  ;;  %4422 = vmatprep.subr.bf16.mxu0 %v4421_v8  ;;  %v3344_v55 = vmul.f32 %v6621_v35, %v3304_v21 }
 0xb44   :  { %3586 = vrot.lane.b32.xlu0 %v6439_v27, %s4808_s2 }
 0xb45   :  { %v3293_v63 = vpop.permute.xlu1 %3292 }
 0xb46   :  { %v3300_v13 = vsel %vm3298_vm0, %v3285_v19, %v3293_v63  ;;  %v3312_v57 = vsel %vm3298_vm0, %v3293_v63, %v3269_v3  ;;  %v6636_v60 = vpop.permute.xlu0 %3286  ;;  %v4495_v3 = vpack.c.bf16 %v3344_v55, %v3340_v41 }
 0xb47   :  { %v3342_v43 = vmul.f32 %v6611_v10, %v3312_v57  ;;  %v3345_v22 = vmul.f32 %v6614_v58, %v3300_v13 }
 0xb48   :  { %3594 = vrot.lane.b32.xlu0 %v6447_v62, %s4808_s2 }
 0xb49   :  { %v4423_v15 = vpack.c.bf16 %v3342_v43, %v3338_v53  ;;  %v6645_v6 = vpop.permute.xlu1 %3356  ;;  %v4493_v0 = vpack.c.bf16 %v3345_v22, %v3341_v18 }
 0xb4a   :  { %v6647_v56 = vpop.permute.xlu0 %3294 }
 0xb4b   :  { %4424 = vmatpush1.bf16.msra.mxu0 %v4423_v15  ;;  %4494 = vmatprep.subr.bf16.mxu1 %v4493_v0 }
 0xb4c   :  { %3574 = vrot.lane.b32.xlu0 %v6457_v11, %s4808_s2  ;;  %4496 = vmatpush1.bf16.msra.mxu1 %v4495_v3 }
 0xb4d   :  { %v6651_v25 = vpop.permute.xlu1 %3364 }
 0xb4e   :  { %v6653_v50 = vpop.permute.xlu0 %3354 }
 0xb50   :  { %3582 = vrot.lane.b32.xlu0 %v6467_v16, %s4808_s2 }
 0xb51   :  { %v6657_v19 = vpop.permute.xlu1 %3372 }
 0xb52   :  { %v6659_v8 = vpop.permute.xlu0 %3362 }
 0xb54   :  { %3590 = vrot.lane.b32.xlu0 %v6477_v33, %s4808_s2 }
 0xb55   :  { %v6663_v21 = vpop.permute.xlu1 %3380 }
 0xb56   :  { %v6665_v7 = vpop.permute.xlu0 %3370 }
 0xb58   :  { %3598 = vrot.lane.b32.xlu0 %v6484_v52, %s4808_s2 }
 0xb59   :  { %v6669_v54 = vpop.permute.xlu1 %3420 }
 0xb5a   :  { %v6671_v20 = vpop.permute.xlu0 %3378 }
 0xb5c   :  { %3634 = vrot.lane.b32.xlu0 %v6429_v9, %s4847_s15 }
 0xb5d   :  { %v6675_v63 = vpop.permute.xlu1 %3428 }
 0xb5e   :  { %v6677_v55 = vpop.permute.xlu0 %3358 }
 0xb60   :  { %3642 = vrot.lane.b32.xlu0 %v6432_v24, %s4847_s15 }
 0xb61   :  { %v6681_v13 = vpop.permute.xlu1 %3436 }
 0xb62   :  { %v6683_v57 = vpop.permute.xlu0 %3366 }
 0xb64   :  { %3650 = vrot.lane.b32.xlu0 %v6439_v27, %s4847_s15 }
 0xb65   :  { %v6687_v53 = vpop.permute.xlu1 %3444 }
 0xb66   :  { %7946 = vst [vmem:[#allocation57_spill] sm:$0xff] %v6687_v53  ;;  %v6689_v18 = vpop.permute.xlu0 %3374 }
 0xb67   :  { %7947 = vst [vmem:[#allocation59_spill] sm:$0xff] %v6689_v18 }
 0xb68   :  { %3658 = vrot.lane.b32.xlu0 %v6447_v62, %s4847_s15 }
 0xb69   :  { %v6693_v43 = vpop.permute.xlu1 %3508 }
 0xb6a   :  { %7948 = vst [vmem:[#allocation60_spill] sm:$0xff] %v6693_v43  ;;  %v6695_v22 = vpop.permute.xlu0 %3382 }
 0xb6b   :  { %7949 = vst [vmem:[#allocation50_spill] sm:$0xff] %v6695_v22 }
 0xb6c   :  { %3638 = vrot.lane.b32.xlu0 %v6457_v11, %s4847_s15 }
 0xb6d   :  { %v6699_v41 = vpop.permute.xlu1 %3516 }
 0xb6e   :  { %7950 = vst [vmem:[#allocation49_spill] sm:$0xff] %v6699_v41  ;;  %v3419_v15 = vpop.permute.xlu0 %3418 }
 0xb70   :  { %3646 = vrot.lane.b32.xlu0 %v6467_v16, %s4847_s15 }
 0xb71   :  { %v6703_v0 = vpop.permute.xlu1 %3524 }
 0xb72   :  { %7951 = vst [vmem:[#allocation51_spill] sm:$0xff] %v6703_v0  ;;  %v3427_v3 = vpop.permute.xlu0 %3426 }
 0xb73   :  { %v6708_v23 = vsel %vm3450_vm4, %v3419_v15, %v3427_v3 }
 0xb74   :  { %7952 = vst [vmem:[#allocation52_spill] sm:$0xff] %v6708_v23  ;;  %3654 = vrot.lane.b32.xlu0 %v6477_v33, %s4847_s15 }
 0xb75   :  { %v6712_v46 = vpop.permute.xlu1 %3532 }
 0xb76   :  { %7953 = vst [vmem:[#allocation65_spill] sm:$0xff] %v6712_v46  ;;  %v3435_v61 = vpop.permute.xlu0 %3434 }
 0xb77   :  { %v6716_v59 = vsel %vm3450_vm4, %v3427_v3, %v3435_v61 }
 0xb78   :  { %7954 = vst [vmem:[#allocation41_spill] sm:$0xff] %v6716_v59  ;;  %3662 = vrot.lane.b32.xlu0 %v6484_v52, %s4847_s15 }
 0xb79   :  { %v3573_v17 = vpop.permute.xlu1 %3572 }
 0xb7a   :  { %v3443_v47 = vpop.permute.xlu0 %3442 }
 0xb7b   :  { %v6722_v40 = vsel %vm3450_vm4, %v3435_v61, %v3443_v47  ;;  %v6726_v44 = vsel %vm3450_vm4, %v3443_v47, %v3419_v15 }
 0xb7c   :  { %7955 = vst [vmem:[#allocation66_spill] sm:$0xff] %v6722_v40  ;;  %7956 = vst [vmem:[#allocation69_spill] sm:$0xff] %v6726_v44  ;;  %3722 = vrot.lane.b32.xlu0 %v6429_v9, %s4812_s7 }
 0xb7d   :  { %v3581_v49 = vpop.permute.xlu1 %3580 }
 0xb7e   :  { %v6732_v3 = vsel %vm426_vm3, %v3573_v17, %v3581_v49  ;;  %v3423_v39 = vpop.permute.xlu0 %3422 }
 0xb80   :  { %3730 = vrot.lane.b32.xlu0 %v6432_v24, %s4812_s7 }
 0xb81   :  { %v3589_v36 = vpop.permute.xlu1 %3588 }
 0xb82   :  { %v6738_v61 = vsel %vm426_vm3, %v3581_v49, %v3589_v36  ;;  %v3431_v37 = vpop.permute.xlu0 %3430 }
 0xb83   :  { %v6742_v47 = vsel %vm3450_vm4, %v3423_v39, %v3431_v37 }
 0xb84   :  { %7957 = vst [vmem:[#allocation43_spill] sm:$0xff] %v6742_v47  ;;  %3738 = vrot.lane.b32.xlu0 %v6439_v27, %s4812_s7 }
 0xb85   :  { %v3597_v15 = vpop.permute.xlu1 %3596 }
 0xb86   :  { %v6748_v46 = vsel %vm426_vm3, %v3589_v36, %v3597_v15  ;;  %v6752_v0 = vsel %vm426_vm3, %v3597_v15, %v3573_v17  ;;  %v3439_v44 = vpop.permute.xlu0 %3438 }
 0xb87   :  { %v6756_v49 = vsel %vm3450_vm4, %v3431_v37, %v3439_v44 }
 0xb88   :  { %7958 = vst [vmem:[#allocation44_spill] sm:$0xff] %v6756_v49  ;;  %v3187_v59 = vpop.f32.mrb[26].mxu0  ;;  %3746 = vrot.lane.b32.xlu0 %v6447_v62, %s4812_s7 }
 0xb89   :  { %v6761_v47 = vadd.f32 %v3187_v59, %v6574_v4  ;;  %v6763_v38 = vpop.f32.mrb[27].mxu0  ;;  %v3637_v36 = vpop.permute.xlu1 %3636 }
 0xb8a   :  { %v3447_v40 = vpop.permute.xlu0 %3446 }
 0xb8b   :  { %7959 = vst [vmem:[#allocation67_spill] sm:$0xff] %v6761_v47  ;;  %v6767_v17 = vsel %vm3450_vm4, %v3439_v44, %v3447_v40  ;;  %v6771_v15 = vsel %vm3450_vm4, %v3447_v40, %v3423_v39  ;;  %3272 = vrot.lane.b32.xlu1 %v6761_v47, %s4845_s22 }
 0xb8c   :  { %7960 = vst [vmem:[#allocation68_spill] sm:$0xff] %v6767_v17  ;;  %7961 = vst [vmem:[#allocation42_spill] sm:$0xff] %v6771_v15  ;;  %v3258_v37 = vpop.f32.mrb[26].mxu1  ;;  %3726 = vrot.lane.b32.xlu0 %v6457_v11, %s4812_s7 }
 0xb8d   :  { %v6779_v59 = vadd.f32 %v3258_v37, %v6574_v4  ;;  %v6781_v49 = vpop.f32.mrb[27].mxu1  ;;  %v3645_v44 = vpop.permute.xlu1 %3644 }
 0xb8e   :  { %v6785_v17 = vsel %vm3666_vm13, %v3637_v36, %v3645_v44  ;;  %v3507_v39 = vpop.permute.xlu0 %3506 }
 0xb8f   :  { %7962 = vst [vmem:[#allocation33_spill] sm:$0xff] %v6779_v59  ;;  %3288 = vrot.lane.b32.xlu1 %v6779_v59, %s4845_s22 }
 0xb90   :  { %3734 = vrot.lane.b32.xlu0 %v6467_v16, %s4812_s7 }
 0xb91   :  { %v3653_v40 = vpop.permute.xlu1 %3652 }
 0xb92   :  { %v6793_v15 = vsel %vm3666_vm13, %v3645_v44, %v3653_v40  ;;  %v3515_v37 = vpop.permute.xlu0 %3514 }
 0xb93   :  { %v6797_v23 = vsel %vm387_vm2, %v3507_v39, %v3515_v37  ;;  %3360 = vrot.lane.b32.xlu1 %v6761_v47, %s4810_s3 }
 0xb94   :  { %7963 = vst [vmem:[#allocation34_spill] sm:$0xff] %v6797_v23  ;;  %3742 = vrot.lane.b32.xlu0 %v6477_v33, %s4812_s7 }
 0xb95   :  { %v3661_v43 = vpop.permute.xlu1 %3660 }
 0xb96   :  { %v6805_v41 = vsel %vm3666_vm13, %v3653_v40, %v3661_v43  ;;  %v6809_v44 = vsel %vm3666_vm13, %v3661_v43, %v3637_v36  ;;  %v3523_v18 = vpop.permute.xlu0 %3522 }
 0xb97   :  { %v6813_v22 = vsel %vm387_vm2, %v3515_v37, %v3523_v18  ;;  %3376 = vrot.lane.b32.xlu1 %v6779_v59, %s4810_s3 }
 0xb98   :  { %7964 = vst [vmem:[#allocation35_spill] sm:$0xff] %v6813_v22  ;;  %3750 = vrot.lane.b32.xlu0 %v6484_v52, %s4812_s7 }
 0xb99   :  { %v3725_v23 = vpop.permute.xlu1 %3724 }
 0xb9a   :  { %v3531_v53 = vpop.permute.xlu0 %3530 }
 0xb9b   :  { %v6821_v40 = vsel %vm387_vm2, %v3523_v18, %v3531_v53  ;;  %v6825_v43 = vsel %vm387_vm2, %v3531_v53, %v3507_v39  ;;  %3424 = vrot.lane.b32.xlu1 %v6761_v47, %s4846_s29 }
 0xb9c   :  { %7965 = vst [vmem:[#allocation36_spill] sm:$0xff] %v6825_v43  ;;  %3786 = vrot.lane.b32.xlu0 %v6429_v9, %s4848_s6 }
 0xb9d   :  { %v3733_v36 = vpop.permute.xlu1 %3732 }
 0xb9e   :  { %v6833_v37 = vsel %vm657_vm6, %v3725_v23, %v3733_v36  ;;  %v3511_v22 = vpop.permute.xlu0 %3510 }
 0xb9f   :  { %7966 = vst [vmem:[#allocation71_spill] sm:$0xff] %v6833_v37  ;;  %3440 = vrot.lane.b32.xlu1 %v6779_v59, %s4846_s29 }
 0xba0   :  { %3794 = vrot.lane.b32.xlu0 %v6432_v24, %s4848_s6 }
 0xba1   :  { %v3741_v53 = vpop.permute.xlu1 %3740 }
 0xba2   :  { %v6841_v18 = vsel %vm657_vm6, %v3733_v36, %v3741_v53  ;;  %v3519_v39 = vpop.permute.xlu0 %3518 }
 0xba3   :  { %7967 = vst [vmem:[#allocation70_spill] sm:$0xff] %v6841_v18  ;;  %v6845_v9 = vsel %vm387_vm2, %v3511_v22, %v3519_v39  ;;  %3512 = vrot.lane.b32.xlu1 %v6761_v47, %s4806_s5 }
 0xba4   :  { %7968 = vst [vmem:[#allocation72_spill] sm:$0xff] %v6845_v9  ;;  %3802 = vrot.lane.b32.xlu0 %v6439_v27, %s4848_s6 }
 0xba5   :  { %v3749_v37 = vpop.permute.xlu1 %3748 }
 0xba6   :  { %v6853_v24 = vsel %vm657_vm6, %v3741_v53, %v3749_v37  ;;  %v6857_v36 = vsel %vm657_vm6, %v3749_v37, %v3725_v23  ;;  %v3527_v18 = vpop.permute.xlu0 %3526 }
 0xba7   :  { %7969 = vst [vmem:[#allocation73_spill] sm:$0xff] %v6853_v24  ;;  %7970 = vst [vmem:[#allocation54_spill] sm:$0xff] %v6857_v36  ;;  %v6861_v43 = vsel %vm387_vm2, %v3519_v39, %v3527_v18  ;;  %3528 = vrot.lane.b32.xlu1 %v6779_v59, %s4806_s5 }
 0xba8   :  { %3810 = vrot.lane.b32.xlu0 %v6447_v62, %s4848_s6 }
 0xba9   :  { %v6867_v27 = vpop.permute.xlu1 %3788 }
 0xbaa   :  { %7971 = vst [vmem:[#allocation53_spill] sm:$0xff] %v6867_v27  ;;  %v3535_v9 = vpop.permute.xlu0 %3534 }
 0xbab   :  { %v6871_v53 = vsel %vm387_vm2, %v3527_v18, %v3535_v9  ;;  %v6875_v23 = vsel %vm387_vm2, %v3535_v9, %v3511_v22  ;;  %3576 = vrot.lane.b32.xlu1 %v6761_v47, %s4808_s2 }
 0xbac   :  { %3790 = vrot.lane.b32.xlu0 %v6457_v11, %s4848_s6 }
 0xbad   :  { %v3797_v37 = vpop.permute.xlu1 %3796 }
 0xbae   :  { %v6885_v39 = vsel %vm3818_vm15, %v6867_v27, %v3797_v37  ;;  %v3571_v18 = vpop.permute.xlu0 %3570  ;;  %v6904_v27 = vmul.f32 %v6732_v3, %v7899_v1  ;;  %v6919_v3 = vmul.f32 %v6738_v61, %v7891_v42  ;;  %v6936_v61 = vmul.f32 %v6748_v46, %v7895_v26 }
 0xbaf   :  { %7972 = vst [vmem:[#allocation55_spill] sm:$0xff] %v6885_v39  ;;  %3592 = vrot.lane.b32.xlu1 %v6779_v59, %s4808_s2  ;;  %v6956_v46 = vadd.f32 %v6763_v38, %v6574_v4 }
 0xbb0   :  { %3798 = vrot.lane.b32.xlu0 %v6467_v16, %s4848_s6  ;;  %7975 = vst [vmem:[#allocation18_spill] sm:$0xff] %v6904_v27  ;;  %7977 = vst [vmem:[#allocation61_spill] sm:$0xff] %v6919_v3  ;;  %v3468_v3 = vld [vmem:[#allocation2 + $0x81] ss:$8 sm:$0xf] }
 0xbb1   :  { %v6891_v9 = vpop.permute.xlu1 %3804  ;;  %7979 = vst [vmem:[#allocation62_spill] sm:$0xff] %v6936_v61 }
 0xbb2   :  { %7973 = vst [vmem:[#allocation56_spill] sm:$0xff] %v6891_v9  ;;  %v6896_v22 = vsel %vm3818_vm15, %v3797_v37, %v6891_v9  ;;  %v3579_v36 = vpop.permute.xlu0 %3578 }
 0xbb3   :  { %7974 = vst [vmem:[#allocation16_spill] sm:$0xff] %v6896_v22  ;;  %v3610_v24 = vsel %vm426_vm3, %v3571_v18, %v3579_v36  ;;  %3640 = vrot.lane.b32.xlu1 %v6761_v47, %s4847_s15 }
 0xbb4   :  { %v6907_v39 = vmul.f32 %v3610_v24, %v7899_v1  ;;  %3806 = vrot.lane.b32.xlu0 %v6477_v33, %s4848_s6 }
 0xbb6   :  { %7976 = vst [vmem:[#allocation17_spill] sm:$0xff] %v6907_v39  ;;  %v3587_v22 = vpop.permute.xlu0 %3586 }
 0xbb7   :  { %v3606_v9 = vsel %vm426_vm3, %v3579_v36, %v3587_v22  ;;  %3656 = vrot.lane.b32.xlu1 %v6779_v59, %s4847_s15 }
 0xbb8   :  { %v6922_v24 = vmul.f32 %v3606_v9, %v7891_v42  ;;  %3814 = vrot.lane.b32.xlu0 %v6484_v52, %s4848_s6  ;;  %v6940_v9 = vmul.f32 %v6752_v0, %v7896_v12  ;;  %v7144_v42 = vrot.slane %v3468_v3, %v5064_v29 }
 0xbba   :  { %7978 = vst [vmem:[#allocation19_spill] sm:$0xff] %v6922_v24  ;;  %v3595_v1 = vpop.permute.xlu0 %3594  ;;  %7980 = vst [vmem:[#allocation63_spill] sm:$0xff] %v6940_v9 }
 0xbbb   :  { %v3602_v36 = vsel %vm426_vm3, %v3587_v22, %v3595_v1  ;;  %v3614_v39 = vsel %vm426_vm3, %v3595_v1, %v3571_v18  ;;  %3728 = vrot.lane.b32.xlu1 %v6761_v47, %s4812_s7 }
 0xbbc   :  { %v6943_v27 = vmul.f32 %v3602_v36, %v7895_v26  ;;  %v6946_v37 = vmul.f32 %v3614_v39, %v7896_v12  ;;  %v6966_v39 = vadd.f32 %v6781_v49, %v6574_v4  ;;  %v3684_v4 = vld [vmem:[#allocation2 + $0x82] ss:$8 sm:$0xf] }
 0xbbe   :  { %7981 = vst [vmem:[#allocation64_spill] sm:$0xff] %v6943_v27  ;;  %7982 = vst [vmem:[#allocation74_spill] sm:$0xff] %v6946_v37  ;;  %v3575_v18 = vpop.permute.xlu0 %3574  ;;  %v7014_v37 = vrot.slane %v3684_v4, %v5070_v32 }
 0xbbf   :  { %3744 = vrot.lane.b32.xlu1 %v6779_v59, %s4812_s7 }
 0xbc0   :  { %7992 = vst [vmem:[#allocation84_spill] sm:$0xff] %v7014_v37 }
 0xbc2   :  { %v3583_v0 = vpop.permute.xlu0 %3582 }
 0xbc3   :  { %v6960_v36 = vsel %vm426_vm3, %v3575_v18, %v3583_v0  ;;  %3280 = vrot.lane.b32.xlu1 %v6956_v46, %s4845_s22 }
 0xbc4   :  { %7983 = vst [vmem:[#allocation75_spill] sm:$0xff] %v6960_v36 }
 0xbc6   :  { %v3591_v1 = vpop.permute.xlu0 %3590 }
 0xbc7   :  { %v6970_v22 = vsel %vm426_vm3, %v3583_v0, %v3591_v1  ;;  %3296 = vrot.lane.b32.xlu1 %v6966_v39, %s4845_s22  ;;  %v6987_v0 = vrot.slane %v3684_v4, %v5064_v29 }
 0xbc8   :  { %7984 = vst [vmem:[#allocation76_spill] sm:$0xff] %v6970_v22  ;;  %v7141_v22 = vrot.slane %v3468_v3, %v5070_v32 }
 0xbc9   :  { %7987 = vst [vmem:[#allocation79_spill] sm:$0xff] %v6987_v0 }
 0xbca   :  { %v3599_v38 = vpop.permute.xlu0 %3598 }
 0xbcb   :  { %v6976_v27 = vsel %vm426_vm3, %v3591_v1, %v3599_v38  ;;  %v6980_v61 = vsel %vm426_vm3, %v3599_v38, %v3575_v18  ;;  %3368 = vrot.lane.b32.xlu1 %v6956_v46, %s4810_s3  ;;  %v6995_v18 = vmul.f32 %v6987_v0, %v6785_v17  ;;  %v6998_v38 = vrot.slane %v3684_v4, %v5068_v31 }
 0xbcc   :  { %7985 = vst [vmem:[#allocation77_spill] sm:$0xff] %v6976_v27  ;;  %7986 = vst [vmem:[#allocation78_spill] sm:$0xff] %v6980_v61 }
 0xbcd   :  { %7988 = vst [vmem:[#allocation80_spill] sm:$0xff] %v6995_v18  ;;  %7989 = vst [vmem:[#allocation81_spill] sm:$0xff] %v6998_v38  ;;  %v7011_v17 = vmul.f32 %v6998_v38, %v6793_v15 }
 0xbce   :  { %v3635_v49 = vpop.permute.xlu0 %3634 }
 0xbcf   :  { %3384 = vrot.lane.b32.xlu1 %v6966_v39, %s4810_s3  ;;  %7991 = vst [vmem:[#allocation83_spill] sm:$0xff] %v7011_v17 }
 0xbd2   :  { %v3643_v12 = vpop.permute.xlu0 %3642 }
 0xbd3   :  { %v3675_v1 = vsel %vm3666_vm13, %v3635_v49, %v3643_v12  ;;  %3432 = vrot.lane.b32.xlu1 %v6956_v46, %s4846_s29 }
 0xbd4   :  { %v7001_v61 = vmul.f32 %v6987_v0, %v3675_v1  ;;  %v7017_v1 = vrot.slane %v3684_v4, %v5066_v30  ;;  %v7032_v4 = vmul.f32 %v7014_v37, %v6805_v41  ;;  %v7062_v41 = vpop.permute.xlu1 %3812 }
 0xbd5   :  { %7999 = vst [vmem:[#allocation91_spill] sm:$0xff] %v7062_v41 }
 0xbd6   :  { %7990 = vst [vmem:[#allocation82_spill] sm:$0xff] %v7001_v61  ;;  %v3651_v26 = vpop.permute.xlu0 %3650  ;;  %7993 = vst [vmem:[#allocation85_spill] sm:$0xff] %v7017_v1 }
 0xbd7   :  { %v3671_v36 = vsel %vm3666_vm13, %v3643_v12, %v3651_v26  ;;  %3448 = vrot.lane.b32.xlu1 %v6966_v39, %s4846_s29  ;;  %7995 = vst [vmem:[#allocation87_spill] sm:$0xff] %v7032_v4 }
 0xbd8   :  { %v7020_v0 = vmul.f32 %v6998_v38, %v3671_v36  ;;  %v7036_v36 = vmul.f32 %v7017_v1, %v6809_v44  ;;  %v3264_v44 = vld [vmem:[%s7681_s12 + $0x8] sm:$0xff] }
 0xbd9   :  { %3946 = vmatprep.mubr.f32.mxu0 %v3264_v44  ;;  %4088 = vmatprep.mubr.f32.mxu1 %v3264_v44 }
 0xbda   :  { %7994 = vst [vmem:[#allocation86_spill] sm:$0xff] %v7020_v0  ;;  %v3659_v27 = vpop.permute.xlu0 %3658  ;;  %7996 = vst [vmem:[#allocation88_spill] sm:$0xff] %v7036_v36 }
 0xbdb   :  { %v3667_v61 = vsel %vm3666_vm13, %v3651_v26, %v3659_v27  ;;  %v3679_v15 = vsel %vm3666_vm13, %v3659_v27, %v3635_v49  ;;  %3520 = vrot.lane.b32.xlu1 %v6956_v46, %s4806_s5  ;;  %v4849_v26 = vmov 14   ;;  %v4850_v27 = vmov 13  }
 0xbdc   :  { %v7039_v18 = vmul.f32 %v7014_v37, %v3667_v61  ;;  %v7042_v12 = vmul.f32 %v7017_v1, %v3679_v15  ;;  %4649 = vset.pattern.permute.xlu0 %v4849_v26  ;;  %4650 = vset.pattern.permute.xlu1 %v4850_v27 }
 0xbde   :  { %7997 = vst [vmem:[#allocation89_spill] sm:$0xff] %v7039_v18  ;;  %7998 = vst [vmem:[#allocation90_spill] sm:$0xff] %v7042_v12  ;;  %v7075_v15 = vpop.permute.xlu0 %3638  ;;  %v4656_v18 = vld [vmem:[%s7682_s13] sm:$0xff] }
 0xbdf   :  { %3536 = vrot.lane.b32.xlu1 %v6966_v39, %s4806_s5  ;;  %8000 = vst [vmem:[#allocation92_spill] sm:$0xff] %v7075_v15  ;;  %369 = vperm.xlu0 %4649, %v4656_v18  }
 0xbe2   :  { %v7086_v4 = vpop.permute.xlu0 %3646 }
 0xbe3   :  { %3792 = vrot.lane.b32.xlu1 %v6761_v47, %s4848_s6  ;;  %8001 = vst [vmem:[#allocation93_spill] sm:$0xff] %v7086_v4  ;;  %4651 = vset.pattern.permute.xlu0 %v4850_v27 }
 0xbe6   :  { %v7092_v26 = vpop.permute.xlu0 %3654 }
 0xbe7   :  { %3808 = vrot.lane.b32.xlu1 %v6779_v59, %s4848_s6  ;;  %8002 = vst [vmem:[#allocation94_spill] sm:$0xff] %v7092_v26 }
 0xbea   :  { %v7096_v36 = vpop.permute.xlu0 %3662 }
 0xbeb   :  { %3584 = vrot.lane.b32.xlu1 %v6956_v46, %s4808_s2  ;;  %8003 = vst [vmem:[#allocation95_spill] sm:$0xff] %v7096_v36 }
 0xbee   :  { %v7102_v38 = vpop.permute.xlu0 %3722 }
 0xbef   :  { %3600 = vrot.lane.b32.xlu1 %v6966_v39, %s4808_s2  ;;  %8004 = vst [vmem:[#allocation96_spill] sm:$0xff] %v7102_v38  ;;  %v3309_v38 = vsel %vm3298_vm0, %v6600_v48, %v6608_v2 }
 0xbf2   :  { %v7106_v4 = vpop.permute.xlu0 %3730 }
 0xbf3   :  { %3648 = vrot.lane.b32.xlu1 %v6956_v46, %s4847_s15  ;;  %8006 = vst [vmem:[#allocation98_spill] sm:$0xff] %v7106_v4  ;;  %v3305_v4 = vsel %vm3298_vm0, %v6608_v2, %v6636_v60  ;;  %v7147_v2 = vrot.slane %v3468_v3, %v5066_v30 }
 0xbf6   :  { %v7112_v9 = vpop.permute.xlu0 %3738 }
 0xbf7   :  { %3664 = vrot.lane.b32.xlu1 %v6966_v39, %s4847_s15  ;;  %8009 = vst [vmem:[#allocation101_spill] sm:$0xff] %v7112_v9  ;;  %v3347_v9 = vmul.f32 %v6590_v45, %v3309_v38  ;;  %v3395_v38 = vsel %vm617_vm5, %v6645_v6, %v6651_v25 }
 0xbfa   :  { %v7116_v24 = vpop.permute.xlu0 %3746 }
 0xbfb   :  { %3736 = vrot.lane.b32.xlu1 %v6956_v46, %s4812_s7  ;;  %8011 = vst [vmem:[#allocation103_spill] sm:$0xff] %v7116_v24 }
 0xbfd   :  { %v7069_v61 = vpop.permute.xlu1 %3272 }
 0xbfe   :  { %v7137_v24 = vpop.permute.xlu0 %3726 }
 0xbff   :  { %3752 = vrot.lane.b32.xlu1 %v6966_v39, %s4812_s7  ;;  %8014 = vst [vmem:[#allocation106_spill] sm:$0xff] %v7137_v24 }
 0xc01   :  { %v7073_v49 = vpop.permute.xlu1 %3288 }
 0xc02   :  { %v7200_v33 = vpop.permute.xlu0 %3734 }
 0xc03   :  { %3800 = vrot.lane.b32.xlu1 %v6956_v46, %s4848_s6  ;;  %8015 = vst [vmem:[#allocation107_spill] sm:$0xff] %v7200_v33 }
 0xc05   :  { %v7079_v44 = vpop.permute.xlu1 %3360 }
 0xc07   :  { %3816 = vrot.lane.b32.xlu1 %v6966_v39, %s4848_s6 }
 0xc09   :  { %v7088_v1 = vpop.permute.xlu1 %3376 }
 0xc0b   :  { %3875 = vperm.xlu1 %4650, %v4656_v18  }
 0xc0d   :  { %v7090_v37 = vpop.permute.xlu1 %3424 }
 0xc11   :  { %v7094_v12 = vpop.permute.xlu1 %3440 }
 0xc15   :  { %v7098_v0 = vpop.permute.xlu1 %3512 }
 0xc19   :  { %v7100_v17 = vpop.permute.xlu1 %3528 }
 0xc1d   :  { %v7104_v15 = vpop.permute.xlu1 %3576 }
 0xc1e   :  { %8005 = vst [vmem:[#allocation97_spill] sm:$0xff] %v7104_v15  ;;  %v3391_v15 = vsel %vm617_vm5, %v6651_v25, %v6657_v19 }
 0xc21   :  { %v7108_v27 = vpop.permute.xlu1 %3592 }
 0xc22   :  { %8007 = vst [vmem:[#allocation99_spill] sm:$0xff] %v7108_v27  ;;  %v3407_v27 = vmul.f32 %v3395_v38, %v7913_v51 }
 0xc25   :  { %v7110_v18 = vpop.permute.xlu1 %3640 }
 0xc26   :  { %8008 = vst [vmem:[#allocation100_spill] sm:$0xff] %v7110_v18  ;;  %v3313_v18 = vsel %vm3298_vm0, %v6647_v56, %v6600_v48  ;;  %v3348_v48 = vmul.f32 %v6621_v35, %v3305_v4  ;;  %v3390_v4 = vsel %vm617_vm5, %v6659_v8, %v6665_v7 }
 0xc27   :  { %v3346_v24 = vmul.f32 %v6611_v10, %v3313_v18  ;;  %v3404_v59 = vmul.f32 %v3390_v4, %v7914_v34 }
 0xc29   :  { %v7114_v26 = vpop.permute.xlu1 %3656 }
 0xc2a   :  { %8010 = vst [vmem:[#allocation102_spill] sm:$0xff] %v7114_v26 }
 0xc2d   :  { %v7118_v36 = vpop.permute.xlu1 %3728 }
 0xc2e   :  { %8012 = vst [vmem:[#allocation104_spill] sm:$0xff] %v7118_v36  ;;  %v7135_v36 = vrot.slane %v3468_v3, %v5068_v31  ;;  %v3394_v3 = vsel %vm617_vm5, %v6653_v50, %v6659_v8  ;;  %v3387_v8 = vsel %vm617_vm5, %v6657_v19, %v6663_v21 }
 0xc2f   :  { %v3403_v19 = vmul.f32 %v3394_v3, %v7913_v51  ;;  %v3409_v47 = vmul.f32 %v3387_v8, %v7916_v5 }
 0xc31   :  { %v7132_v26 = vpop.permute.xlu1 %3744  ;;  %v4429_v8 = vpack.c.bf16 %v3407_v27, %v3403_v19  ;;  %v8018_v19 = vld [vmem:[#allocation59_spill] sm:$0xff] }
 0xc32   :  { %8013 = vst [vmem:[#allocation105_spill] sm:$0xff] %v7132_v26  ;;  %v3301_v26 = vsel %vm3298_vm0, %v6636_v60, %v6647_v56  ;;  %v3386_v60 = vsel %vm617_vm5, %v6665_v7, %v6671_v20  ;;  %v3398_v56 = vsel %vm617_vm5, %v6671_v20, %v6653_v50  ;;  %v3399_v7 = vsel %vm617_vm5, %v6663_v21, %v6645_v6 }
 0xc33   :  { %v3349_v20 = vmul.f32 %v6614_v58, %v3301_v26  ;;  %v3402_v6 = vmul.f32 %v3398_v56, %v7915_v14  ;;  %v3405_v21 = vmul.f32 %v3386_v60, %v7916_v5  ;;  %v3408_v26 = vmul.f32 %v3391_v15, %v7914_v34 }
 0xc34   :  { %v3406_v38 = vmul.f32 %v3399_v7, %v7915_v14 }
 0xc35   :  { %v3281_v18 = vpop.permute.xlu1 %3280  ;;  %v4501_v7 = vpack.c.bf16 %v3409_v47, %v3405_v21  ;;  %v8020_v21 = vld [vmem:[#allocation60_spill] sm:$0xff] }
 0xc36   :  { %v3310_v50 = vsel %vm3298_vm0, %v7069_v61, %v3281_v18  ;;  %v3306_v25 = vsel %vm3298_vm0, %v3281_v18, %v7073_v49  ;;  %v4431_v56 = vpack.c.bf16 %v3406_v38, %v3402_v6  ;;  %v8021_v38 = vld [vmem:[#allocation52_spill] sm:$0xff] }
 0xc37   :  { %v3351_v41 = vmul.f32 %v6590_v45, %v3310_v50  ;;  %v3460_v45 = vsel %vm3450_vm4, %v6669_v54, %v6675_v63  ;;  %v3352_v3 = vmul.f32 %v6621_v35, %v3306_v25 }
 0xc39   :  { %v3297_v11 = vpop.permute.xlu1 %3296  ;;  %v4425_v18 = vpack.c.bf16 %v3351_v41, %v3347_v9  ;;  %v3456_v9 = vsel %vm3450_vm4, %v6675_v63, %v6681_v13  ;;  %v3396_v41 = vsel %vm617_vm5, %v6677_v55, %v6683_v57 }
 0xc3a   :  { %v3302_v4 = vsel %vm3298_vm0, %v7073_v49, %v3297_v11  ;;  %v3314_v15 = vsel %vm3298_vm0, %v3297_v11, %v7069_v61  ;;  %v4503_v49 = vpack.c.bf16 %v3408_v26, %v3404_v59  ;;  %v3495_v11 = vmul.f32 %v7135_v36, %v3460_v45  ;;  %v8016_v61 = vld [vmem:[#allocation57_spill] sm:$0xff] }
 0xc3b   :  { %v3350_v35 = vmul.f32 %v6611_v10, %v3314_v15  ;;  %v3353_v60 = vmul.f32 %v6614_v58, %v3302_v4  ;;  %4426 = vmatprep.subr.bf16.mxu0 %v4425_v18  ;;  %v3464_v63 = vsel %vm3450_vm4, %v8016_v61, %v6669_v54  ;;  %v7232_v30 = vmul.f32 %v7141_v22, %v3456_v9  ;;  %v7235_v58 = vpop.permute.xlu0 %3742  ;;  %v8022_v4 = vld [vmem:[#allocation66_spill] sm:$0xff] }
 0xc3c   :  { %v3411_v10 = vmul.f32 %v3396_v41, %v7913_v51  ;;  %v4499_v59 = vpack.c.bf16 %v3352_v3, %v3348_v48  ;;  %v3452_v54 = vsel %vm3450_vm4, %v6681_v13, %v8016_v61  ;;  %v8017_v48 = vld [vmem:[#allocation50_spill] sm:$0xff]  ;;  %v3491_v18 = vmul.f32 %v7135_v36, %v8021_v38 }
 0xc3d   :  { %v4427_v50 = vpack.c.bf16 %v3350_v35, %v3346_v24  ;;  %v3369_v25 = vpop.permute.xlu1 %3368  ;;  %v4497_v33 = vpack.c.bf16 %v3353_v60, %v3349_v20  ;;  %v3494_v20 = vmul.f32 %v7144_v42, %v3464_v63  ;;  %v3388_v6 = vsel %vm617_vm5, %v8018_v19, %v8017_v48  ;;  %v8023_v63 = vld [vmem:[#allocation23_spill] sm:$0xff] }
 0xc3e   :  { %v3397_v47 = vsel %vm617_vm5, %v7079_v44, %v3369_v25  ;;  %v3393_v24 = vsel %vm617_vm5, %v3369_v25, %v7088_v1  ;;  %v3400_v13 = vsel %vm617_vm5, %v8017_v48, %v6677_v55  ;;  %v3493_v55 = vmul.f32 %v7147_v2, %v8022_v4  ;;  %v8030_v4 = vld [vmem:[#allocation22_spill] sm:$0xff] }
 0xc3f   :  { %v3415_v27 = vmul.f32 %v3397_v47, %v7913_v51  ;;  %4428 = vmatpush1.bf16.msra.mxu0 %v4427_v50  ;;  %4498 = vmatprep.subr.bf16.mxu1 %v4497_v33  ;;  %v3392_v51 = vsel %vm617_vm5, %v6683_v57, %v8018_v19  ;;  %v8019_v33 = vld [vmem:[#allocation49_spill] sm:$0xff]  ;;  %v3416_v15 = vmul.f32 %v3393_v24, %v7914_v34 }
 0xc40   :  { %4430 = vmatprep.subr.bf16.mxu0 %v4429_v8  ;;  %4500 = vmatpush1.bf16.msra.mxu1 %v4499_v59  ;;  %v3547_v26 = vsel %vm387_vm2, %v8020_v21, %v8019_v33  ;;  %v3410_v41 = vmul.f32 %v3400_v13, %v7915_v14  ;;  %v3413_v35 = vmul.f32 %v3388_v6, %v7916_v5  ;;  %v8027_v6 = vld [vmem:[#allocation51_spill] sm:$0xff] }
 0xc41   :  { %4502 = vmatprep.subr.bf16.mxu1 %v4501_v7  ;;  %v3385_v45 = vpop.permute.xlu1 %3384  ;;  %v4433_v3 = vpack.c.bf16 %v3415_v27, %v3411_v10  ;;  %v3497_v7 = vmul.f32 %v7147_v2, %v3452_v54  ;;  %v3412_v61 = vmul.f32 %v3392_v51, %v7914_v34  ;;  %v3559_v50 = vmul.f32 %v3547_v26, %v8023_v63  ;;  %v8025_v10 = vld [vmem:[#allocation69_spill] sm:$0xff]  ;;  %v8026_v27 = vld [vmem:[#allocation43_spill] sm:$0xff] }
 0xc42   :  { %v3389_v57 = vsel %vm617_vm5, %v7088_v1, %v3385_v45  ;;  %v3401_v9 = vsel %vm617_vm5, %v3385_v45, %v7079_v44  ;;  %v7283_v1 = vpop.permute.xlu0 %3750  ;;  %v8024_v44 = vld [vmem:[#allocation41_spill] sm:$0xff]  ;;  %v3490_v59 = vmul.f32 %v7144_v42, %v8025_v10  ;;  %v4437_v54 = vpack.c.bf16 %v3495_v11, %v3491_v18  ;;  %v8029_v18 = vld [vmem:[#allocation34_spill] sm:$0xff] }
 0xc43   :  { %v3414_v60 = vmul.f32 %v3401_v9, %v7915_v14  ;;  %v3417_v8 = vmul.f32 %v3389_v57, %v7916_v5  ;;  %4432 = vmatpush1.bf16.msra.mxu0 %v4431_v56  ;;  %v3492_v25 = vmul.f32 %v7141_v22, %v8024_v44  ;;  %v4507_v56 = vpack.c.bf16 %v3416_v15, %v3412_v61  ;;  %v8028_v51 = vld [vmem:[#allocation65_spill] sm:$0xff] }
 0xc44   :  { %4434 = vmatprep.subr.bf16.mxu0 %v4433_v3  ;;  %4504 = vmatpush1.bf16.msra.mxu1 %v4503_v49  ;;  %v4509_v24 = vpack.c.bf16 %v3497_v7, %v3493_v55  ;;  %v3499_v48 = vmul.f32 %v7135_v36, %v8026_v27  ;;  %v3543_v13 = vsel %vm387_vm2, %v8019_v33, %v8027_v6 }
 0xc45   :  { %v4435_v14 = vpack.c.bf16 %v3414_v60, %v3410_v41  ;;  %v3433_v47 = vpop.permute.xlu1 %3432  ;;  %v4505_v5 = vpack.c.bf16 %v3417_v8, %v3413_v35  ;;  %v3539_v11 = vsel %vm387_vm2, %v8027_v6, %v8028_v51  ;;  %v3551_v26 = vsel %vm387_vm2, %v8028_v51, %v8020_v21  ;;  %v8032_v41 = vld [vmem:[#allocation68_spill] sm:$0xff]  ;;  %v8033_v8 = vld [vmem:[#allocation21_spill] sm:$0xff] }
 0xc46   :  { %v3462_v34 = vsel %vm3450_vm4, %v7090_v37, %v3433_v47  ;;  %v3458_v49 = vsel %vm3450_vm4, %v3433_v47, %v7094_v12  ;;  %v4439_v38 = vpack.c.bf16 %v3494_v20, %v3490_v59  ;;  %v3555_v45 = vmul.f32 %v8029_v18, %v8023_v63  ;;  %v7315_v15 = vpop.permute.xlu0 %3786  ;;  %v8031_v20 = vld [vmem:[#allocation42_spill] sm:$0xff] }
 0xc47   :  { %v3503_v19 = vmul.f32 %v7135_v36, %v3462_v34  ;;  %4436 = vmatpush1.bf16.msra.mxu0 %v4435_v14  ;;  %4506 = vmatprep.subr.bf16.mxu1 %v4505_v5  ;;  %v4511_v36 = vpack.c.bf16 %v7232_v30, %v3492_v25  ;;  %v3557_v55 = vmul.f32 %v6821_v40, %v8030_v4  ;;  %v8037_v5 = vld [vmem:[#allocation35_spill] sm:$0xff] }
 0xc48   :  { %4438 = vmatprep.subr.bf16.mxu0 %v4437_v54  ;;  %4508 = vmatpush1.bf16.msra.mxu1 %v4507_v56  ;;  %v3504_v57 = vmul.f32 %v7141_v22, %v3458_v49  ;;  %v3498_v9 = vmul.f32 %v7144_v42, %v8031_v20  ;;  %v3501_v35 = vmul.f32 %v7147_v2, %v8032_v41  ;;  %v8043_v41 = vld [vmem:[#allocation46_spill] sm:$0xff] }
 0xc49   :  { %4510 = vmatprep.subr.bf16.mxu1 %v4509_v24  ;;  %v3449_v33 = vpop.permute.xlu1 %3448  ;;  %v4441_v3 = vpack.c.bf16 %v3503_v19, %v3499_v48  ;;  %v3558_v7 = vmul.f32 %v3551_v26, %v8033_v8  ;;  %v3561_v61 = vmul.f32 %v3539_v11, %v8030_v4  ;;  %v4445_v47 = vpack.c.bf16 %v3559_v50, %v3555_v45 }
 0xc4a   :  { %v3454_v21 = vsel %vm3450_vm4, %v7094_v12, %v3449_v33  ;;  %v3466_v30 = vsel %vm3450_vm4, %v3449_v33, %v7090_v37  ;;  %v8034_v12 = vld [vmem:[#allocation44_spill] sm:$0xff]  ;;  %v7348_v49 = vpop.permute.xlu0 %3794 }
 0xc4b   :  { %v3502_v40 = vmul.f32 %v7144_v42, %v3466_v30  ;;  %v3505_v60 = vmul.f32 %v7147_v2, %v3454_v21  ;;  %4440 = vmatpush1.bf16.msra.mxu0 %v4439_v38  ;;  %v3500_v44 = vmul.f32 %v7141_v22, %v8034_v12  ;;  %v8035_v37 = vld [vmem:[#allocation36_spill] sm:$0xff]  ;;  %v4517_v54 = vpack.c.bf16 %v3561_v61, %v3557_v55  ;;  %v8040_v21 = vld [vmem:[#allocation47_spill] sm:$0xff] }
 0xc4c   :  { %4442 = vmatprep.subr.bf16.mxu0 %v4441_v3  ;;  %4512 = vmatpush1.bf16.msra.mxu1 %v4511_v36  ;;  %v3554_v25 = vmul.f32 %v8035_v37, %v8033_v8  ;;  %v8036_v42 = vld [vmem:[#allocation24_spill] sm:$0xff]  ;;  %v3565_v38 = vmul.f32 %v6871_v53, %v8030_v4  ;;  %v4529_v61 = vpack.c.bf16 %v6966_v39, %v6484_v52  ;;  %v8048_v52 = vld [vmem:[#allocation67_spill] sm:$0xff] }
 0xc4d   :  { %v4443_v10 = vpack.c.bf16 %v3502_v40, %v3498_v9  ;;  %v3521_v59 = vpop.permute.xlu1 %3520  ;;  %v4513_v14 = vpack.c.bf16 %v3505_v60, %v3501_v35  ;;  %v3556_v2 = vmul.f32 %v8037_v5, %v8036_v42  ;;  %v4515_v56 = vpack.c.bf16 %v3504_v57, %v3500_v44  ;;  %v8038_v22 = vld [vmem:[#allocation72_spill] sm:$0xff]  ;;  %v8042_v9 = vld [vmem:[#allocation31_spill] sm:$0xff]  ;;  %v8044_v60 = vld [vmem:[#allocation45_spill] sm:$0xff] }
 0xc4e   :  { %v3549_v34 = vsel %vm387_vm2, %v7098_v0, %v3521_v59  ;;  %v3563_v24 = vmul.f32 %v8038_v22, %v8023_v63  ;;  %v3545_v27 = vsel %vm387_vm2, %v3521_v59, %v7100_v17  ;;  %v3560_v50 = vmul.f32 %v3543_v13, %v8036_v42  ;;  %v7367_v55 = vpop.permute.xlu0 %3802  ;;  %v8039_v57 = vld [vmem:[#allocation32_spill] sm:$0xff]  ;;  %v8050_v59 = vld [vmem:[#allocation33_spill] sm:$0xff]  ;;  %v8053_v5 = vld [vmem:[#allocation91_spill] sm:$0xff] }
 0xc4f   :  { %v3567_v48 = vmul.f32 %v3549_v34, %v8023_v63  ;;  %4444 = vmatpush1.bf16.msra.mxu0 %v4443_v10  ;;  %4514 = vmatprep.subr.bf16.mxu1 %v4513_v14  ;;  %v4447_v19 = vpack.c.bf16 %v3558_v7, %v3554_v25  ;;  %v3568_v26 = vmul.f32 %v3545_v27, %v8036_v42  ;;  %v8047_v10 = vld [vmem:[#allocation48_spill] sm:$0xff]  ;;  %v8058_v27 = vld [vmem:[#allocation70_spill] sm:$0xff] }
 0xc50   :  { %4446 = vmatprep.subr.bf16.mxu0 %v4445_v47  ;;  %4516 = vmatpush1.bf16.msra.mxu1 %v4515_v56  ;;  %v4519_v11 = vpack.c.bf16 %v3560_v50, %v3556_v2  ;;  %v3562_v13 = vmul.f32 %v6875_v23, %v8033_v8  ;;  %v3564_v33 = vmul.f32 %v6861_v43, %v8036_v42  ;;  %v3836_v43 = vld [vmem:[#allocation2 + $0x83] ss:$8 sm:$0xf] }
 0xc51   :  { %4518 = vmatprep.subr.bf16.mxu1 %v4517_v54  ;;  %v3537_v6 = vpop.permute.xlu1 %3536  ;;  %v4449_v51 = vpack.c.bf16 %v3567_v48, %v3563_v24  ;;  %v4453_v53 = vpack.c.bf16 %v8040_v21, %v8039_v57  ;;  %v4455_v35 = vpack.c.bf16 %v8043_v41, %v8042_v9  ;;  %v4457_v40 = vpack.c.bf16 %v6956_v46, %v6467_v16  ;;  %v8046_v16 = vld [vmem:[#allocation20_spill] sm:$0xff]  ;;  %v8052_v47 = vld [vmem:[#allocation71_spill] sm:$0xff]  ;;  %v8056_v54 = vld [vmem:[#allocation97_spill] sm:$0xff] }
 0xc52   :  { %v3541_v36 = vsel %vm387_vm2, %v7100_v17, %v3537_v6  ;;  %v3553_v63 = vsel %vm387_vm2, %v3537_v6, %v7098_v0  ;;  %v4523_v23 = vpack.c.bf16 %v3568_v26, %v3564_v33  ;;  %v7387_v12 = vrot.slane %v3836_v43, %v5068_v31  ;;  %v7389_v44 = vpop.permute.xlu0 %3810  ;;  %v8051_v31 = vld [vmem:[#allocation38_spill] sm:$0xff]  ;;  %v8054_v2 = vld [vmem:[#allocation56_spill] sm:$0xff]  ;;  %v8055_v56 = vld [vmem:[#allocation99_spill] sm:$0xff] }
 0xc53   :  { %v3566_v18 = vmul.f32 %v3553_v63, %v8033_v8  ;;  %v3569_v45 = vmul.f32 %v3541_v36, %v8030_v4  ;;  %4448 = vmatpush1.bf16.msra.mxu0 %v4447_v19  ;;  %v8041_v4 = vld [vmem:[#allocation30_spill] sm:$0xff]  ;;  %v8045_v8 = vld [vmem:[#allocation29_spill] sm:$0xff]  ;;  %v7392_v37 = vrot.slane %v3836_v43, %v5070_v32  ;;  %v7395_v46 = vrot.slane %v3836_v43, %v8046_v16  ;;  %v8059_v50 = vld [vmem:[#allocation39_spill] sm:$0xff] }
 0xc54   :  { %4450 = vmatprep.subr.bf16.mxu0 %v4449_v51  ;;  %4520 = vmatpush1.bf16.msra.mxu1 %v4519_v11  ;;  %v4525_v30 = vpack.c.bf16 %v8041_v4, %v6447_v62  ;;  %v4527_v7 = vpack.c.bf16 %v8045_v8, %v8044_v60  ;;  %v7384_v62 = vrot.slane %v3836_v43, %v5064_v29  ;;  %v8049_v29 = vld [vmem:[#allocation58_spill] sm:$0xff]  ;;  %v8057_v24 = vld [vmem:[#allocation37_spill] sm:$0xff]  ;;  %v8062_v11 = vld [vmem:[#allocation76_spill] sm:$0xff]  ;;  %vm3878_vm2 = vcmask 261120  }
 0xc55   :  { %v4451_v17 = vpack.c.bf16 %v3566_v18, %v3562_v13  ;;  %v7365_v3 = vpop.permute.xlu1 %3792  ;;  %v4521_v0 = vpack.c.bf16 %v3569_v45, %v3565_v38  ;;  %v4459_v39 = vpack.c.bf16 %v8048_v52, %v8047_v10  ;;  %v4531_v14 = vpack.c.bf16 %v8050_v59, %v8049_v29  ;;  %v8060_v19 = vld [vmem:[#allocation73_spill] sm:$0xff]  ;;  %v8061_v51 = vld [vmem:[#allocation26_spill] sm:$0xff]  ;;  %v8063_v63 = vld [vmem:[#allocation40_spill] sm:$0xff] }
 0xc56   :  { %v7403_v42 = vmul.f32 %v8052_v47, %v8051_v31  ;;  %v3820_v32 = vsel %vm3818_vm15, %v8054_v2, %v8053_v5  ;;  %v7417_v48 = vmul.f32 %v8058_v27, %v8057_v24  ;;  %v7421_v6 = vmul.f32 %v8060_v19, %v8059_v50  ;;  %v8064_v13 = vld [vmem:[#allocation54_spill] sm:$0xff]  ;;  %v8065_v18 = vld [vmem:[#allocation55_spill] sm:$0xff]  ;;  %v8066_v33 = vld [vmem:[#allocation16_spill] sm:$0xff]  ;;  %v7456_v10 = vpop.permute.xlu0 %3790 }
 0xc57   :  { %4452 = vmatpush1.bf16.msra.mxu0 %v4451_v17  ;;  %4522 = vmatprep.subr.bf16.mxu1 %v4521_v0  ;;  %v3627_v26 = vmul.f32 %v8062_v11, %v8061_v51  ;;  %v7428_v38 = vmul.f32 %v8064_v13, %v8063_v63  ;;  %v7432_v45 = vmul.f32 %v7384_v62, %v8065_v18  ;;  %v8067_v0 = vld [vmem:[#allocation61_spill] sm:$0xff]  ;;  %v8072_v9 = vld [vmem:[#allocation63_spill] sm:$0xff]  ;;  %v8073_v41 = vld [vmem:[#allocation74_spill] sm:$0xff] }
 0xc58   :  { %4454 = vmatprep.subr.bf16.mxu0 %v4453_v53  ;;  %4524 = vmatpush1.bf16.msra.mxu1 %v4523_v23  ;;  %v7436_v17 = vmul.f32 %v7387_v12, %v8066_v33  ;;  %v8068_v23 = vld [vmem:[#allocation19_spill] sm:$0xff]  ;;  %v8070_v21 = vld [vmem:[#allocation53_spill] sm:$0xff]  ;;  %v7446_v4 = vmul.f32 %v7392_v37, %v3820_v32  ;;  %v8079_v59 = vld [vmem:[#allocation78_spill] sm:$0xff] }
 0xc59   :  { %4526 = vmatprep.subr.bf16.mxu1 %v4525_v30  ;;  %v7373_v20 = vpop.permute.xlu1 %3808  ;;  %v8069_v57 = vpack.c.bf16 %v8067_v0, %v8068_v23  ;;  %v3832_v53 = vsel %vm3818_vm15, %v8053_v5, %v8070_v21  ;;  %v8071_v30 = vld [vmem:[#allocation28_spill] sm:$0xff]  ;;  %v8075_v8 = vld [vmem:[#allocation75_spill] sm:$0xff]  ;;  %v8077_v16 = vld [vmem:[#allocation77_spill] sm:$0xff] }
 0xc5a   :  { %v8078_v29 = vld [vmem:[#allocation27_spill] sm:$0xff]  ;;  %v8080_v47 = vld [vmem:[#allocation94_spill] sm:$0xff]  ;;  %v8081_v5 = vld [vmem:[#allocation93_spill] sm:$0xff] }
 0xc5b   :  { %4456 = vmatpush1.bf16.msra.mxu0 %v4455_v35  ;;  %v8074_v35 = vpack.c.bf16 %v8072_v9, %v8073_v41  ;;  %v3673_v2 = vsel %vm3666_vm13, %v8081_v5, %v8080_v47  ;;  %v8083_v27 = vld [vmem:[#allocation17_spill] sm:$0xff]  ;;  %v8087_v11 = vld [vmem:[#allocation96_spill] sm:$0xff]  ;;  %v8089_v18 = vld [vmem:[#allocation62_spill] sm:$0xff] }
 0xc5c   :  { %4458 = vmatprep.subr.bf16.mxu0 %v4457_v40  ;;  %4528 = vmatpush1.bf16.msra.mxu1 %v4527_v7  ;;  %v3626_v7 = vmul.f32 %v8075_v8, %v8071_v30  ;;  %v8090_v33 = vld [vmem:[#allocation64_spill] sm:$0xff]  ;;  %v8092_v23 = vld [vmem:[#allocation103_spill] sm:$0xff] }
 0xc5d   :  { %4530 = vmatprep.subr.bf16.mxu1 %v4529_v61  ;;  %v3585_v25 = vpop.permute.xlu1 %3584  ;;  %v8076_v61 = vld [vmem:[#allocation25_spill] sm:$0xff]  ;;  %v8091_v0 = vpack.c.bf16 %v8089_v18, %v8090_v33  ;;  %v8094_v8 = vld [vmem:[#allocation95_spill] sm:$0xff] }
 0xc5e   :  { %v3609_v34 = vsel %vm426_vm3, %v3585_v25, %v8055_v56  ;;  %v3613_v22 = vsel %vm426_vm3, %v8056_v54, %v3585_v25  ;;  %v3628_v25 = vmul.f32 %v8077_v16, %v8076_v61 }
 0xc5f   :  { %v3631_v36 = vmul.f32 %v3609_v34, %v8061_v51  ;;  %4460 = vmatpush1.bf16.msra.mxu0 %v4459_v39  ;;  %v3630_v43 = vmul.f32 %v3613_v22, %v8071_v30  ;;  %v8082_v22 = vld [vmem:[#allocation18_spill] sm:$0xff] }
 0xc60   :  { %4462 = vmatprep.subr.bf16.mxu0 %v8069_v57  ;;  %4532 = vmatpush1.bf16.msra.mxu1 %v4531_v14  ;;  %v3629_v14 = vmul.f32 %v8079_v59, %v8078_v29  ;;  %v8084_v19 = vpack.c.bf16 %v8082_v22, %v8083_v27  ;;  %v8086_v51 = vld [vmem:[#allocation98_spill] sm:$0xff]  ;;  %v8100_v22 = vld [vmem:[#allocation79_spill] sm:$0xff] }
 0xc61   :  { %4534 = vmatprep.subr.bf16.mxu1 %v8074_v35  ;;  %v3601_v40 = vpop.permute.xlu1 %3600  ;;  %v4465_v60 = vpack.c.bf16 %v3631_v36, %v3627_v26  ;;  %v3762_v26 = vsel %vm657_vm6, %v8087_v11, %v8086_v51  ;;  %v8088_v36 = vld [vmem:[#allocation101_spill] sm:$0xff]  ;;  %v4467_v21 = vpack.c.bf16 %v3630_v43, %v3626_v7  ;;  %v3766_v7 = vsel %vm657_vm6, %v8092_v23, %v8087_v11 }
 0xc62   :  { %v3605_v52 = vsel %vm426_vm3, %v8055_v56, %v3601_v40  ;;  %v3617_v39 = vsel %vm426_vm3, %v3601_v40, %v8056_v54  ;;  %v8085_v56 = vld [vmem:[#allocation92_spill] sm:$0xff]  ;;  %v3758_v13 = vsel %vm657_vm6, %v8086_v51, %v8088_v36  ;;  %v3754_v57 = vsel %vm657_vm6, %v8088_v36, %v8092_v23  ;;  %v8093_v35 = vld [vmem:[#allocation81_spill] sm:$0xff]  ;;  %v8102_v51 = vld [vmem:[#allocation90_spill] sm:$0xff] }
 0xc63   :  { %v3632_v32 = vmul.f32 %v3605_v52, %v8076_v61  ;;  %v3633_v34 = vmul.f32 %v3617_v39, %v8078_v29  ;;  %4464 = vmatpush1.bf16.msra.mxu0 %v8084_v19  ;;  %v3677_v54 = vsel %vm3666_vm13, %v8085_v56, %v8081_v5  ;;  %v3715_v40 = vmul.f32 %v8093_v35, %v3673_v2  ;;  %v8095_v61 = vld [vmem:[#allocation102_spill] sm:$0xff]  ;;  %v8096_v52 = vld [vmem:[#allocation100_spill] sm:$0xff]  ;;  %v8097_v5 = vld [vmem:[#allocation83_spill] sm:$0xff] }
 0xc64   :  { %4466 = vmatprep.subr.bf16.mxu0 %v4465_v60  ;;  %4536 = vmatpush1.bf16.msra.mxu1 %v8091_v0  ;;  %v3669_v60 = vsel %vm3666_vm13, %v8080_v47, %v8094_v8  ;;  %v7506_v43 = vmul.f32 %v3762_v26, %v8051_v31  ;;  %v3681_v29 = vsel %vm3666_vm13, %v8094_v8, %v8085_v56  ;;  %v7521_v47 = vpop.permute.xlu0 %3798  ;;  %v8098_v2 = vld [vmem:[#allocation86_spill] sm:$0xff]  ;;  %v8101_v56 = vld [vmem:[#allocation88_spill] sm:$0xff]  ;;  %v8109_v8 = vld [vmem:[#allocation107_spill] sm:$0xff] }
 0xc65   :  { %v4539_v30 = vpack.c.bf16 %v3632_v32, %v3628_v25  ;;  %v3649_v9 = vpop.permute.xlu1 %3648  ;;  %v4537_v41 = vpack.c.bf16 %v3633_v34, %v3629_v14  ;;  %v3771_v59 = vmul.f32 %v3758_v13, %v8057_v24  ;;  %v7519_v14 = vmul.f32 %v3754_v57, %v8059_v50  ;;  %v8104_v13 = vld [vmem:[#allocation84_spill] sm:$0xff] }
 0xc66   :  { %v3674_v16 = vsel %vm3666_vm13, %v3649_v9, %v8095_v61  ;;  %v3678_v39 = vsel %vm3666_vm13, %v8096_v52, %v3649_v9  ;;  %v8099_v32 = vpack.c.bf16 %v8097_v5, %v8098_v2  ;;  %v7527_v34 = vmul.f32 %v7395_v46, %v3832_v53  ;;  %v8106_v9 = vld [vmem:[#allocation80_spill] sm:$0xff]  ;;  %v8114_v2 = vld [vmem:[#allocation105_spill] sm:$0xff] }
 0xc67   :  { %v3719_v25 = vmul.f32 %v8093_v35, %v3674_v16  ;;  %4468 = vmatpush1.bf16.msra.mxu0 %v4467_v21  ;;  %4538 = vmatprep.subr.bf16.mxu1 %v4537_v41  ;;  %v3714_v27 = vmul.f32 %v8100_v22, %v3677_v54  ;;  %v3718_v19 = vmul.f32 %v8100_v22, %v3678_v39  ;;  %v8105_v54 = vld [vmem:[#allocation85_spill] sm:$0xff]  ;;  %v8107_v41 = vld [vmem:[#allocation82_spill] sm:$0xff] }
 0xc68   :  { %4470 = vmatprep.subr.bf16.mxu0 %v8099_v32  ;;  %4540 = vmatpush1.bf16.msra.mxu1 %v4539_v30  ;;  %v8103_v11 = vpack.c.bf16 %v8101_v56, %v8102_v51  ;;  %v3716_v18 = vmul.f32 %v8104_v13, %v3669_v60  ;;  %v3773_v33 = vmul.f32 %v3766_v7, %v8063_v63  ;;  %v8111_v16 = vld [vmem:[#allocation89_spill] sm:$0xff]  ;;  %v3807_v5 = vpop.permute.xlu0 %3806 }
 0xc69   :  { %v3665_v26 = vpop.permute.xlu1 %3664  ;;  %v4473_v36 = vpack.c.bf16 %v3719_v25, %v3715_v40  ;;  %v3717_v23 = vmul.f32 %v8105_v54, %v3681_v29  ;;  %v4479_v57 = vpack.c.bf16 %v7403_v42, %v7506_v43  ;;  %v8108_v35 = vpack.c.bf16 %v8106_v9, %v8107_v41  ;;  %v8113_v29 = vld [vmem:[#allocation106_spill] sm:$0xff] }
 0xc6a   :  { %4542 = vmatprep.subr.bf16.mxu1 %v8103_v11  ;;  %v3670_v0 = vsel %vm3666_vm13, %v8095_v61, %v3665_v26  ;;  %v3682_v53 = vsel %vm3666_vm13, %v3665_v26, %v8096_v52  ;;  %v4551_v40 = vpack.c.bf16 %v7421_v6, %v7519_v14  ;;  %v3760_v60 = vsel %vm657_vm6, %v8109_v8, %v7235_v58  ;;  %v8110_v61 = vld [vmem:[#allocation87_spill] sm:$0xff] }
 0xc6b   :  { %v3720_v21 = vmul.f32 %v8104_v13, %v3670_v0  ;;  %v3721_v30 = vmul.f32 %v8105_v54, %v3682_v53  ;;  %4472 = vmatpush1.bf16.msra.mxu0 %v8108_v35  ;;  %v8112_v42 = vpack.c.bf16 %v8110_v61, %v8111_v16  ;;  %v4477_v52 = vpack.c.bf16 %v7417_v48, %v3771_v59  ;;  %v8115_v48 = vld [vmem:[#allocation104_spill] sm:$0xff] }
 0xc6c   :  { %4474 = vmatprep.subr.bf16.mxu0 %v4473_v36  ;;  %v3823_v39 = vsel %vm3818_vm15, %v7348_v49, %v7367_v55  ;;  %v4475_v43 = vpack.c.bf16 %v3718_v19, %v3714_v27  ;;  %v3764_v14 = vsel %vm657_vm6, %v8113_v29, %v8109_v8  ;;  %v4549_v22 = vpack.c.bf16 %v7428_v38, %v3773_v33  ;;  %v3815_v54 = vpop.permute.xlu0 %3814 }
 0xc6d   :  { %4544 = vmatpush1.bf16.msra.mxu1 %v8112_v42  ;;  %v4547_v7 = vpack.c.bf16 %v3720_v21, %v3716_v18  ;;  %v3737_v6 = vpop.permute.xlu1 %3736  ;;  %v4545_v25 = vpack.c.bf16 %v3721_v30, %v3717_v23  ;;  %v3779_v27 = vmul.f32 %v3760_v60, %v8057_v24  ;;  %v3831_v19 = vsel %vm3818_vm15, %v7389_v44, %v7315_v15 }
 0xc6e   :  { %v3761_v32 = vsel %vm657_vm6, %v3737_v6, %v8114_v2  ;;  %v3765_v59 = vsel %vm657_vm6, %v8115_v48, %v3737_v6  ;;  %v3756_v51 = vsel %vm657_vm6, %v7235_v58, %v7283_v1  ;;  %v3768_v38 = vsel %vm657_vm6, %v7283_v1, %v8113_v29 }
 0xc6f   :  { %v3783_v56 = vmul.f32 %v3761_v32, %v8057_v24  ;;  %4476 = vmatpush1.bf16.msra.mxu0 %v4475_v43  ;;  %4546 = vmatprep.subr.bf16.mxu1 %v4545_v25  ;;  %v3859_v11 = vmul.f32 %v7387_v12, %v3823_v39  ;;  %v3778_v26 = vmul.f32 %v3764_v14, %v8051_v31  ;;  %v8116_v14 = vmov 0.0  }
 0xc70   :  { %4478 = vmatprep.subr.bf16.mxu0 %v4477_v52  ;;  %v3827_v24 = vsel %vm3818_vm15, %v7315_v15, %v7348_v49  ;;  %v3782_v36 = vmul.f32 %v3765_v59, %v8051_v31  ;;  %v3819_v1 = vsel %vm3818_vm15, %v7367_v55, %v7389_v44  ;;  %v3861_v18 = vmul.f32 %v7395_v46, %v3831_v19 }
 0xc71   :  { %4548 = vmatpush1.bf16.msra.mxu1 %v4547_v7  ;;  %v3753_v58 = vpop.permute.xlu1 %3752  ;;  %v4481_v13 = vpack.c.bf16 %v3783_v56, %v3779_v27  ;;  %v3780_v49 = vmul.f32 %v3756_v51, %v8059_v50  ;;  %v3781_v31 = vmul.f32 %v3768_v38, %v8063_v63  ;;  %v3858_v55 = vmul.f32 %v7384_v62, %v3827_v24 }
 0xc72   :  { %4550 = vmatprep.subr.bf16.mxu1 %v4549_v22  ;;  %v3757_v33 = vsel %vm657_vm6, %v8114_v2, %v3753_v58  ;;  %v3769_v15 = vsel %vm657_vm6, %v3753_v58, %v8115_v48  ;;  %v3825_v44 = vsel %vm3818_vm15, %v7521_v47, %v3807_v5  ;;  %v4485_v23 = vpack.c.bf16 %v7436_v17, %v3859_v11 }
 0xc73   :  { %v3784_v0 = vmul.f32 %v3757_v33, %v8059_v50  ;;  %v3785_v53 = vmul.f32 %v3769_v15, %v8063_v63  ;;  %4480 = vmatpush1.bf16.msra.mxu0 %v4479_v57  ;;  %v3860_v21 = vmul.f32 %v7392_v37, %v3819_v1  ;;  %v4483_v30 = vpack.c.bf16 %v3782_v36, %v3778_v26 }
 0xc74   :  { %4482 = vmatprep.subr.bf16.mxu0 %v4481_v13  ;;  %v3829_v63 = vsel %vm3818_vm15, %v7456_v10, %v7521_v47  ;;  %v4557_v17 = vpack.c.bf16 %v7527_v34, %v3861_v18  ;;  %v3821_v8 = vsel %vm3818_vm15, %v3807_v5, %v3815_v54  ;;  %v3263_v47 = vld [vmem:[%s7681_s12] sm:$0xff]  ;;  %v3833_v61 = vsel %vm3818_vm15, %v3815_v54, %v7456_v10  ;;  %s4767_s12 = scalar_lea.vmem %s4185_s21, 512 }
 0xc75   :  { %4552 = vmatpush1.bf16.msra.mxu1 %v4551_v40  ;;  %v4555_v9 = vpack.c.bf16 %v3784_v0, %v3780_v49  ;;  %v3801_v41 = vpop.permute.xlu1 %3800  ;;  %v4553_v50 = vpack.c.bf16 %v3785_v53, %v3781_v31  ;;  %v3867_v40 = vmul.f32 %v7387_v12, %v3825_v44  ;;  %v4487_v34 = vpack.c.bf16 %v7432_v45, %v3858_v55  ;;  %p4768_p12 = scmp.ne.s32.totalorder %s4185_s21, %s4767_s12  ;;  %p4773_p0 = scmp.lt.s32.totalorder %s4767_s12, %s4767_s12 }
 0xc76   :  { %v3826_v57 = vsel %vm3818_vm15, %v3801_v41, %v7373_v20  ;;  %v3830_v35 = vsel %vm3818_vm15, %v7365_v3, %v3801_v41  ;;  %v4559_v16 = vpack.c.bf16 %v7446_v4, %v3860_v21  ;;  %v3866_v39 = vmul.f32 %v7384_v62, %v3829_v63 }
 0xc77   :  { %v3871_v60 = vmul.f32 %v7387_v12, %v3826_v57  ;;  %4484 = vmatpush1.bf16.msra.mxu0 %v4483_v30  ;;  %4554 = vmatprep.subr.bf16.mxu1 %v4553_v50  ;;  %v3870_v42 = vmul.f32 %v7384_v62, %v3830_v35  ;;  %v3868_v43 = vmul.f32 %v7392_v37, %v3821_v8  ;;  %p4774_p1 = por %p4773_p0, %p4772_p13 }
 0xc78   :  { %4486 = vmatprep.subr.bf16.mxu0 %v4485_v23  ;;  %v3869_v45 = vmul.f32 %v7395_v46, %v3833_v61 }
 0xc79   :  { %4556 = vmatpush1.bf16.msra.mxu1 %v4555_v9  ;;  %v3817_v12 = vpop.permute.xlu1 %3816  ;;  %v4489_v52 = vpack.c.bf16 %v3871_v60, %v3867_v40  ;;  %v4491_v62 = vpack.c.bf16 %v3870_v42, %v3866_v39  ;;  %p4775_p2 = pnand %p4774_p1, %p4768_p12 }
 0xc7a   :  { %4558 = vmatprep.subr.bf16.mxu1 %v4557_v17  ;;  %v3822_v7 = vsel %vm3818_vm15, %v7373_v20, %v3817_v12  ;;  %v3834_v10 = vsel %vm3818_vm15, %v3817_v12, %v7365_v3  ;;  %3947 = vmatmul.mubr.f32.vlgmr.msra.gmra.mrb[8].mxu0 %v3263_v47  ;;  %v370_v3 = vpop.permute.xlu0 %369 }
 0xc7b   :  { %v3872_v4 = vmul.f32 %v7392_v37, %v3822_v7  ;;  %v3873_v6 = vmul.f32 %v7395_v46, %v3834_v10  ;;  %4488 = vmatpush1.bf16.msra.mxu0 %v4487_v34  ;;  %4017 = vmatprep.mubr.f32.mxu0 %v8116_v14 }
 0xc7c   :  { %4089 = vmatmul.mubr.f32.vlgmr.msra.gmra.mrb[8].mxu1 %v3263_v47  ;;  %4490 = vmatprep.subr.bf16.mxu0 %v4489_v52 }
 0xc7d   :  { %4560 = vmatpush1.bf16.msra.mxu1 %v4559_v16  ;;  %v4563_v25 = vpack.c.bf16 %v3872_v4, %v3868_v43  ;;  %v4561_v29 = vpack.c.bf16 %v3873_v6, %v3869_v45  ;;  %4159 = vmatprep.mubr.f32.mxu1 %v8116_v14 }
 0xc7f   :  { %4492 = vmatpush1.bf16.msra.mxu0 %v4491_v62  ;;  %4562 = vmatprep.subr.bf16.mxu1 %v4561_v29 }
 0xc81   :  { %4564 = vmatpush1.bf16.msra.mxu1 %v4563_v25 }
 0xc82   :  { %4227 = vmatmul.mubr.msk.f32.vlgmr.msra.gmra.mrb[8].mxu0 %vm3878_vm2, %v3265_v28 }
 0xc84   :  { %4228 = vmatmul.mubr.msk.f32.vlgmr.msra.gmra.mrb[8].mxu1 %vm3878_vm2, %v3265_v28 }
 0xc8a   :  { %v3876_v20 = vpop.permute.xlu1 %3875 }
 0xc8b   :  { %v4565_v37 = vadd.f32 %v3876_v20, %v370_v3 }
 0xd55   :  { %v4019_v46 = vpop.f32.mrb[8].mxu0 }
 0xd56   :  { %v4566_v5 = vadd.f32 %v4565_v37, %v4019_v46  ;;  %v4021_v2 = vpop.f32.mrb[9].mxu0 }
 0xd57   :  { %v4161_v32 = vpop.f32.mrb[8].mxu1  ;;  %v4568_v48 = vadd.f32 %v4565_v37, %v4021_v2 }
 0xd58   :  { %v4570_v59 = vadd.f32 %v4565_v37, %v4161_v32  ;;  %v4163_v22 = vpop.f32.mrb[9].mxu1  ;;  %v4170_v27 = vmax.f32 %v4566_v5, 0.0 }
 0xd59   :  { %v4572_v19 = vadd.f32 %v4565_v37, %v4163_v22  ;;  %v4171_v56 = vmax.f32 %v4568_v48, 0.0 }
 0xd5a   :  { %v4172_v51 = vmax.f32 %v4570_v59, 0.0  ;;  %4174 = vst [vmem:[#allocation11] sm:$0xff] %v4170_v27 }
 0xd5b   :  { %v4173_v38 = vmax.f32 %v4572_v19, 0.0  ;;  %4175 = vst [vmem:[#allocation11 + $0x8] sm:$0xff] %v4171_v56 }
 0xd5c   :  { %4176 = vst [vmem:[#allocation11 + $0x10] sm:$0xff] %v4172_v51 }
 0xd5d   :  { %4177 = vst [vmem:[#allocation11 + $0x18] sm:$0xff] %v4173_v38 }
 0xd5e   :  { %4778 = shalt.err (!%p4775_p2)
}
 0xd5f   :  { %s4779_s24 = scalar_lea.hbm %s7683_s14, 512 }
 0xd60   :  { %p4780_p3 = scmp.ne.s32.totalorder %s7683_s14, %s4779_s24  ;;  %p4783_p4 = scmp.lt.u32.totalorder %s4779_s24, %s7683_s14 }
 0xd62   :  { %p4785_p5 = pnand %p4783_p4, %p4780_p3 }
 0xd64   :  { %4788 = shalt.err (!%p4785_p5)
}
 0xd65   :  { %4187 = dma.vmem_to_hbm [thread:$0]  %s4185_s21, 512, %s7683_s14, [#allocation4]  }
 0xd66   :  { %4795 = dma.done.wait [#allocation4], 512  }
 0xd67   :  { %4796 = vsyncadd [#allocation4], 4294966784 }
 0xd68   :  { %4191 = vsyncpa [#allocation3], 1 }
 0xd69   :  { %4192 = vsyncpa [#allocation6], 1 }
 0xd6a   :  { %4193 = vsyncpa [#allocation9], 1 }
 0xd6b   :  { %4194 = vsyncpa [#allocation4], 1 }

</bundles_post_ra>
